<compile_context>
chip_gen: v7x
topology: tpu7x:2x2x1
jax: 0.10.0
libtpu: 0.0.40
codegen_flags: <defaults>
</compile_context>

<pallas_src>
import math

import jax
import jax.numpy as jnp
from jax import lax
from jax.experimental import pallas as pl
from jax.experimental.pallas import tpu as pltpu


_COMPUTE_DTYPE = jnp.bfloat16   # MXU operand dtype (accumulation is always f32)
_PAD_TAIL = 8                   # zero tail rows after the flattened (h*w) image so the
                                # shifted 3x3-tap slices stay in bounds; >= 2 is required
assert _PAD_TAIL >= 2, "tap slices read at most 2 rows past the image; need pad >= 2"


def _vmem_budget_bytes():
    """Generation-aware scoped-VMEM budget (v5e/v6e: 128 MiB physical, v7x: 64 MiB)."""
    phys = 128 * 1024 * 1024
    try:
        phys = int(getattr(pltpu.get_tpu_info(), "vmem_capacity_bytes", phys))
    except Exception:
        pass
    return min(phys * 3 // 4, 100 * 1024 * 1024)


# ---------------------------------------------------------------------------
# Kernel 1: ConvTranspose2d(kernel_size=2, stride=2)
# ---------------------------------------------------------------------------
def _up_kernel(x_ref, w_ref, b_ref, o_ref):
    # x_ref: (R, W, Cin)            R low-res rows (bf16)
    # w_ref: (Cin, 4*Cout)          columns ordered (di, dj, co) (bf16)
    # b_ref: (1, 4*Cout)            bias tiled over (di, dj) (f32)
    # o_ref: (R, 2, W, 2*Cout)      raw output layout (r, di, w, dj*Cout + co) (bf16)
    R, W, Cin = x_ref.shape
    n4 = w_ref.shape[-1]
    n2 = n4 // 2
    x = x_ref[...].reshape(R * W, Cin)
    # One fused MXU matmul for both output-row parities (halves MXU pushes vs two dots).
    y = jnp.dot(x, w_ref[...], preferred_element_type=jnp.float32) + b_ref[...]
    y = y.astype(o_ref.dtype)
    o_ref[:, 0, :, :] = y[:, :n2].reshape(R, W, n2)     # di = 0 rows
    o_ref[:, 1, :, :] = y[:, n2:].reshape(R, W, n2)     # di = 1 rows


def conv_transpose_2x2(x_nhwc, w_iohw, bias):
    """ConvTranspose2d(k=2, s=2): NHWC (N,H,W,Cin) -> NHWC (N,2H,2W,Cout), bf16."""
    N, H, W, Cin = x_nhwc.shape
    Cout = w_iohw.shape[1]
    # w[ci, (di*2 + dj)*Cout + co] = w_iohw[ci, co, di, dj]
    w = jnp.transpose(w_iohw, (0, 2, 3, 1)).reshape(Cin, 4 * Cout).astype(_COMPUTE_DTYPE)
    b = jnp.tile(bias.astype(jnp.float32), 4).reshape(1, 4 * Cout)
    x_rows = x_nhwc.reshape(N * H, W, Cin).astype(_COMPUTE_DTYPE)

    rows = N * H
    budget = _vmem_budget_bytes()
    # Batch R rows per grid step: amortizes ~0.35us/step pipeline overhead and fills the
    # MXU M dimension (target R*W >= 256), capped by the VMEM budget.
    r_tgt = max(8, -(-256 // W))
    per_row_bytes = 2 * W * (Cin + 4 * Cout) * 2          # double-buffered bf16 in + out
    r_cap = max(1, (budget // 3) // max(per_row_bytes, 1))
    R = max(1, min(rows, r_tgt, r_cap))
    grid0 = -(-rows // R)

    flops = 2 * rows * W * Cin * 4 * Cout
    bytes_accessed = x_rows.size * 2 + w.size * 2 + b.size * 4 + rows * W * 4 * Cout * 2

    out_raw = pl.pallas_call(
        _up_kernel,
        out_shape=jax.ShapeDtypeStruct((rows, 2, W, 2 * Cout), _COMPUTE_DTYPE),
        grid_spec=pltpu.PrefetchScalarGridSpec(
            num_scalar_prefetch=0,
            grid=(grid0,),
            in_specs=[
                pl.BlockSpec((R, W, Cin), lambda r: (r, 0, 0)),
                pl.BlockSpec((Cin, 4 * Cout), lambda r: (0, 0)),    # resident weights
                pl.BlockSpec((1, 4 * Cout), lambda r: (0, 0)),      # resident bias
            ],
            out_specs=pl.BlockSpec((R, 2, W, 2 * Cout), lambda r: (r, 0, 0, 0)),
        ),
        compiler_params=pltpu.CompilerParams(
            dimension_semantics=("parallel",),
            vmem_limit_bytes=budget),
        cost_estimate=pl.CostEstimate(flops=int(flops), transcendentals=0,
                                      bytes_accessed=int(bytes_accessed)),
    )(x_rows, w, b)
    # Row-major order of (n*H + h, di, w, dj, co) IS (n, 2h+di, 2w+dj, co): free reshape.
    return out_raw.reshape(N, 2 * H, 2 * W, Cout)


# ---------------------------------------------------------------------------
# Kernel 2: fused  concat -> conv3x3(valid)+ReLU -> conv3x3(valid)+ReLU  (row-tiled)
# ---------------------------------------------------------------------------
def _make_fused_kernel(T, Wc, C1, C2, Co):
    Ctot = C1 + C2
    Tw = T * Wc                 # rows delivered by the "current tile" input blocks
    Hw = (T + 4) * Wc           # real input rows per tile (incl. the 4-row halo)
    M1 = (T + 2) * Wc           # conv1 rows computed (width over-computed to Wc)
    M2 = T * Wc                 # conv2 rows computed
    pad = _PAD_TAIL

    def kernel(skip_c, skip_h, up_c, up_h, w1_ref, b1_ref, w2_ref, b2_ref,
               out_ref, x_scr, h1_scr):
        # skip_c/up_c: (1, T*Wc, C)  current-tile rows;  skip_h/up_h: (1, 4*Wc, C) halo
        # w1_ref: (9, C1+C2, Co)  w2_ref: (9, Co, Co)  (bf16);  b*_ref: (1, Co) f32
        # x_scr:  ((T+4)*Wc + pad, C1+C2) bf16  channel-concat input (never hits HBM)
        # h1_scr: ((T+2)*Wc + pad, Co) bf16     conv1 activation (never hits HBM)

        # Channel concat + halo append done as VMEM->VMEM copies (no HBM concat / pad).
        x_scr[0:Tw, 0:C1] = skip_c[0]
        x_scr[Tw:Hw, 0:C1] = skip_h[0]
        x_scr[0:Tw, C1:Ctot] = up_c[0]
        x_scr[Tw:Hw, C1:Ctot] = up_h[0]
        x_scr[Hw:Hw + pad, :] = jnp.zeros((pad, Ctot), x_scr.dtype)

        # conv1: 9 shifted-slice taps, K = C1+C2 per dot; 3 independent partial
        # accumulators (one per dy) give the scheduler ILP instead of one long chain.
        parts = []
        for dy in range(3):
            p = jnp.dot(x_scr[pl.ds(dy * Wc + 0, M1), :], w1_ref[dy * 3 + 0],
                        preferred_element_type=jnp.float32)
            p = p + jnp.dot(x_scr[pl.ds(dy * Wc + 1, M1), :], w1_ref[dy * 3 + 1],
                            preferred_element_type=jnp.float32)
            p = p + jnp.dot(x_scr[pl.ds(dy * Wc + 2, M1), :], w1_ref[dy * 3 + 2],
                            preferred_element_type=jnp.float32)
            parts.append(p)
        acc1 = (parts[0] + parts[1]) + parts[2] + b1_ref[...]
        h1_scr[0:M1, :] = jnp.maximum(acc1, 0.0).astype(h1_scr.dtype)
        h1_scr[M1:M1 + pad, :] = jnp.zeros((pad, Co), h1_scr.dtype)

        # conv2 on the VMEM-resident conv1 activation.
        parts = []
        for dy in range(3):
            p = jnp.dot(h1_scr[pl.ds(dy * Wc + 0, M2), :], w2_ref[dy * 3 + 0],
                        preferred_element_type=jnp.float32)
            p = p + jnp.dot(h1_scr[pl.ds(dy * Wc + 1, M2), :], w2_ref[dy * 3 + 1],
                            preferred_element_type=jnp.float32)
            p = p + jnp.dot(h1_scr[pl.ds(dy * Wc + 2, M2), :], w2_ref[dy * 3 + 2],
                            preferred_element_type=jnp.float32)
            parts.append(p)
        acc2 = (parts[0] + parts[1]) + parts[2] + b2_ref[...]
        # TODO(synk): lane-flatten this store when Co < 128 (masked vst otherwise).
        out_ref[0] = jnp.maximum(acc2, 0.0).astype(out_ref.dtype)

    return kernel


def fused_concat_double_conv(skip_nhwc, up_nhwc, w1_oihw, b1, w2_oihw, b2,
                             out_dtype=jnp.float32):
    """torch.cat([skip, up], C) -> Conv3x3 valid + ReLU -> Conv3x3 valid + ReLU."""
    N, Hc, Wc, C1 = skip_nhwc.shape
    C2 = up_nhwc.shape[-1]
    Co = w1_oihw.shape[0]
    Ctot = C1 + C2
    assert up_nhwc.shape[:3] == (N, Hc, Wc)
    assert w1_oihw.shape == (Co, Ctot, 3, 3) and w2_oihw.shape == (Co, Co, 3, 3)
    # Over-compute-then-crop invariant: with two stacked 3x3 VALID convs, a kept conv2
    # column w < Wc-4 reads conv1 columns <= Wc-3, never the two wrap-contaminated
    # columns Wc-2, Wc-1, so computing full-width rows and cropping later is safe.
    assert Wc % 2 == 0 and Hc % 2 == 0 and Hc >= 8 and Wc >= 6
    H2o, W2o = Hc - 4, Wc - 4

    budget = _vmem_budget_bytes()
    out_itemsize = int(jnp.dtype(out_dtype).itemsize)

    # ---- output-row tiling (4-row halo): choose T (multiple of 4) within the budget ----
    bytes_per_out_row = Wc * (2 * 2 * Ctot               # skip+up current blocks, 2x buf, bf16
                              + 2 * out_itemsize * Co    # output block, 2x buffered
                              + 2 * Ctot + 2 * Co)       # x_scr + h1_scr (bf16)
    fixed = (2 * 2 * (9 * Ctot * Co + 9 * Co * Co)       # weights, 2x buffered, bf16
             + 2 * 2 * 4 * Wc * Ctot                     # halo blocks
             + (2 << 20))                                # slack for internal scratch
    t_cap = max(4, (budget * 3 // 4 - fixed) // max(bytes_per_out_row, 1))
    T = max(4, (min(int(t_cap), H2o) // 4) * 4)
    # Prefer a nearby evenly-dividing tile (avoids a ragged, over-computed last tile).
    for cand in range(T, max(3, T - 12), -4):
        if H2o % cand == 0:
            T = cand
            break
    K = -(-H2o // T)

    kernel = _make_fused_kernel(T, Wc, C1, C2, Co)

    # Flatten (h, w) into one row axis (contiguous, free reshape). No jnp.pad any more:
    # the zero tail lives in the kernel's VMEM scratch.
    skip_flat = skip_nhwc.reshape(N, Hc * Wc, C1).astype(_COMPUTE_DTYPE)
    up_flat = up_nhwc.reshape(N, Hc * Wc, C2).astype(_COMPUTE_DTYPE)

    # Conv weights OIHW -> (tap, Cin, Cout); conv1 kept whole (K = C1+C2 per tap dot).
    w1 = jnp.transpose(w1_oihw, (2, 3, 1, 0)).reshape(9, Ctot, Co).astype(_COMPUTE_DTYPE)
    w2 = jnp.transpose(w2_oihw, (2, 3, 1, 0)).reshape(9, Co, Co).astype(_COMPUTE_DTYPE)
    b1m = b1.reshape(1, Co).astype(jnp.float32)
    b2m = b2.reshape(1, Co).astype(jnp.float32)

    t4 = T // 4
    max_halo_blk = -(-Hc // 4) - 1      # last valid 4-row block along the flattened rows

    def cur_map(n, i):
        return (n, i, 0)

    def halo_map(n, i):
        # Halo = input rows [(i+1)*T, (i+1)*T + 4). The clamp only engages when
        # (i+1)*T >= Hc, in which case those rows only feed dropped output rows.
        return (n, jnp.minimum((i + 1) * t4, max_halo_blk), 0)

    flops = 2 * 9 * N * ((H2o + 2) * Wc * Ctot * Co + H2o * Wc * Co * Co)
    bytes_accessed = ((skip_flat.size + up_flat.size) * 2 + (w1.size + w2.size) * 2
                      + N * H2o * Wc * Co * out_itemsize)

    # TODO(synk): fuse the transposed-conv upsample into this kernel (compute `up` rows per
    # tile from x2 in VMEM) to remove the HBM round trip of the largest intermediate.
    # TODO(synk): fold the PadToAgree crop of `skip` into the tile copy (needs an
    # element-offset row window); today it is one fused slice copy in the wrapper.
    # TODO(synk): pipeline_mode=pl.Buffered(1) on the constant weight/bias specs once
    # single-buffered inputs are confirmed supported by the pipeline emitter.
    out_flat = pl.pallas_call(
        kernel,
        out_shape=jax.ShapeDtypeStruct((N, H2o * Wc, Co), out_dtype),
        grid_spec=pltpu.PrefetchScalarGridSpec(
            num_scalar_prefetch=0,
            grid=(N, K),
            in_specs=[
                pl.BlockSpec((1, T * Wc, C1), cur_map),    # skip: current tile rows
                pl.BlockSpec((1, 4 * Wc, C1), halo_map),   # skip: 4-row halo
                pl.BlockSpec((1, T * Wc, C2), cur_map),    # up:   current tile rows
                pl.BlockSpec((1, 4 * Wc, C2), halo_map),   # up:   4-row halo
                pl.BlockSpec((9, Ctot, Co), lambda n, i: (0, 0, 0)),  # resident weights
                pl.BlockSpec((1, Co), lambda n, i: (0, 0)),
                pl.BlockSpec((9, Co, Co), lambda n, i: (0, 0, 0)),
                pl.BlockSpec((1, Co), lambda n, i: (0, 0)),
            ],
            out_specs=pl.BlockSpec((1, T * Wc, Co), cur_map),
            scratch_shapes=[
                pltpu.VMEM(((T + 4) * Wc + _PAD_TAIL, Ctot), _COMPUTE_DTYPE),
                pltpu.VMEM(((T + 2) * Wc + _PAD_TAIL, Co), _COMPUTE_DTYPE),
            ],
        ),
        compiler_params=pltpu.CompilerParams(
            dimension_semantics=("parallel", "parallel"),   # batch x row-tiles (megacore)
            vmem_limit_bytes=budget),
        cost_estimate=pl.CostEstimate(flops=int(flops), transcendentals=0,
                                      bytes_accessed=int(bytes_accessed)),
    )(skip_flat, skip_flat, up_flat, up_flat, w1, b1m, w2, b2m)

    # Width was over-computed to Wc; the crop of the two wrap columns fuses with the final
    # NHWC->NCHW transpose in the caller, so it costs no extra HBM pass.
    return out_flat.reshape(N, H2o, Wc, Co)[:, :, :W2o, :]


# ---------------------------------------------------------------------------
# PadToAgree (pure indexing glue) and module forward
# ---------------------------------------------------------------------------
def _pad_axis(x, axis, lo, hi):
    """F.pad semantics on one axis: negative amounts crop, positive zero-pad."""
    if lo < 0:
        x = lax.slice_in_dim(x, -lo, x.shape[axis], axis=axis)
        lo = 0
    if hi < 0:
        x = lax.slice_in_dim(x, 0, x.shape[axis] + hi, axis=axis)
        hi = 0
    if lo > 0 or hi > 0:
        cfg = [(0, 0)] * x.ndim
        cfg[axis] = (lo, hi)
        x = jnp.pad(x, cfg)
    return x


def pad_to_agree_nhwc(x1, x2):
    """Pad/crop x1 spatially to x2's spatial shape (matches the PyTorch PadToAgree)."""
    off_h = (x2.shape[1] - x1.shape[1]) / 2   # NHWC axis 1 == NCHW dim -2
    off_w = (x2.shape[2] - x1.shape[2]) / 2   # NHWC axis 2 == NCHW dim -1
    x1 = _pad_axis(x1, 2, math.floor(off_w), math.ceil(off_w))
    x1 = _pad_axis(x1, 1, math.floor(off_h), math.ceil(off_h))
    return x1


def init_unet_up_params(key, in_size, out_size):
    ks = jax.random.split(key, 6)
    s = 0.1
    return dict(
        up_w=jax.random.normal(ks[0], (in_size, out_size, 2, 2), jnp.float32) * s,  # (I,O,kH,kW)
        up_b=jax.random.normal(ks[1], (out_size,), jnp.float32) * s,
        c1_w=jax.random.normal(ks[2], (out_size, in_size, 3, 3), jnp.float32) * s,  # (O,I,kH,kW)
        c1_b=jax.random.normal(ks[3], (out_size,), jnp.float32) * s,
        c2_w=jax.random.normal(ks[4], (out_size, out_size, 3, 3), jnp.float32) * s,
        c2_b=jax.random.normal(ks[5], (out_size,), jnp.float32) * s,
    )


def unet_up_forward(params, inputs1_nchw, inputs2_nchw):
    x1 = jnp.transpose(inputs1_nchw, (0, 2, 3, 1))   # NCHW -> NHWC (boundary only)
    x2 = jnp.transpose(inputs2_nchw, (0, 2, 3, 1))
    up = conv_transpose_2x2(x2, params["up_w"], params["up_b"])           # Pallas kernel 1
    skip = pad_to_agree_nhwc(x1, up)                                      # indexing glue
    out = fused_concat_double_conv(skip, up,
                                   params["c1_w"], params["c1_b"],
                                   params["c2_w"], params["c2_b"])        # Pallas kernel 2
    return jnp.transpose(out, (0, 3, 1, 2))                               # back to NCHW


# ---------------------------------------------------------------------------
# Pure-JAX f32 reference (for verification)
# ---------------------------------------------------------------------------
def unet_up_reference(params, inputs1_nchw, inputs2_nchw):
    x1 = jnp.transpose(inputs1_nchw, (0, 2, 3, 1))
    x2 = jnp.transpose(inputs2_nchw, (0, 2, 3, 1))
    N, H, W, _ = x2.shape
    Cout = params["up_w"].shape[1]
    out2 = jnp.einsum("nhwc,coij->nhiwjo", x2, params["up_w"])
    out2 = out2.reshape(N, 2 * H, 2 * W, Cout) + params["up_b"]
    out1 = pad_to_agree_nhwc(x1, out2)
    cat = jnp.concatenate([out1, out2], axis=-1)
    dn = ("NHWC", "HWIO", "NHWC")
    w1 = jnp.transpose(params["c1_w"], (2, 3, 1, 0))
    w2 = jnp.transpose(params["c2_w"], (2, 3, 1, 0))
    h = lax.conv_general_dilated(cat, w1, (1, 1), "VALID", dimension_numbers=dn)
    h = jnp.maximum(h + params["c1_b"], 0.0)
    h = lax.conv_general_dilated(h, w2, (1, 1), "VALID", dimension_numbers=dn)
    h = jnp.maximum(h + params["c2_b"], 0.0)
    return jnp.transpose(h, (0, 3, 1, 2))


if __name__ == "__main__":
    key = jax.random.PRNGKey(0)
    kp, k1, k2 = jax.random.split(key, 3)

    in_size, out_size = 8, 4
    params = init_unet_up_params(kp, in_size, out_size)

    # inputs1: skip connection (N, in_size - out_size, 20, 20); inputs2: (N, in_size, 8, 8)
    inputs1 = jax.random.normal(k1, (2, in_size - out_size, 20, 20), jnp.float32)
    inputs2 = jax.random.normal(k2, (2, in_size, 8, 8), jnp.float32)

    fwd = jax.jit(unet_up_forward)
    out = jax.block_until_ready(fwd(params, inputs1, inputs2))

    assert out.shape == (2, out_size, 12, 12), out.shape
    ref = unet_up_reference(params, inputs1, inputs2)
    err = float(jnp.max(jnp.abs(out - ref)))
    assert jnp.allclose(out, ref, atol=3e-2, rtol=3e-2), err  # bf16 operands, f32 accumulation

    print("KERNEL_OK")
</pallas_src>

<mosaic_0001>
module attributes {stable_mosaic.version = 11 : i64} {
  func.func @_up_kernel(%arg0: i32, %arg1: memref<16x8x8xbf16, #tpu.memory_space<vmem>>, %arg2: memref<8x16xbf16, #tpu.memory_space<vmem>>, %arg3: memref<1x16xf32, #tpu.memory_space<vmem>>, %arg4: memref<16x2x8x8xbf16, #tpu.memory_space<vmem>>) attributes {dimension_semantics = [#tpu.dimension_semantics<parallel>], iteration_bounds = array<i64: 1>, scalar_prefetch = 0 : i64, scratch_operands = 0 : i64, tpu.core_type = #tpu.core_type<tc>, window_params = [{transform_indices = @transform_0, window_bounds = array<i64: 16, 8, 8>}, {pipeline_mode = #tpu.pipeline_mode<synchronous>, transform_indices = @transform_1, window_bounds = array<i64: 8, 16>}, {pipeline_mode = #tpu.pipeline_mode<synchronous>, transform_indices = @transform_2, window_bounds = array<i64: 1, 16>}, {transform_indices = @transform_3, window_bounds = array<i64: 16, 2, 8, 8>}]} {
    %c0 = arith.constant 0 : index
    %c0_0 = arith.constant 0 : index
    %c0_1 = arith.constant 0 : index
    %0 = vector.load %arg1[%c0, %c0_0, %c0_1] : memref<16x8x8xbf16, #tpu.memory_space<vmem>>, vector<16x8x8xbf16>
    %1 = vector.shape_cast %0 : vector<16x8x8xbf16> to vector<128x8xbf16>
    %c0_2 = arith.constant 0 : index
    %c0_3 = arith.constant 0 : index
    %2 = vector.load %arg2[%c0_2, %c0_3] : memref<8x16xbf16, #tpu.memory_space<vmem>>, vector<8x16xbf16>
    %cst = arith.constant dense<0.000000e+00> : vector<128x16xf32>
    %3 = tpu.matmul %1, %2, %cst {dimension_numbers = #tpu.dot_dimension_numbers<[1], [0], [0], [1], [0, 0, 1, 1], [], []>} : vector<128x8xbf16>, vector<8x16xbf16>, vector<128x16xf32> -> vector<128x16xf32>
    %c0_4 = arith.constant 0 : index
    %c0_5 = arith.constant 0 : index
    %4 = vector.load %arg3[%c0_4, %c0_5] : memref<1x16xf32, #tpu.memory_space<vmem>>, vector<1x16xf32>
    %5 = vector.broadcast %4 : vector<1x16xf32> to vector<128x16xf32>
    %6 = arith.addf %3, %5 : vector<128x16xf32>
    %7 = arith.truncf %6 : vector<128x16xf32> to vector<128x16xbf16>
    %8 = vector.extract_strided_slice %7 {offsets = [0, 0], sizes = [128, 8], strides = [1, 1]} : vector<128x16xbf16> to vector<128x8xbf16>
    %9 = vector.shape_cast %8 : vector<128x8xbf16> to vector<16x8x8xbf16>
    %c0_6 = arith.constant 0 : index
    %c0_7 = arith.constant 0 : index
    %c0_8 = arith.constant 0 : index
    %c0_9 = arith.constant 0 : index
    %10 = vector.load %arg4[%c0_6, %c0_7, %c0_8, %c0_9] : memref<16x2x8x8xbf16, #tpu.memory_space<vmem>>, vector<16x1x8x8xbf16>
    %11 = vector.shape_cast %10 : vector<16x1x8x8xbf16> to vector<16x8x8xbf16>
    %12 = vector.shape_cast %9 : vector<16x8x8xbf16> to vector<16x1x8x8xbf16>
    tpu.vector_store %arg4[%c0_6, %c0_7, %c0_8, %c0_9], %12 {strides = array<i32>} : memref<16x2x8x8xbf16, #tpu.memory_space<vmem>>, vector<16x1x8x8xbf16>,
    %13 = vector.extract_strided_slice %7 {offsets = [0, 8], sizes = [128, 8], strides = [1, 1]} : vector<128x16xbf16> to vector<128x8xbf16>
    %14 = vector.shape_cast %13 : vector<128x8xbf16> to vector<16x8x8xbf16>
    %c0_10 = arith.constant 0 : index
    %c1 = arith.constant 1 : index
    %c0_11 = arith.constant 0 : index
    %c0_12 = arith.constant 0 : index
    %15 = vector.load %arg4[%c0_10, %c1, %c0_11, %c0_12] : memref<16x2x8x8xbf16, #tpu.memory_space<vmem>>, vector<16x1x8x8xbf16>
    %16 = vector.shape_cast %15 : vector<16x1x8x8xbf16> to vector<16x8x8xbf16>
    %17 = vector.shape_cast %14 : vector<16x8x8xbf16> to vector<16x1x8x8xbf16>
    tpu.vector_store %arg4[%c0_10, %c1, %c0_11, %c0_12], %17 {strides = array<i32>} : memref<16x2x8x8xbf16, #tpu.memory_space<vmem>>, vector<16x1x8x8xbf16>,
    return
  }
  func.func @transform_0(%arg0: i32) -> (i32, i32, i32) {
    %c0_i32 = arith.constant 0 : i32
    %c0_i32_0 = arith.constant 0 : i32
    %c0_i32_1 = arith.constant 0 : i32
    return %arg0, %c0_i32, %c0_i32_0 : i32, i32, i32
  }
  func.func @transform_1(%arg0: i32) -> (i32, i32) {
    %c0_i32 = arith.constant 0 : i32
    %c0_i32_0 = arith.constant 0 : i32
    %c0_i32_1 = arith.constant 0 : i32
    return %c0_i32, %c0_i32_0 : i32, i32
  }
  func.func @transform_2(%arg0: i32) -> (i32, i32) {
    %c0_i32 = arith.constant 0 : i32
    %c0_i32_0 = arith.constant 0 : i32
    %c0_i32_1 = arith.constant 0 : i32
    return %c0_i32, %c0_i32_0 : i32, i32
  }
  func.func @transform_3(%arg0: i32) -> (i32, i32, i32, i32) {
    %c0_i32 = arith.constant 0 : i32
    %c0_i32_0 = arith.constant 0 : i32
    %c0_i32_1 = arith.constant 0 : i32
    %c0_i32_2 = arith.constant 0 : i32
    return %arg0, %c0_i32, %c0_i32_0, %c0_i32_1 : i32, i32, i32, i32
  }
}

module attributes {stable_mosaic.version = 11 : i64} {
  func.func @kernel(%arg0: i32, %arg1: i32, %arg2: memref<1x192x4xbf16, #tpu.memory_space<vmem>>, %arg3: memref<1x64x4xbf16, #tpu.memory_space<vmem>>, %arg4: memref<1x192x4xbf16, #tpu.memory_space<vmem>>, %arg5: memref<1x64x4xbf16, #tpu.memory_space<vmem>>, %arg6: memref<9x8x4xbf16, #tpu.memory_space<vmem>>, %arg7: memref<1x4xf32, #tpu.memory_space<vmem>>, %arg8: memref<9x4x4xbf16, #tpu.memory_space<vmem>>, %arg9: memref<1x4xf32, #tpu.memory_space<vmem>>, %arg10: memref<1x192x4xf32, #tpu.memory_space<vmem>>, %arg11: memref<264x8xbf16, #tpu.memory_space<vmem>>, %arg12: memref<232x4xbf16, #tpu.memory_space<vmem>>) attributes {dimension_semantics = [#tpu.dimension_semantics<parallel>, #tpu.dimension_semantics<parallel>], iteration_bounds = array<i64: 2, 1>, scalar_prefetch = 0 : i64, scratch_operands = 2 : i64, tpu.core_type = #tpu.core_type<tc>, window_params = [{transform_indices = @transform_0, window_bounds = array<i64: 1, 192, 4>}, {transform_indices = @transform_1, window_bounds = array<i64: 1, 64, 4>}, {transform_indices = @transform_2, window_bounds = array<i64: 1, 192, 4>}, {transform_indices = @transform_3, window_bounds = array<i64: 1, 64, 4>}, {pipeline_mode = #tpu.pipeline_mode<synchronous>, transform_indices = @transform_4, window_bounds = array<i64: 9, 8, 4>}, {pipeline_mode = #tpu.pipeline_mode<synchronous>, transform_indices = @transform_5, window_bounds = array<i64: 1, 4>}, {pipeline_mode = #tpu.pipeline_mode<synchronous>, transform_indices = @transform_6, window_bounds = array<i64: 9, 4, 4>}, {pipeline_mode = #tpu.pipeline_mode<synchronous>, transform_indices = @transform_7, window_bounds = array<i64: 1, 4>}, {transform_indices = @transform_8, window_bounds = array<i64: 1, 192, 4>}]} {
    %c0 = arith.constant 0 : index
    %c0_0 = arith.constant 0 : index
    %c0_1 = arith.constant 0 : index
    %0 = vector.load %arg2[%c0, %c0_0, %c0_1] : memref<1x192x4xbf16, #tpu.memory_space<vmem>>, vector<1x192x4xbf16>
    %1 = vector.shape_cast %0 : vector<1x192x4xbf16> to vector<192x4xbf16>
    %c0_2 = arith.constant 0 : index
    %c0_3 = arith.constant 0 : index
    %2 = vector.load %arg11[%c0_2, %c0_3] : memref<264x8xbf16, #tpu.memory_space<vmem>>, vector<192x4xbf16>
    tpu.vector_store %arg11[%c0_2, %c0_3], %1 {strides = array<i32>} : memref<264x8xbf16, #tpu.memory_space<vmem>>, vector<192x4xbf16>,
    %c0_4 = arith.constant 0 : index
    %c0_5 = arith.constant 0 : index
    %c0_6 = arith.constant 0 : index
    %3 = vector.load %arg3[%c0_4, %c0_5, %c0_6] : memref<1x64x4xbf16, #tpu.memory_space<vmem>>, vector<1x64x4xbf16>
    %4 = vector.shape_cast %3 : vector<1x64x4xbf16> to vector<64x4xbf16>
    %c192 = arith.constant 192 : index
    %c0_7 = arith.constant 0 : index
    %5 = vector.load %arg11[%c192, %c0_7] : memref<264x8xbf16, #tpu.memory_space<vmem>>, vector<64x4xbf16>
    tpu.vector_store %arg11[%c192, %c0_7], %4 {strides = array<i32>} : memref<264x8xbf16, #tpu.memory_space<vmem>>, vector<64x4xbf16>,
    %c0_8 = arith.constant 0 : index
    %c0_9 = arith.constant 0 : index
    %c0_10 = arith.constant 0 : index
    %6 = vector.load %arg4[%c0_8, %c0_9, %c0_10] : memref<1x192x4xbf16, #tpu.memory_space<vmem>>, vector<1x192x4xbf16>
    %7 = vector.shape_cast %6 : vector<1x192x4xbf16> to vector<192x4xbf16>
    %c0_11 = arith.constant 0 : index
    %c4 = arith.constant 4 : index
    %8 = vector.load %arg11[%c0_11, %c4] : memref<264x8xbf16, #tpu.memory_space<vmem>>, vector<192x4xbf16>
    tpu.vector_store %arg11[%c0_11, %c4], %7 {strides = array<i32>} : memref<264x8xbf16, #tpu.memory_space<vmem>>, vector<192x4xbf16>,
    %c0_12 = arith.constant 0 : index
    %c0_13 = arith.constant 0 : index
    %c0_14 = arith.constant 0 : index
    %9 = vector.load %arg5[%c0_12, %c0_13, %c0_14] : memref<1x64x4xbf16, #tpu.memory_space<vmem>>, vector<1x64x4xbf16>
    %10 = vector.shape_cast %9 : vector<1x64x4xbf16> to vector<64x4xbf16>
    %c192_15 = arith.constant 192 : index
    %c4_16 = arith.constant 4 : index
    %11 = vector.load %arg11[%c192_15, %c4_16] : memref<264x8xbf16, #tpu.memory_space<vmem>>, vector<64x4xbf16>
    tpu.vector_store %arg11[%c192_15, %c4_16], %10 {strides = array<i32>} : memref<264x8xbf16, #tpu.memory_space<vmem>>, vector<64x4xbf16>,
    %cst = arith.constant 0.000000e+00 : bf16
    %12 = vector.broadcast %cst : bf16 to vector<8x8xbf16>
    %c256 = arith.constant 256 : index
    %c0_17 = arith.constant 0 : index
    %13 = vector.load %arg11[%c256, %c0_17] : memref<264x8xbf16, #tpu.memory_space<vmem>>, vector<8x8xbf16>
    tpu.vector_store %arg11[%c256, %c0_17], %12 {strides = array<i32>} : memref<264x8xbf16, #tpu.memory_space<vmem>>, vector<8x8xbf16>,
    %c0_18 = arith.constant 0 : index
    %c0_19 = arith.constant 0 : index
    %14 = vector.load %arg11[%c0_18, %c0_19] : memref<264x8xbf16, #tpu.memory_space<vmem>>, vector<224x8xbf16>
    %c0_20 = arith.constant 0 : index
    %c0_21 = arith.constant 0 : index
    %c0_22 = arith.constant 0 : index
    %15 = vector.load %arg6[%c0_20, %c0_21, %c0_22] : memref<9x8x4xbf16, #tpu.memory_space<vmem>>, vector<1x8x4xbf16>
    %16 = vector.shape_cast %15 : vector<1x8x4xbf16> to vector<8x4xbf16>
    %cst_23 = arith.constant dense<0.000000e+00> : vector<224x4xf32>
    %17 = tpu.matmul %14, %16, %cst_23 {dimension_numbers = #tpu.dot_dimension_numbers<[1], [0], [0], [1], [0, 0, 1, 1], [], []>} : vector<224x8xbf16>, vector<8x4xbf16>, vector<224x4xf32> -> vector<224x4xf32>
    %c1 = arith.constant 1 : index
    %c0_24 = arith.constant 0 : index
    %18 = vector.load %arg11[%c1, %c0_24] : memref<264x8xbf16, #tpu.memory_space<vmem>>, vector<224x8xbf16>
    %c1_25 = arith.constant 1 : index
    %c0_26 = arith.constant 0 : index
    %c0_27 = arith.constant 0 : index
    %19 = vector.load %arg6[%c1_25, %c0_26, %c0_27] : memref<9x8x4xbf16, #tpu.memory_space<vmem>>, vector<1x8x4xbf16>
    %20 = vector.shape_cast %19 : vector<1x8x4xbf16> to vector<8x4xbf16>
    %cst_28 = arith.constant dense<0.000000e+00> : vector<224x4xf32>
    %21 = tpu.matmul %18, %20, %cst_28 {dimension_numbers = #tpu.dot_dimension_numbers<[1], [0], [0], [1], [0, 0, 1, 1], [], []>} : vector<224x8xbf16>, vector<8x4xbf16>, vector<224x4xf32> -> vector<224x4xf32>
    %22 = arith.addf %17, %21 : vector<224x4xf32>
    %c2 = arith.constant 2 : index
    %c0_29 = arith.constant 0 : index
    %23 = vector.load %arg11[%c2, %c0_29] : memref<264x8xbf16, #tpu.memory_space<vmem>>, vector<224x8xbf16>
    %c2_30 = arith.constant 2 : index
    %c0_31 = arith.constant 0 : index
    %c0_32 = arith.constant 0 : index
    %24 = vector.load %arg6[%c2_30, %c0_31, %c0_32] : memref<9x8x4xbf16, #tpu.memory_space<vmem>>, vector<1x8x4xbf16>
    %25 = vector.shape_cast %24 : vector<1x8x4xbf16> to vector<8x4xbf16>
    %cst_33 = arith.constant dense<0.000000e+00> : vector<224x4xf32>
    %26 = tpu.matmul %23, %25, %cst_33 {dimension_numbers = #tpu.dot_dimension_numbers<[1], [0], [0], [1], [0, 0, 1, 1], [], []>} : vector<224x8xbf16>, vector<8x4xbf16>, vector<224x4xf32> -> vector<224x4xf32>
    %27 = arith.addf %22, %26 : vector<224x4xf32>
    %c16 = arith.constant 16 : index
    %c0_34 = arith.constant 0 : index
    %28 = vector.load %arg11[%c16, %c0_34] : memref<264x8xbf16, #tpu.memory_space<vmem>>, vector<224x8xbf16>
    %c3 = arith.constant 3 : index
    %c0_35 = arith.constant 0 : index
    %c0_36 = arith.constant 0 : index
    %29 = vector.load %arg6[%c3, %c0_35, %c0_36] : memref<9x8x4xbf16, #tpu.memory_space<vmem>>, vector<1x8x4xbf16>
    %30 = vector.shape_cast %29 : vector<1x8x4xbf16> to vector<8x4xbf16>
    %cst_37 = arith.constant dense<0.000000e+00> : vector<224x4xf32>
    %31 = tpu.matmul %28, %30, %cst_37 {dimension_numbers = #tpu.dot_dimension_numbers<[1], [0], [0], [1], [0, 0, 1, 1], [], []>} : vector<224x8xbf16>, vector<8x4xbf16>, vector<224x4xf32> -> vector<224x4xf32>
    %c17 = arith.constant 17 : index
    %c0_38 = arith.constant 0 : index
    %32 = vector.load %arg11[%c17, %c0_38] : memref<264x8xbf16, #tpu.memory_space<vmem>>, vector<224x8xbf16>
    %c4_39 = arith.constant 4 : index
    %c0_40 = arith.constant 0 : index
    %c0_41 = arith.constant 0 : index
    %33 = vector.load %arg6[%c4_39, %c0_40, %c0_41] : memref<9x8x4xbf16, #tpu.memory_space<vmem>>, vector<1x8x4xbf16>
    %34 = vector.shape_cast %33 : vector<1x8x4xbf16> to vector<8x4xbf16>
    %cst_42 = arith.constant dense<0.000000e+00> : vector<224x4xf32>
    %35 = tpu.matmul %32, %34, %cst_42 {dimension_numbers = #tpu.dot_dimension_numbers<[1], [0], [0], [1], [0, 0, 1, 1], [], []>} : vector<224x8xbf16>, vector<8x4xbf16>, vector<224x4xf32> -> vector<224x4xf32>
    %36 = arith.addf %31, %35 : vector<224x4xf32>
    %c18 = arith.constant 18 : index
    %c0_43 = arith.constant 0 : index
    %37 = vector.load %arg11[%c18, %c0_43] : memref<264x8xbf16, #tpu.memory_space<vmem>>, vector<224x8xbf16>
    %c5 = arith.constant 5 : index
    %c0_44 = arith.constant 0 : index
    %c0_45 = arith.constant 0 : index
    %38 = vector.load %arg6[%c5, %c0_44, %c0_45] : memref<9x8x4xbf16, #tpu.memory_space<vmem>>, vector<1x8x4xbf16>
    %39 = vector.shape_cast %38 : vector<1x8x4xbf16> to vector<8x4xbf16>
    %cst_46 = arith.constant dense<0.000000e+00> : vector<224x4xf32>
    %40 = tpu.matmul %37, %39, %cst_46 {dimension_numbers = #tpu.dot_dimension_numbers<[1], [0], [0], [1], [0, 0, 1, 1], [], []>} : vector<224x8xbf16>, vector<8x4xbf16>, vector<224x4xf32> -> vector<224x4xf32>
    %41 = arith.addf %36, %40 : vector<224x4xf32>
    %c32 = arith.constant 32 : index
    %c0_47 = arith.constant 0 : index
    %42 = vector.load %arg11[%c32, %c0_47] : memref<264x8xbf16, #tpu.memory_space<vmem>>, vector<224x8xbf16>
    %c6 = arith.constant 6 : index
    %c0_48 = arith.constant 0 : index
    %c0_49 = arith.constant 0 : index
    %43 = vector.load %arg6[%c6, %c0_48, %c0_49] : memref<9x8x4xbf16, #tpu.memory_space<vmem>>, vector<1x8x4xbf16>
    %44 = vector.shape_cast %43 : vector<1x8x4xbf16> to vector<8x4xbf16>
    %cst_50 = arith.constant dense<0.000000e+00> : vector<224x4xf32>
    %45 = tpu.matmul %42, %44, %cst_50 {dimension_numbers = #tpu.dot_dimension_numbers<[1], [0], [0], [1], [0, 0, 1, 1], [], []>} : vector<224x8xbf16>, vector<8x4xbf16>, vector<224x4xf32> -> vector<224x4xf32>
    %c33 = arith.constant 33 : index
    %c0_51 = arith.constant 0 : index
    %46 = vector.load %arg11[%c33, %c0_51] : memref<264x8xbf16, #tpu.memory_space<vmem>>, vector<224x8xbf16>
    %c7 = arith.constant 7 : index
    %c0_52 = arith.constant 0 : index
    %c0_53 = arith.constant 0 : index
    %47 = vector.load %arg6[%c7, %c0_52, %c0_53] : memref<9x8x4xbf16, #tpu.memory_space<vmem>>, vector<1x8x4xbf16>
    %48 = vector.shape_cast %47 : vector<1x8x4xbf16> to vector<8x4xbf16>
    %cst_54 = arith.constant dense<0.000000e+00> : vector<224x4xf32>
    %49 = tpu.matmul %46, %48, %cst_54 {dimension_numbers = #tpu.dot_dimension_numbers<[1], [0], [0], [1], [0, 0, 1, 1], [], []>} : vector<224x8xbf16>, vector<8x4xbf16>, vector<224x4xf32> -> vector<224x4xf32>
    %50 = arith.addf %45, %49 : vector<224x4xf32>
    %c34 = arith.constant 34 : index
    %c0_55 = arith.constant 0 : index
    %51 = vector.load %arg11[%c34, %c0_55] : memref<264x8xbf16, #tpu.memory_space<vmem>>, vector<224x8xbf16>
    %c8 = arith.constant 8 : index
    %c0_56 = arith.constant 0 : index
    %c0_57 = arith.constant 0 : index
    %52 = vector.load %arg6[%c8, %c0_56, %c0_57] : memref<9x8x4xbf16, #tpu.memory_space<vmem>>, vector<1x8x4xbf16>
    %53 = vector.shape_cast %52 : vector<1x8x4xbf16> to vector<8x4xbf16>
    %cst_58 = arith.constant dense<0.000000e+00> : vector<224x4xf32>
    %54 = tpu.matmul %51, %53, %cst_58 {dimension_numbers = #tpu.dot_dimension_numbers<[1], [0], [0], [1], [0, 0, 1, 1], [], []>} : vector<224x8xbf16>, vector<8x4xbf16>, vector<224x4xf32> -> vector<224x4xf32>
    %55 = arith.addf %50, %54 : vector<224x4xf32>
    %56 = arith.addf %27, %41 : vector<224x4xf32>
    %57 = arith.addf %56, %55 : vector<224x4xf32>
    %c0_59 = arith.constant 0 : index
    %c0_60 = arith.constant 0 : index
    %58 = vector.load %arg7[%c0_59, %c0_60] : memref<1x4xf32, #tpu.memory_space<vmem>>, vector<1x4xf32>
    %59 = vector.broadcast %58 : vector<1x4xf32> to vector<224x4xf32>
    %60 = arith.addf %57, %59 : vector<224x4xf32>
    %cst_61 = arith.constant 0.000000e+00 : f32
    %61 = vector.broadcast %cst_61 : f32 to vector<224x4xf32>
    %62 = arith.maximumf %60, %61 : vector<224x4xf32>
    %63 = arith.truncf %62 : vector<224x4xf32> to vector<224x4xbf16>
    %c0_62 = arith.constant 0 : index
    %c0_63 = arith.constant 0 : index
    %64 = vector.load %arg12[%c0_62, %c0_63] : memref<232x4xbf16, #tpu.memory_space<vmem>>, vector<224x4xbf16>
    tpu.vector_store %arg12[%c0_62, %c0_63], %63 {strides = array<i32>} : memref<232x4xbf16, #tpu.memory_space<vmem>>, vector<224x4xbf16>,
    %cst_64 = arith.constant 0.000000e+00 : bf16
    %65 = vector.broadcast %cst_64 : bf16 to vector<8x4xbf16>
    %c224 = arith.constant 224 : index
    %c0_65 = arith.constant 0 : index
    %66 = vector.load %arg12[%c224, %c0_65] : memref<232x4xbf16, #tpu.memory_space<vmem>>, vector<8x4xbf16>
    tpu.vector_store %arg12[%c224, %c0_65], %65 {strides = array<i32>} : memref<232x4xbf16, #tpu.memory_space<vmem>>, vector<8x4xbf16>,
    %c0_66 = arith.constant 0 : index
    %c0_67 = arith.constant 0 : index
    %67 = vector.load %arg12[%c0_66, %c0_67] : memref<232x4xbf16, #tpu.memory_space<vmem>>, vector<192x4xbf16>
    %c0_68 = arith.constant 0 : index
    %c0_69 = arith.constant 0 : index
    %c0_70 = arith.constant 0 : index
    %68 = vector.load %arg8[%c0_68, %c0_69, %c0_70] : memref<9x4x4xbf16, #tpu.memory_space<vmem>>, vector<1x4x4xbf16>
    %69 = vector.shape_cast %68 : vector<1x4x4xbf16> to vector<4x4xbf16>
    %cst_71 = arith.constant dense<0.000000e+00> : vector<192x4xf32>
    %70 = tpu.matmul %67, %69, %cst_71 {dimension_numbers = #tpu.dot_dimension_numbers<[1], [0], [0], [1], [0, 0, 1, 1], [], []>} : vector<192x4xbf16>, vector<4x4xbf16>, vector<192x4xf32> -> vector<192x4xf32>
    %c1_72 = arith.constant 1 : index
    %c0_73 = arith.constant 0 : index
    %71 = vector.load %arg12[%c1_72, %c0_73] : memref<232x4xbf16, #tpu.memory_space<vmem>>, vector<192x4xbf16>
    %c1_74 = arith.constant 1 : index
    %c0_75 = arith.constant 0 : index
    %c0_76 = arith.constant 0 : index
    %72 = vector.load %arg8[%c1_74, %c0_75, %c0_76] : memref<9x4x4xbf16, #tpu.memory_space<vmem>>, vector<1x4x4xbf16>
    %73 = vector.shape_cast %72 : vector<1x4x4xbf16> to vector<4x4xbf16>
    %cst_77 = arith.constant dense<0.000000e+00> : vector<192x4xf32>
    %74 = tpu.matmul %71, %73, %cst_77 {dimension_numbers = #tpu.dot_dimension_numbers<[1], [0], [0], [1], [0, 0, 1, 1], [], []>} : vector<192x4xbf16>, vector<4x4xbf16>, vector<192x4xf32> -> vector<192x4xf32>
    %75 = arith.addf %70, %74 : vector<192x4xf32>
    %c2_78 = arith.constant 2 : index
    %c0_79 = arith.constant 0 : index
    %76 = vector.load %arg12[%c2_78, %c0_79] : memref<232x4xbf16, #tpu.memory_space<vmem>>, vector<192x4xbf16>
    %c2_80 = arith.constant 2 : index
    %c0_81 = arith.constant 0 : index
    %c0_82 = arith.constant 0 : index
    %77 = vector.load %arg8[%c2_80, %c0_81, %c0_82] : memref<9x4x4xbf16, #tpu.memory_space<vmem>>, vector<1x4x4xbf16>
    %78 = vector.shape_cast %77 : vector<1x4x4xbf16> to vector<4x4xbf16>
    %cst_83 = arith.constant dense<0.000000e+00> : vector<192x4xf32>
    %79 = tpu.matmul %76, %78, %cst_83 {dimension_numbers = #tpu.dot_dimension_numbers<[1], [0], [0], [1], [0, 0, 1, 1], [], []>} : vector<192x4xbf16>, vector<4x4xbf16>, vector<192x4xf32> -> vector<192x4xf32>
    %80 = arith.addf %75, %79 : vector<192x4xf32>
    %c16_84 = arith.constant 16 : index
    %c0_85 = arith.constant 0 : index
    %81 = vector.load %arg12[%c16_84, %c0_85] : memref<232x4xbf16, #tpu.memory_space<vmem>>, vector<192x4xbf16>
    %c3_86 = arith.constant 3 : index
    %c0_87 = arith.constant 0 : index
    %c0_88 = arith.constant 0 : index
    %82 = vector.load %arg8[%c3_86, %c0_87, %c0_88] : memref<9x4x4xbf16, #tpu.memory_space<vmem>>, vector<1x4x4xbf16>
    %83 = vector.shape_cast %82 : vector<1x4x4xbf16> to vector<4x4xbf16>
    %cst_89 = arith.constant dense<0.000000e+00> : vector<192x4xf32>
    %84 = tpu.matmul %81, %83, %cst_89 {dimension_numbers = #tpu.dot_dimension_numbers<[1], [0], [0], [1], [0, 0, 1, 1], [], []>} : vector<192x4xbf16>, vector<4x4xbf16>, vector<192x4xf32> -> vector<192x4xf32>
    %c17_90 = arith.constant 17 : index
    %c0_91 = arith.constant 0 : index
    %85 = vector.load %arg12[%c17_90, %c0_91] : memref<232x4xbf16, #tpu.memory_space<vmem>>, vector<192x4xbf16>
    %c4_92 = arith.constant 4 : index
    %c0_93 = arith.constant 0 : index
    %c0_94 = arith.constant 0 : index
    %86 = vector.load %arg8[%c4_92, %c0_93, %c0_94] : memref<9x4x4xbf16, #tpu.memory_space<vmem>>, vector<1x4x4xbf16>
    %87 = vector.shape_cast %86 : vector<1x4x4xbf16> to vector<4x4xbf16>
    %cst_95 = arith.constant dense<0.000000e+00> : vector<192x4xf32>
    %88 = tpu.matmul %85, %87, %cst_95 {dimension_numbers = #tpu.dot_dimension_numbers<[1], [0], [0], [1], [0, 0, 1, 1], [], []>} : vector<192x4xbf16>, vector<4x4xbf16>, vector<192x4xf32> -> vector<192x4xf32>
    %89 = arith.addf %84, %88 : vector<192x4xf32>
    %c18_96 = arith.constant 18 : index
    %c0_97 = arith.constant 0 : index
    %90 = vector.load %arg12[%c18_96, %c0_97] : memref<232x4xbf16, #tpu.memory_space<vmem>>, vector<192x4xbf16>
    %c5_98 = arith.constant 5 : index
    %c0_99 = arith.constant 0 : index
    %c0_100 = arith.constant 0 : index
    %91 = vector.load %arg8[%c5_98, %c0_99, %c0_100] : memref<9x4x4xbf16, #tpu.memory_space<vmem>>, vector<1x4x4xbf16>
    %92 = vector.shape_cast %91 : vector<1x4x4xbf16> to vector<4x4xbf16>
    %cst_101 = arith.constant dense<0.000000e+00> : vector<192x4xf32>
    %93 = tpu.matmul %90, %92, %cst_101 {dimension_numbers = #tpu.dot_dimension_numbers<[1], [0], [0], [1], [0, 0, 1, 1], [], []>} : vector<192x4xbf16>, vector<4x4xbf16>, vector<192x4xf32> -> vector<192x4xf32>
    %94 = arith.addf %89, %93 : vector<192x4xf32>
    %c32_102 = arith.constant 32 : index
    %c0_103 = arith.constant 0 : index
    %95 = vector.load %arg12[%c32_102, %c0_103] : memref<232x4xbf16, #tpu.memory_space<vmem>>, vector<192x4xbf16>
    %c6_104 = arith.constant 6 : index
    %c0_105 = arith.constant 0 : index
    %c0_106 = arith.constant 0 : index
    %96 = vector.load %arg8[%c6_104, %c0_105, %c0_106] : memref<9x4x4xbf16, #tpu.memory_space<vmem>>, vector<1x4x4xbf16>
    %97 = vector.shape_cast %96 : vector<1x4x4xbf16> to vector<4x4xbf16>
    %cst_107 = arith.constant dense<0.000000e+00> : vector<192x4xf32>
    %98 = tpu.matmul %95, %97, %cst_107 {dimension_numbers = #tpu.dot_dimension_numbers<[1], [0], [0], [1], [0, 0, 1, 1], [], []>} : vector<192x4xbf16>, vector<4x4xbf16>, vector<192x4xf32> -> vector<192x4xf32>
    %c33_108 = arith.constant 33 : index
    %c0_109 = arith.constant 0 : index
    %99 = vector.load %arg12[%c33_108, %c0_109] : memref<232x4xbf16, #tpu.memory_space<vmem>>, vector<192x4xbf16>
    %c7_110 = arith.constant 7 : index
    %c0_111 = arith.constant 0 : index
    %c0_112 = arith.constant 0 : index
    %100 = vector.load %arg8[%c7_110, %c0_111, %c0_112] : memref<9x4x4xbf16, #tpu.memory_space<vmem>>, vector<1x4x4xbf16>
    %101 = vector.shape_cast %100 : vector<1x4x4xbf16> to vector<4x4xbf16>
    %cst_113 = arith.constant dense<0.000000e+00> : vector<192x4xf32>
    %102 = tpu.matmul %99, %101, %cst_113 {dimension_numbers = #tpu.dot_dimension_numbers<[1], [0], [0], [1], [0, 0, 1, 1], [], []>} : vector<192x4xbf16>, vector<4x4xbf16>, vector<192x4xf32> -> vector<192x4xf32>
    %103 = arith.addf %98, %102 : vector<192x4xf32>
    %c34_114 = arith.constant 34 : index
    %c0_115 = arith.constant 0 : index
    %104 = vector.load %arg12[%c34_114, %c0_115] : memref<232x4xbf16, #tpu.memory_space<vmem>>, vector<192x4xbf16>
    %c8_116 = arith.constant 8 : index
    %c0_117 = arith.constant 0 : index
    %c0_118 = arith.constant 0 : index
    %105 = vector.load %arg8[%c8_116, %c0_117, %c0_118] : memref<9x4x4xbf16, #tpu.memory_space<vmem>>, vector<1x4x4xbf16>
    %106 = vector.shape_cast %105 : vector<1x4x4xbf16> to vector<4x4xbf16>
    %cst_119 = arith.constant dense<0.000000e+00> : vector<192x4xf32>
    %107 = tpu.matmul %104, %106, %cst_119 {dimension_numbers = #tpu.dot_dimension_numbers<[1], [0], [0], [1], [0, 0, 1, 1], [], []>} : vector<192x4xbf16>, vector<4x4xbf16>, vector<192x4xf32> -> vector<192x4xf32>
    %108 = arith.addf %103, %107 : vector<192x4xf32>
    %109 = arith.addf %80, %94 : vector<192x4xf32>
    %110 = arith.addf %109, %108 : vector<192x4xf32>
    %c0_120 = arith.constant 0 : index
    %c0_121 = arith.constant 0 : index
    %111 = vector.load %arg9[%c0_120, %c0_121] : memref<1x4xf32, #tpu.memory_space<vmem>>, vector<1x4xf32>
    %112 = vector.broadcast %111 : vector<1x4xf32> to vector<192x4xf32>
    %113 = arith.addf %110, %112 : vector<192x4xf32>
    %cst_122 = arith.constant 0.000000e+00 : f32
    %114 = vector.broadcast %cst_122 : f32 to vector<192x4xf32>
    %115 = arith.maximumf %113, %114 : vector<192x4xf32>
    %c0_123 = arith.constant 0 : index
    %c0_124 = arith.constant 0 : index
    %c0_125 = arith.constant 0 : index
    %116 = vector.load %arg10[%c0_123, %c0_124, %c0_125] : memref<1x192x4xf32, #tpu.memory_space<vmem>>, vector<1x192x4xf32>
    %117 = vector.shape_cast %116 : vector<1x192x4xf32> to vector<192x4xf32>
    %118 = vector.shape_cast %115 : vector<192x4xf32> to vector<1x192x4xf32>
    tpu.vector_store %arg10[%c0_123, %c0_124, %c0_125], %118 {strides = array<i32>} : memref<1x192x4xf32, #tpu.memory_space<vmem>>, vector<1x192x4xf32>,
    return
  }
  func.func @transform_0(%arg0: i32, %arg1: i32) -> (i32, i32, i32) {
    %c0_i32 = arith.constant 0 : i32
    %c0_i32_0 = arith.constant 0 : i32
    return %arg0, %arg1, %c0_i32 : i32, i32, i32
  }
  func.func @transform_1(%arg0: i32, %arg1: i32) -> (i32, i32, i32) {
    %c1_i32 = arith.constant 1 : i32
    %0 = arith.addi %arg1, %c1_i32 : i32
    %c3_i32 = arith.constant 3 : i32
    %1 = arith.muli %0, %c3_i32 : i32
    %c3_i32_0 = arith.constant 3 : i32
    %2 = arith.minsi %1, %c3_i32_0 : i32
    %c0_i32 = arith.constant 0 : i32
    %c0_i32_1 = arith.constant 0 : i32
    return %arg0, %2, %c0_i32 : i32, i32, i32
  }
  func.func @transform_2(%arg0: i32, %arg1: i32) -> (i32, i32, i32) {
    %c0_i32 = arith.constant 0 : i32
    %c0_i32_0 = arith.constant 0 : i32
    return %arg0, %arg1, %c0_i32 : i32, i32, i32
  }
  func.func @transform_3(%arg0: i32, %arg1: i32) -> (i32, i32, i32) {
    %c1_i32 = arith.constant 1 : i32
    %0 = arith.addi %arg1, %c1_i32 : i32
    %c3_i32 = arith.constant 3 : i32
    %1 = arith.muli %0, %c3_i32 : i32
    %c3_i32_0 = arith.constant 3 : i32
    %2 = arith.minsi %1, %c3_i32_0 : i32
    %c0_i32 = arith.constant 0 : i32
    %c0_i32_1 = arith.constant 0 : i32
    return %arg0, %2, %c0_i32 : i32, i32, i32
  }
  func.func @transform_4(%arg0: i32, %arg1: i32) -> (i32, i32, i32) {
    %c0_i32 = arith.constant 0 : i32
    %c0_i32_0 = arith.constant 0 : i32
    %c0_i32_1 = arith.constant 0 : i32
    %c0_i32_2 = arith.constant 0 : i32
    return %c0_i32, %c0_i32_0, %c0_i32_1 : i32, i32, i32
  }
  func.func @transform_5(%arg0: i32, %arg1: i32) -> (i32, i32) {
    %c0_i32 = arith.constant 0 : i32
    %c0_i32_0 = arith.constant 0 : i32
    %c0_i32_1 = arith.constant 0 : i32
    return %c0_i32, %c0_i32_0 : i32, i32
  }
  func.func @transform_6(%arg0: i32, %arg1: i32) -> (i32, i32, i32) {
    %c0_i32 = arith.constant 0 : i32
    %c0_i32_0 = arith.constant 0 : i32
    %c0_i32_1 = arith.constant 0 : i32
    %c0_i32_2 = arith.constant 0 : i32
    return %c0_i32, %c0_i32_0, %c0_i32_1 : i32, i32, i32
  }
  func.func @transform_7(%arg0: i32, %arg1: i32) -> (i32, i32) {
    %c0_i32 = arith.constant 0 : i32
    %c0_i32_0 = arith.constant 0 : i32
    %c0_i32_1 = arith.constant 0 : i32
    return %c0_i32, %c0_i32_0 : i32, i32
  }
  func.func @transform_8(%arg0: i32, %arg1: i32) -> (i32, i32, i32) {
    %c0_i32 = arith.constant 0 : i32
    %c0_i32_0 = arith.constant 0 : i32
    return %arg0, %arg1, %c0_i32 : i32, i32, i32
  }
}

</mosaic_0001>

<bundles_post_ra>
// kernel: tile.8
= control target key start
LH: loop header
LB: loop body
LE: loop exit
PB: predicated region body
PF: predicated region fallthrough
CT: control target
= control target key end

     0   :  { %s22_s0 = inlined_call_operand.vmem [shape: f32[4], index: 0, kind: input, shape index: {}]   ;;  %s23_s1 = inlined_call_operand.vmem [shape: f32[4,4], index: 1, kind: output, shape index: {}]  }
   0x1   :  { %v4_v0 = vld [vmem:[%s22_s0] ss:$0 sm:$0xff] }
   0x2   :  { %5 = vst [vmem:[%s23_s1] sm:$0xf] %v4_v0 }

// kernel: tile.9
= control target key start
LH: loop header
LB: loop body
LE: loop exit
PB: predicated region body
PF: predicated region fallthrough
CT: control target
= control target key end

     0   :  { %s101_s0 = inlined_call_operand.vmem [shape: f32[4,4], index: 0, kind: input, shape index: {}]   ;;  %s102_s1 = inlined_call_operand.hbm [shape: f32[1,16], index: 1, kind: output, shape index: {}]  }
   0x1   :  { %v5_v0 = vld [vmem:[%s101_s0] sm:$0xf] }
   0x2   :  { %6 = vst [vmem:[#allocation3] sm:$0xf] %v5_v0 }
   0x3   :  { %2 = vsyncpa [#allocation1], 0  ;;  %vm8_vm0 = vcmask 31744   ;;  %s72_s0 = smov 12   ;;  %s73_s8 = smov 4   ;;  %vm14_vm1 = vcmask 130144  }
   0x4   :  { %s74_s9 = smov 8   ;;  %vm20_vm2 = vcmask 97344   ;;  %vm26_vm3 = vcmask 64544   ;;  %s75_s10 = smov [#allocation0]  }
   0x5   :  { %s38_s11 = sshll.u32 %s75_s10, 4  ;;  %s39_s11 = int_to_ptr.vmem [resolvable:$true] %s38_s11 }
   0x6   :  { %s48_s12 = scalar_lea.vmem %s39_s11, 16  ;;  %s52_s13 = scalar_lea.vmem %s39_s11, 32 }
   0x7   :  { %p49_p0 = scmp.ne.s32.totalorder %s39_s11, %s48_s12  ;;  %p53_p1 = scmp.lt.s32.totalorder %s39_s11, %s39_s11 }
   0x8   :  { %p54_p2 = scmp.lt.s32.totalorder %s52_s13, %s48_s12 }
   0x9   :  { %v11_v1 = vld [vmem:[#allocation3 + $0x3] sm:$0x1]   ;;  %v23_v2 = vld [vmem:[#allocation3 + $0x1] sm:$0x1]   ;;  %v7_v3 = vld [vmem:[#allocation3] sm:$0x1]  }
   0xa   :  { %12 = vrot.lane.b32.xlu0 %v11_v1, %s72_s0  ;;  %24 = vrot.lane.b32.xlu1 %v23_v2, %s73_s8  ;;  %v17_v4 = vld [vmem:[#allocation3 + $0x2] sm:$0x1]   ;;  %9 = vst.msk [vmem:[#allocation2] sm:$0x1] %vm8_vm0, %v7_v3   ;;  %p55_p3 = por %p54_p2, %p53_p1 }
   0xc   :  { %p56_p4 = pnand %p55_p3, %p49_p0 }
   0xe   :  { %18 = vrot.lane.b32.xlu0 %v17_v4, %s74_s9 }
  0x7c   :  { %v13_v5 = vpop.permute.xlu0 %12   ;;  %v25_v6 = vpop.permute.xlu1 %24  }
  0x7d   :  { %15 = vst.msk [vmem:[#allocation2] sm:$0x1] %vm14_vm1, %v13_v5  }
  0x80   :  { %v19_v7 = vpop.permute.xlu0 %18  }
  0x81   :  { %21 = vst.msk [vmem:[#allocation2] sm:$0x1] %vm20_vm2, %v19_v7  }
  0x82   :  { %27 = vst.msk [vmem:[#allocation2] sm:$0x1] %vm26_vm3, %v25_v6  }
  0x89   :  { %v31_v8 = vld [vmem:[#allocation2] sm:$0x1] }
  0x8a   :  { %33 = vst [vmem:[#allocation0] sm:$0x1] %v31_v8 }
  0x8b   :  { %59 = shalt.err (!%p56_p4)
}
  0x8c   :  { %s60_s16 = scalar_lea.hbm %s102_s1, 16 }
  0x8d   :  { %p61_p5 = scmp.ne.s32.totalorder %s102_s1, %s60_s16  ;;  %p64_p6 = scmp.lt.u32.totalorder %s60_s16, %s102_s1 }
  0x8f   :  { %p66_p7 = pnand %p64_p6, %p61_p5 }
  0x91   :  { %69 = shalt.err (!%p66_p7)
}
  0x92   :  { %41 = dma.vmem_to_hbm [thread:$0]  %s39_s11, 16, %s102_s1, [#allocation1]  }
  0x93   :  { %70 = dma.done.wait [#allocation1], 16  }
  0x94   :  { %71 = vsyncadd [#allocation1], 4294967280 }
  0x95   :  { %43 = vsyncpa [#allocation1], 1 }

// kernel: unet_up_forward.2
= control target key start
LH: loop header
LB: loop body
LE: loop exit
PB: predicated region body
PF: predicated region fallthrough
CT: control target
= control target key end

     0   :  { %8 = vsyncpa [#allocation3], 0  ;;  %s740_s0 = inlined_call_operand.hbm [shape: bf16[16,8,8], index: 0, kind: input, shape index: {}]   ;;  %s741_s1 = inlined_call_operand.hbm [shape: bf16[8,16], index: 1, kind: input, shape index: {}]   ;;  %s742_s2 = inlined_call_operand.hbm [shape: f32[1,16], index: 2, kind: input, shape index: {}]   ;;  %s743_s3 = inlined_call_operand.hbm [shape: bf16[16,2,8,8], index: 3, kind: output, shape index: {}]  }
   0x1   :  { %9 = vsyncpa [#allocation6], 0 }
   0x2   :  { %10 = vsyncpa [#allocation4], 0  ;;  %s596_s12 = smov [#allocation5]   ;;  %s597_s14 = smov [#allocation2]  }
   0x3   :  { %s29_s13 = sshll.u32 %s596_s12, 4  ;;  %s16_s15 = sshll.u32 %s597_s14, 4  ;;  %s30_s13 = int_to_ptr.vmem [resolvable:$true] %s29_s13  ;;  %s623_s15 = int_to_ptr.vmem [resolvable:$true] %s16_s15 }
   0x4   :  { %s502_s18 = scalar_lea.hbm %s741_s1, 64 }
   0x5   :  { %p503_p0 = scmp.ne.s32.totalorder %s741_s1, %s502_s18  ;;  %p506_p1 = scmp.lt.u32.totalorder %s502_s18, %s741_s1 }
   0x7   :  { %p508_p2 = pnand %p506_p1, %p503_p0 }
   0x9   :  { %511 = shalt.err (!%p508_p2)
}
   0xa   :  { %s512_s23 = scalar_lea.vmem %s30_s13, 64  ;;  %p517_p4 = scmp.lt.s32.totalorder %s30_s13, %s30_s13 }
   0xb   :  { %p513_p3 = scmp.ne.s32.totalorder %s30_s13, %s512_s23  ;;  %p518_p5 = scmp.lt.s32.totalorder %s512_s23, %s512_s23 }
   0xd   :  { %p519_p6 = por %p518_p5, %p517_p4 }
   0xf   :  { %p520_p7 = pnand %p519_p6, %p513_p3 }
  0x11   :  { %523 = shalt.err (!%p520_p7)
}
  0x12   :  { %32 = dma.hbm_to_vmem [thread:$0]  %s741_s1, 64, %s30_s13, [#allocation6]  }
  0x13   :  { %s524_s28 = scalar_lea.hbm %s740_s0, 1024 }
  0x14   :  { %p525_p8 = scmp.ne.s32.totalorder %s740_s0, %s524_s28  ;;  %p528_p9 = scmp.lt.u32.totalorder %s524_s28, %s740_s0 }
  0x16   :  { %p530_p10 = pnand %p528_p9, %p525_p8 }
  0x18   :  { %533 = shalt.err (!%p530_p10)
}
  0x19   :  { %s534_s6 = scalar_lea.vmem %s623_s15, 1024  ;;  %p539_p12 = scmp.lt.s32.totalorder %s623_s15, %s623_s15 }
  0x1a   :  { %p535_p11 = scmp.ne.s32.totalorder %s623_s15, %s534_s6  ;;  %p540_p13 = scmp.lt.s32.totalorder %s534_s6, %s534_s6 }
  0x1c   :  { %p541_p0 = por %p540_p13, %p539_p12 }
  0x1e   :  { %p542_p1 = pnand %p541_p0, %p535_p11 }
  0x20   :  { %545 = shalt.err (!%p542_p1)
}
  0x21   :  { %s598_s1 = smov 64   ;;  %s599_s7 = smov 4  }
  0x22   :  { %22 = dma.hbm_to_vmem [thread:$0]  %s740_s0, 1024, %s623_s15, [#allocation3], %s598_s1, %s598_s1, %s599_s7  }
  0x23   :  { %s600_s10 = smov [#allocation7]   ;;  %s546_s14 = scalar_lea.hbm %s742_s2, 16 }
  0x24   :  { %s39_s11 = sshll.u32 %s600_s10, 4  ;;  %p547_p2 = scmp.ne.s32.totalorder %s742_s2, %s546_s14  ;;  %s40_s11 = int_to_ptr.vmem [resolvable:$true] %s39_s11 }
  0x25   :  { %p550_p3 = scmp.lt.u32.totalorder %s546_s14, %s742_s2 }
  0x27   :  { %p552_p4 = pnand %p550_p3, %p547_p2 }
  0x29   :  { %555 = shalt.err (!%p552_p4)
}
  0x2a   :  { %s556_s20 = scalar_lea.vmem %s40_s11, 16  ;;  %s560_s0 = scalar_lea.vmem %s40_s11, 32 }
  0x2b   :  { %p557_p5 = scmp.ne.s32.totalorder %s40_s11, %s556_s20  ;;  %p561_p6 = scmp.lt.s32.totalorder %s40_s11, %s40_s11 }
  0x2c   :  { %p562_p7 = scmp.lt.s32.totalorder %s560_s0, %s556_s20 }
  0x2e   :  { %p563_p8 = por %p562_p7, %p561_p6 }
  0x30   :  { %p564_p9 = pnand %p563_p8, %p557_p5 }
  0x32   :  { %567 = shalt.err (!%p564_p9)
}
  0x33   :  { %42 = dma.hbm_to_vmem [thread:$0]  %s742_s2, 16, %s40_s11, [#allocation6]  }
  0x34   :  { %590 = dma.done.wait [#allocation3], 1024  }
  0x35   :  { %591 = vsyncadd [#allocation3], 4294966272 }
  0x36   :  { %592 = dma.done.wait [#allocation6], 80  }
  0x37   :  { %593 = vsyncadd [#allocation6], 4294967216  ;;  %vm142_vm0 = vcmask 1043456   ;;  %vm117_vm1 = vcmask 64512   ;;  %v69_v0 = vld [vmem:[#allocation5] sm:$0xf] }
  0x38   :  { %485 = vmatprep.subr.msk.bf16.mxu0 %vm142_vm0, %v69_v0  ;;  %486 = vmatprep.subr.msk.bf16.mxu1 %vm142_vm0, %v69_v0  ;;  %v144_v1 = vsel %vm142_vm0, %v69_v0, 0  ;;  %v494_v2 = vld [vmem:[#allocation2] sm:$0xff]   ;;  %v496_v4 = vld [vmem:[#allocation2 + $0x8] sm:$0xff]   ;;  %v498_v6 = vld [vmem:[#allocation2 + $0x10] sm:$0xff]   ;;  %vm307_vm2 = vcmask 60416   ;;  %s601_s2 = smov 120  }
  0x39   :  { %466 = vmatpush3.bf16.msra.mxu0 %v144_v1  ;;  %484 = vmatpush3.bf16.msra.mxu1 %v144_v1  ;;  %v495_v3 = vld [vmem:[#allocation2 + $0x20] sm:$0xff]   ;;  %v497_v5 = vld [vmem:[#allocation2 + $0x28] sm:$0xff]   ;;  %v500_v7 = vld [vmem:[#allocation2 + $0x30] sm:$0xff]   ;;  %s602_s22 = smov [#allocation8]  }
  0x3a   :  { %467 = vmatprep.mubr.msk.bf16.mxu0 %vm117_vm1, %v494_v2  ;;  %475 = vmatprep.mubr.msk.bf16.mxu1 %vm117_vm1, %v495_v3  ;;  %v499_v8 = vld [vmem:[#allocation2 + $0x18] sm:$0xff]   ;;  %v407_v10 = vld [vmem:[#allocation7] ss:$0 sm:$0xff]  ;;  %s394_s23 = sshll.u32 %s602_s22, 4  ;;  %s395_s23 = int_to_ptr.vmem [resolvable:$true] %s394_s23 }
  0x3b   :  { %v501_v9 = vld [vmem:[#allocation2 + $0x38] sm:$0xff]   ;;  %s568_s24 = scalar_lea.vmem %s395_s23, 2048  ;;  %p573_p11 = scmp.lt.s32.totalorder %s395_s23, %s395_s23 }
  0x3c   :  { %468 = vmatmul.mubr.msk.bf16.vlgmr.msra.gmra.mrb[0].mxu0 %vm117_vm1, %v496_v4  ;;  %476 = vmatmul.mubr.msk.bf16.vlgmr.msra.gmra.mrb[0].mxu1 %vm117_vm1, %v497_v5  ;;  %p569_p10 = scmp.ne.s32.totalorder %s395_s23, %s568_s24  ;;  %p574_p12 = scmp.lt.s32.totalorder %s568_s24, %s568_s24 }
  0x3d   :  { %471 = vmatprep.mubr.msk.bf16.mxu0 %vm117_vm1, %v498_v6  ;;  %479 = vmatprep.mubr.msk.bf16.mxu1 %vm117_vm1, %v500_v7 }
  0x3e   :  { %p575_p13 = por %p574_p12, %p573_p11 }
  0x40   :  { %p576_p0 = pnand %p575_p13, %p569_p10 }
  0x44   :  { %472 = vmatmul.mubr.msk.bf16.gmra.mrb[4].mxu0 %vm117_vm1, %v499_v8  ;;  %480 = vmatmul.mubr.msk.bf16.gmra.mrb[4].mxu1 %vm117_vm1, %v501_v9 }
 0x10f   :  { %v469_v11 = vpop.f32.mrb[0].mxu0  ;;  %v477_v13 = vpop.f32.mrb[0].mxu1 }
 0x110   :  { %v189_v12 = vadd.f32 %v469_v11, %v407_v10  ;;  %v180_v14 = vpop.f32.mrb[1].mxu0  ;;  %v221_v15 = vadd.f32 %v477_v13, %v407_v10  ;;  %v212_v17 = vpop.f32.mrb[1].mxu1 }
 0x111   :  { %v181_v16 = vadd.f32 %v407_v10, %v180_v14  ;;  %v470_v18 = vpop.f32.mrb[2].mxu0  ;;  %v213_v20 = vadd.f32 %v407_v10, %v212_v17  ;;  %v478_v22 = vpop.f32.mrb[2].mxu1 }
 0x112   :  { %v442_v19 = vpack.c.bf16 %v189_v12, %v189_v12  ;;  %v192_v21 = vadd.f32 %v470_v18, %v407_v10  ;;  %v183_v23 = vpop.f32.mrb[3].mxu0  ;;  %v450_v24 = vpack.c.bf16 %v221_v15, %v221_v15  ;;  %v224_v26 = vadd.f32 %v478_v22, %v407_v10  ;;  %v215_v28 = vpop.f32.mrb[3].mxu1 }
 0x113   :  { %v440_v25 = vpack.c.bf16 %v181_v16, %v181_v16  ;;  %v184_v27 = vadd.f32 %v407_v10, %v183_v23  ;;  %v448_v29 = vpack.c.bf16 %v213_v20, %v213_v20  ;;  %v216_v31 = vadd.f32 %v407_v10, %v215_v28 }
 0x114   :  { %310 = vst.msk [vmem:[#allocation8 + $0x10] sm:$0xf] %vm307_vm2, %v442_v19  ;;  %v443_v30 = vpack.c.bf16 %v192_v21, %v192_v21  ;;  %328 = vrot.lane.b32.xlu1 %v442_v19, %s601_s2  ;;  %318 = vst.msk [vmem:[#allocation8 + $0x50] sm:$0xf] %vm307_vm2, %v450_v24  ;;  %v451_v32 = vpack.c.bf16 %v224_v26, %v224_v26  ;;  %344 = vrot.lane.b32.xlu0 %v450_v24, %s601_s2 }
 0x115   :  { %308 = vst.msk [vmem:[#allocation8] sm:$0xf] %vm307_vm2, %v440_v25  ;;  %v441_v33 = vpack.c.bf16 %v184_v27, %v184_v27  ;;  %316 = vst.msk [vmem:[#allocation8 + $0x40] sm:$0xf] %vm307_vm2, %v448_v29  ;;  %v449_v34 = vpack.c.bf16 %v216_v31, %v216_v31 }
 0x116   :  { %311 = vst.msk [vmem:[#allocation8 + $0x18] sm:$0xf] %vm307_vm2, %v443_v30  ;;  %319 = vst.msk [vmem:[#allocation8 + $0x58] sm:$0xf] %vm307_vm2, %v451_v32 }
 0x117   :  { %309 = vst.msk [vmem:[#allocation8 + $0x8] sm:$0xf] %vm307_vm2, %v441_v33  ;;  %v473_v35 = vpop.f32.mrb[4].mxu0  ;;  %317 = vst.msk [vmem:[#allocation8 + $0x48] sm:$0xf] %vm307_vm2, %v449_v34  ;;  %v481_v38 = vpop.f32.mrb[4].mxu1 }
 0x118   :  { %330 = vrot.lane.b32.xlu1 %v443_v30, %s601_s2  ;;  %v205_v36 = vadd.f32 %v473_v35, %v407_v10  ;;  %v196_v37 = vpop.f32.mrb[5].mxu0  ;;  %324 = vrot.lane.b32.xlu0 %v440_v25, %s601_s2  ;;  %v237_v41 = vadd.f32 %v481_v38, %v407_v10  ;;  %v228_v42 = vpop.f32.mrb[5].mxu1 }
 0x119   :  { %v197_v39 = vadd.f32 %v407_v10, %v196_v37  ;;  %v474_v40 = vpop.f32.mrb[6].mxu0  ;;  %v229_v46 = vadd.f32 %v407_v10, %v228_v42  ;;  %v482_v47 = vpop.f32.mrb[6].mxu1 }
 0x11a   :  { %v446_v43 = vpack.c.bf16 %v205_v36, %v205_v36  ;;  %v208_v44 = vadd.f32 %v474_v40, %v407_v10  ;;  %v199_v45 = vpop.f32.mrb[7].mxu0  ;;  %v454_v50 = vpack.c.bf16 %v237_v41, %v237_v41  ;;  %v240_v51 = vadd.f32 %v482_v47, %v407_v10  ;;  %v231_v52 = vpop.f32.mrb[7].mxu1 }
 0x11b   :  { %v444_v48 = vpack.c.bf16 %v197_v39, %v197_v39  ;;  %v200_v49 = vadd.f32 %v407_v10, %v199_v45  ;;  %v452_v54 = vpack.c.bf16 %v229_v46, %v229_v46  ;;  %v232_v55 = vadd.f32 %v407_v10, %v231_v52 }
 0x11c   :  { %314 = vst.msk [vmem:[#allocation8 + $0x30] sm:$0xf] %vm307_vm2, %v446_v43  ;;  %346 = vrot.lane.b32.xlu1 %v451_v32, %s601_s2  ;;  %v447_v53 = vpack.c.bf16 %v208_v44, %v208_v44  ;;  %340 = vrot.lane.b32.xlu0 %v448_v29, %s601_s2  ;;  %322 = vst.msk [vmem:[#allocation8 + $0x70] sm:$0xf] %vm307_vm2, %v454_v50  ;;  %v455_v57 = vpack.c.bf16 %v240_v51, %v240_v51 }
 0x11d   :  { %312 = vst.msk [vmem:[#allocation8 + $0x20] sm:$0xf] %vm307_vm2, %v444_v48  ;;  %v445_v56 = vpack.c.bf16 %v200_v49, %v200_v49  ;;  %320 = vst.msk [vmem:[#allocation8 + $0x60] sm:$0xf] %vm307_vm2, %v452_v54  ;;  %v453_v58 = vpack.c.bf16 %v232_v55, %v232_v55 }
 0x11e   :  { %315 = vst.msk [vmem:[#allocation8 + $0x38] sm:$0xf] %vm307_vm2, %v447_v53  ;;  %323 = vst.msk [vmem:[#allocation8 + $0x78] sm:$0xf] %vm307_vm2, %v455_v57 }
 0x11f   :  { %313 = vst.msk [vmem:[#allocation8 + $0x28] sm:$0xf] %vm307_vm2, %v445_v56  ;;  %321 = vst.msk [vmem:[#allocation8 + $0x68] sm:$0xf] %vm307_vm2, %v453_v58 }
 0x120   :  { %342 = vrot.lane.b32.xlu1 %v449_v34, %s601_s2  ;;  %326 = vrot.lane.b32.xlu0 %v441_v33, %s601_s2 }
 0x124   :  { %338 = vrot.lane.b32.xlu1 %v447_v53, %s601_s2  ;;  %336 = vrot.lane.b32.xlu0 %v446_v43, %s601_s2 }
 0x128   :  { %334 = vrot.lane.b32.xlu1 %v445_v56, %s601_s2  ;;  %332 = vrot.lane.b32.xlu0 %v444_v48, %s601_s2 }
 0x12c   :  { %350 = vrot.lane.b32.xlu1 %v453_v58, %s601_s2  ;;  %348 = vrot.lane.b32.xlu0 %v452_v54, %s601_s2 }
 0x130   :  { %354 = vrot.lane.b32.xlu1 %v455_v57, %s601_s2  ;;  %352 = vrot.lane.b32.xlu0 %v454_v50, %s601_s2 }
 0x186   :  { %v329_v59 = vpop.permute.xlu1 %328  ;;  %v345_v60 = vpop.permute.xlu0 %344 }
 0x187   :  { %375 = vst.msk [vmem:[#allocation8 + $0x14] sm:$0xf] %vm307_vm2, %v329_v59  ;;  %383 = vst.msk [vmem:[#allocation8 + $0x54] sm:$0xf] %vm307_vm2, %v345_v60 }
 0x18a   :  { %v331_v61 = vpop.permute.xlu1 %330  ;;  %v325_v62 = vpop.permute.xlu0 %324 }
 0x18b   :  { %376 = vst.msk [vmem:[#allocation8 + $0x1c] sm:$0xf] %vm307_vm2, %v331_v61  ;;  %373 = vst.msk [vmem:[#allocation8 + $0x4] sm:$0xf] %vm307_vm2, %v325_v62 }
 0x18e   :  { %v347_v63 = vpop.permute.xlu1 %346  ;;  %v341_v0 = vpop.permute.xlu0 %340 }
 0x18f   :  { %384 = vst.msk [vmem:[#allocation8 + $0x5c] sm:$0xf] %vm307_vm2, %v347_v63  ;;  %381 = vst.msk [vmem:[#allocation8 + $0x44] sm:$0xf] %vm307_vm2, %v341_v0 }
 0x192   :  { %v343_v1 = vpop.permute.xlu1 %342  ;;  %v327_v2 = vpop.permute.xlu0 %326 }
 0x193   :  { %382 = vst.msk [vmem:[#allocation8 + $0x4c] sm:$0xf] %vm307_vm2, %v343_v1  ;;  %374 = vst.msk [vmem:[#allocation8 + $0xc] sm:$0xf] %vm307_vm2, %v327_v2 }
 0x196   :  { %v339_v3 = vpop.permute.xlu1 %338  ;;  %v337_v4 = vpop.permute.xlu0 %336 }
 0x197   :  { %380 = vst.msk [vmem:[#allocation8 + $0x3c] sm:$0xf] %vm307_vm2, %v339_v3  ;;  %379 = vst.msk [vmem:[#allocation8 + $0x34] sm:$0xf] %vm307_vm2, %v337_v4 }
 0x19a   :  { %v335_v5 = vpop.permute.xlu1 %334  ;;  %v333_v6 = vpop.permute.xlu0 %332 }
 0x19b   :  { %378 = vst.msk [vmem:[#allocation8 + $0x2c] sm:$0xf] %vm307_vm2, %v335_v5  ;;  %377 = vst.msk [vmem:[#allocation8 + $0x24] sm:$0xf] %vm307_vm2, %v333_v6 }
 0x19e   :  { %v351_v7 = vpop.permute.xlu1 %350  ;;  %v349_v8 = vpop.permute.xlu0 %348 }
 0x19f   :  { %386 = vst.msk [vmem:[#allocation8 + $0x6c] sm:$0xf] %vm307_vm2, %v351_v7  ;;  %385 = vst.msk [vmem:[#allocation8 + $0x64] sm:$0xf] %vm307_vm2, %v349_v8 }
 0x1a2   :  { %v355_v9 = vpop.permute.xlu1 %354  ;;  %v353_v10 = vpop.permute.xlu0 %352 }
 0x1a3   :  { %388 = vst.msk [vmem:[#allocation8 + $0x7c] sm:$0xf] %vm307_vm2, %v355_v9  ;;  %387 = vst.msk [vmem:[#allocation8 + $0x74] sm:$0xf] %vm307_vm2, %v353_v10 }
 0x1a4   :  { %579 = shalt.err (!%p576_p0)
}
 0x1a5   :  { %s580_s27 = scalar_lea.hbm %s743_s3, 2048 }
 0x1a6   :  { %p581_p1 = scmp.ne.s32.totalorder %s743_s3, %s580_s27  ;;  %p584_p2 = scmp.lt.u32.totalorder %s580_s27, %s743_s3 }
 0x1a8   :  { %p586_p3 = pnand %p584_p2, %p581_p1 }
 0x1aa   :  { %589 = shalt.err (!%p586_p3)
}
 0x1ab   :  { %400 = dma.vmem_to_hbm [thread:$0]  %s395_s23, 2048, %s743_s3, [#allocation4], %s598_s1, %s598_s1, %s599_s7  }
 0x1ac   :  { %594 = dma.done.wait [#allocation4], 2048  }
 0x1ad   :  { %595 = vsyncadd [#allocation4], 4294965248 }
 0x1ae   :  { %404 = vsyncpa [#allocation3], 1 }
 0x1af   :  { %405 = vsyncpa [#allocation6], 1 }
 0x1b0   :  { %406 = vsyncpa [#allocation4], 1 }

// kernel: unet_up_forward.3
= control target key start
LH: loop header
LB: loop body
LE: loop exit
PB: predicated region body
PF: predicated region fallthrough
CT: control target
= control target key end

     0   :  { %s10197_s0 = inlined_call_operand.hbm [shape: bf16[2,256,4], index: 0, kind: input, shape index: {}, may-alias: {0,1}]   ;;  %s10198_s1 = inlined_call_operand.hbm [shape: bf16[2,256,4], index: 1, kind: input, shape index: {}, may-alias: {0,1}]   ;;  %s10199_s2 = inlined_call_operand.hbm [shape: bf16[2,256,4], index: 2, kind: input, shape index: {}, may-alias: {2,3}]   ;;  %s10200_s3 = inlined_call_operand.hbm [shape: bf16[2,256,4], index: 3, kind: input, shape index: {}, may-alias: {2,3}]   ;;  %s10201_s4 = inlined_call_operand.hbm [shape: bf16[9,8,4], index: 4, kind: input, shape index: {}]   ;;  %s10202_s5 = inlined_call_operand.hbm [shape: f32[1,4], index: 5, kind: input, shape index: {}]   ;;  %s10203_s6 = inlined_call_operand.hbm [shape: bf16[9,4,4], index: 6, kind: input, shape index: {}]   ;;  %s10204_s7 = inlined_call_operand.hbm [shape: f32[1,4], index: 7, kind: input, shape index: {}]   ;;  %s10205_s8 = inlined_call_operand.hbm [shape: f32[2,192,4], index: 8, kind: output, shape index: {}]  }
   0x1   :  { %10241 = sst [smem:[#allocation39_spill]] %s10198_s1 }
   0x2   :  { %10242 = sst [smem:[#allocation40_spill]] %s10200_s3 }
   0x3   :  { %10243 = sst [smem:[#allocation41_spill]] %s10201_s4 }
   0x4   :  { %10244 = sst [smem:[#allocation42_spill]] %s10202_s5 }
   0x5   :  { %10245 = sst [smem:[#allocation43_spill]] %s10205_s8 }
   0x6   :  { %13 = vsyncpa [#allocation5], 0 }
   0x7   :  { %15 = vsyncpa [#allocation5 + $0x1], 0 }
   0x8   :  { %16 = vsyncpa [#allocation8], 0 }
   0x9   :  { %18 = vsyncpa [#allocation8 + $0x1], 0 }
   0xa   :  { %19 = vsyncpa [#allocation11], 0 }
   0xb   :  { %21 = vsyncpa [#allocation11 + $0x1], 0 }
   0xc   :  { %22 = vsyncpa [#allocation14], 0 }
   0xd   :  { %23 = vsyncpa [#allocation17], 0 }
   0xe   :  { %24 = vsyncpa [#allocation6], 0 }
   0xf   :  { %26 = vsyncpa [#allocation6 + $0x1], 0  ;;  %s8417_s27 = smov 0   ;;  %s8419_s28 = smov 0  }
  0x10   :  { %s8421_s29 = smov 0   ;;  %s8423_s30 = smov 0  }
  0x11   :  { %s8425_s9 = smov 0   ;;  %s8427_s10 = smov 0  }
  0x12 LB: > { %10246 = sst [smem:[#allocation26_spill]] %s8333_s27  ;;  %s8448_s11 = sadd.s32 4294967295, %s8353_s10   ;;  %s8353_s10 = sphi %s8427_s10, %s32_s10   ;;  %s8349_s9 = sphi %s8425_s9, %s10307_s9   ;;  %s8345_s30 = sphi %s8423_s30, %s10306_s30   ;;  %s8341_s29 = sphi %s8421_s29, %s10305_s29   ;;  %s8337_s28 = sphi %s8419_s28, %s10304_s28   ;;  %s8333_s27 = sphi %s8417_s27, %s10303_s27  }
  0x13   : > { %10247 = sst [smem:[#allocation27_spill]] %s8337_s28  ;;  %s6191_s12 = sadd.s32 4294967294, %s8353_s10  }
  0x14   : > { %10248 = sst [smem:[#allocation28_spill]] %s8341_s29  ;;  %p66_p0 = scmp.ne.s32.totalorder %s8337_s28, %s8333_s27 }
  0x15   : > { %10249 = sst [smem:[#allocation29_spill]] %s8345_s30  ;;  %p10206_p1 = scmp.eq.s32.totalorder %s8448_s11, 0 }
  0x16   : > { %10250 = sst [smem:[#allocation30_spill]] %s8349_s9  ;;  %p282_p3 = scmp.eq.s32.totalorder %s6191_s12, 1 }
  0x17   : > { %10251 = sst [smem:[#allocation31_spill]] %s8448_s11  ;;  %p8457_p4 = por %p10206_p1, %p66_p0 }
  0x18   : > { %p6192_p5 = scmp.ge.s32.totalorder %s8353_s10, 1  ;;  %p8462_p6 = por %p282_p3, %p66_p0 }
  0x19   : > { %s10252_s13 = scalar_select %p8457_p4, 1, 0 }
  0x1a   : > { %s10254_s14 = scalar_select %p8462_p6, 1, 0 }
  0x1b   : > { %10253 = sst [smem:[#allocation32_spill]] %s10252_s13  ;;  %p289_p7 = scmp.lt.s32.totalorder %s8353_s10, 3 }
  0x1c   : > { %10255 = sst [smem:[#allocation33_spill]] %s10254_s14  ;;  %s8355_s16 = smov [#allocation12]  }
  0x1d   : > { %p8467_p8 = pnand %p6192_p5, %p289_p7  ;;  %s301_s17 = sshll.u32 %s8355_s16, 4  ;;  %s8471_s17 = int_to_ptr.vmem [resolvable:$true] %s301_s17 }
  0x1e   : > { %s8356_s19 = smov [#allocation13]   ;;  %s10259_s4 = sld [smem:[#allocation41_spill]] }
  0x1f   : > { %s10256_s15 = scalar_select %p8467_p8, 1, 0 }
  0x20   : > { %p7832_p9 = pneg %p8467_p8  ;;  %s315_s20 = sshll.u32 %s8356_s19, 4  ;;  %s8482_s20 = int_to_ptr.vmem [resolvable:$true] %s315_s20 }
  0x21   : > { %10257 = sst [smem:[#allocation34_spill]] %s10256_s15 }
  0x22   : > { %p8478_p11 = pnand %p7832_p9, %p10206_p1 }
  0x24   : > { %s10258_s18 = scalar_select %p8478_p11, 1, 0 }
  0x25   : > { %s8019_s23 = scalar_lea.hbm %s10259_s4, 576  ;;  %p8492_p13 = pneg %p8478_p11 }
  0x26   : > { %p8020_p12 = scmp.ne.s32.totalorder %s10259_s4, %s8019_s23  ;;  %p8026_p5 = scmp.lt.u32.totalorder %s8019_s23, %s10259_s4 }
  0x27   : > { %s10260_s26 = scalar_select %p8492_p13, 1, 0 }
  0x28   : > { %p8022_p0 = pnand %p8492_p13, %p8020_p12 }
  0x2a   : > { %p8023_p3 = pneg %p8022_p0 }
  0x2c   : > { %p8028_p7 = pnand %p8026_p5, %p8023_p3 }
  0x2e   : > { %8031 = shalt.err (!%p8028_p7)
}
  0x2f   : > { %s8032_s19 = scalar_lea.vmem %s8471_s17, 576  ;;  %p8040_p2 = scmp.lt.s32.totalorder %s8471_s17, %s8471_s17 }
  0x30   : > { %p8033_p9 = scmp.ne.s32.totalorder %s8471_s17, %s8032_s19  ;;  %p8041_p6 = scmp.lt.s32.totalorder %s8032_s19, %s8032_s19 }
  0x32   : > { %p8035_p10 = pnand %p8033_p9, %p8492_p13  ;;  %p8042_p12 = por %p8041_p6, %p8040_p2 }
  0x34   : > { %p8036_p1 = pneg %p8035_p10 }
  0x36   : > { %p8043_p0 = pnand %p8042_p12, %p8036_p1 }
  0x38   : > { %8046 = shalt.err (!%p8043_p0)
}
  0x39   : > { %s10210_s21 = smov 64   ;;  %s10212_s22 = smov 4  }
  0x3a   : > { %7835 = dma.hbm_to_vmem [thread:$0]  (!%p8478_p11), %s10259_s4, 576, %s8471_s17, [#allocation11], %s10210_s21, %s10210_s21, %s10212_s22  }
  0x3b   : > { %s10261_s5 = sld [smem:[#allocation42_spill]] }
  0x41   : > { %s8047_s16 = scalar_lea.hbm %s10261_s5, 16 }
  0x42   : > { %p8048_p1 = scmp.ne.s32.totalorder %s10261_s5, %s8047_s16  ;;  %p8054_p10 = scmp.lt.u32.totalorder %s8047_s16, %s10261_s5 }
  0x44   : > { %p8050_p2 = pnand %p8048_p1, %p8492_p13 }
  0x46   : > { %p8051_p6 = pneg %p8050_p2 }
  0x48   : > { %p8056_p3 = pnand %p8054_p10, %p8051_p6 }
  0x4a   : > { %8059 = shalt.err (!%p8056_p3)
}
  0x4b   : > { %s8060_s17 = scalar_lea.vmem %s8482_s20, 16  ;;  %s8067_s14 = scalar_lea.vmem %s8482_s20, 32 }
  0x4c   : > { %p8061_p5 = scmp.ne.s32.totalorder %s8482_s20, %s8060_s17  ;;  %p8068_p12 = scmp.lt.s32.totalorder %s8482_s20, %s8482_s20 }
  0x4d   : > { %p8069_p0 = scmp.lt.s32.totalorder %s8067_s14, %s8060_s17 }
  0x4e   : > { %p8063_p7 = pnand %p8061_p5, %p8492_p13 }
  0x4f   : > { %p8070_p1 = por %p8069_p0, %p8068_p12 }
  0x50   : > { %p8064_p9 = pneg %p8063_p7 }
  0x52   : > { %p8071_p2 = pnand %p8070_p1, %p8064_p9 }
  0x54   : > { %8074 = shalt.err (!%p8071_p2)
}
  0x55   : > { %7838 = dma.hbm_to_vmem [thread:$0]  (!%p8478_p11), %s10261_s5, 16, %s8482_s20, [#allocation14]  }
  0x56   : > { %s44_s23 = sadd.s32 1, %s8349_s9  ;;  %s53_s24 = sadd.s32 1, %s8341_s29 }
  0x57   : > { %p46_p6 = scmp.ge.s32.totalorder %s44_s23, 2  ;;  %p60_p10 = scmp.ne.s32.totalorder %s8341_s29, %s8337_s28 }
  0x58   : > { %p61_p3 = scmp.eq.s32.totalorder %s8353_s10, 0  ;;  %p7866_p5 = scmp.lt.s32.totalorder %s8353_s10, 2 }
  0x59   : > { %s10309_s23 = smov (%p46_p6, %s44_s23), 0  ;;  %p10263_p9 = scmp.eq.s32.totalorder %s8448_s11, 1 }
  0x5a   : > { %10262 = sst [smem:[#allocation35_spill]] %s10309_s23  ;;  %p62_p7 = por %p61_p3, %p60_p10 }
  0x5b   : > { %p8550_p12 = por %p10263_p9, %p60_p10  ;;  %s48_s12 = ssub.s32 %s8349_s9, %s10309_s23 }
  0x5c   : > { %s8557_s16 = sand.u32 1, %s8341_s29   ;;  %p51_p0 = scmp.eq.s32.totalorder %s48_s12, 0 }
  0x5d   : > { %s10264_s25 = scalar_select %p8550_p12, 1, 0 }
  0x5e   : > { %s8560_s20 = sshll.u32 %s8349_s9, 11  ;;  %p8562_p1 = pnand %p7866_p5, %p62_p7 }
  0x5f   : > { %10265 = sst [smem:[#allocation36_spill]] %s10264_s25  ;;  %s10220_s17 = sand.u32 1, %s8353_s10  }
  0x60   : > { %s10266_s19 = scalar_select %p8562_p1, 1, 0 }
  0x61   : > { %s8568_s14 = scalar_select %p51_p0, %s8341_s29, %s53_s24  }
  0x62   : > { %s10216_s8 = sshll.u32 %s8557_s16, 5  ;;  %s10217_s27 = sadd.s32 1536, %s8560_s20 }
  0x63   : > { %10267 = sst [smem:[#allocation37_spill]] %s8568_s14  ;;  %s10268_s1 = sld [smem:[#allocation39_spill]] }
  0x64   : > { %s383_s12 = scalar_lea.vmem [#allocation7], %s10216_s8  ;;  %s8585_s24 = scalar_lea.sflag [#allocation8], %s10220_s17 }
  0x65   : > { %s396_s5 = sshll.u32 %s383_s12, 4  ;;  %p8591_p6 = pneg %p8562_p1  ;;  %s8581_s5 = int_to_ptr.vmem [resolvable:$true] %s396_s5 }
  0x67   : > { %s10269_s9 = scalar_select %p8591_p6, 1, 0 }
  0x69   : > { %s8577_s4 = scalar_lea.hbm %s10268_s1, %s10217_s27  ;;  %s8080_s12 = scalar_lea.hbm %s10268_s1, 4096 }
  0x6a   : > { %s8075_s23 = scalar_lea.hbm %s8577_s4, 512  ;;  %p8081_p5 = scmp.lt.u32.totalorder %s8577_s4, %s10268_s1 }
  0x6b   : > { %p8076_p2 = scmp.ne.s32.totalorder %s8577_s4, %s8075_s23  ;;  %p8082_p7 = scmp.lt.u32.totalorder %s8080_s12, %s8075_s23 }
  0x6c   : > { %p8084_p0 = scmp.lt.u32.totalorder %s8075_s23, %s8577_s4 }
  0x6d   : > { %p8078_p10 = pnand %p8591_p6, %p8076_p2  ;;  %p8083_p9 = por %p8082_p7, %p8081_p5 }
  0x6f   : > { %p8079_p3 = pneg %p8078_p10  ;;  %p8085_p12 = por %p8084_p0, %p8083_p9 }
  0x71   : > { %p8086_p4 = pnand %p8085_p12, %p8079_p3 }
  0x73   : > { %8089 = shalt.err (!%p8086_p4)
}
  0x74   : > { %s8090_s17 = scalar_lea.vmem %s8581_s5, 512  ;;  %s8359_s21 = smov [#allocation7]  }
  0x75   : > { %p8091_p2 = scmp.ne.s32.totalorder %s8581_s5, %s8090_s17  ;;  %s8095_s22 = sshll.u32 %s8359_s21, 4  ;;  %s8096_s22 = int_to_ptr.vmem [resolvable:$false] %s8095_s22 }
  0x76   : > { %s8097_s8 = scalar_lea.vmem %s8096_s22, 1024  ;;  %p8098_p11 = scmp.lt.s32.totalorder %s8581_s5, %s8096_s22 }
  0x77   : > { %p8093_p10 = pnand %p8091_p2, %p8591_p6  ;;  %p8099_p13 = scmp.lt.s32.totalorder %s8097_s8, %s8090_s17 }
  0x79   : > { %p8094_p8 = pneg %p8093_p10  ;;  %p8100_p5 = por %p8099_p13, %p8098_p11 }
  0x7b   : > { %p8101_p7 = pnand %p8100_p5, %p8094_p8 }
  0x7d   : > { %8104 = shalt.err (!%p8101_p7)
}
  0x7e   : > { %s10270_s23 = smov 4   ;;  %s10271_s27 = smov 64  }
  0x7f   : > { %7851 = dma.hbm_to_vmem [thread:$0]  (!%p8562_p1), %s8577_s4, 512, %s8581_s5, %s8585_s24, %s10271_s27, %s10271_s27, %s10270_s23  }
  0x80   : > { %s10272_s12 = sadd.s32 1536, %s8560_s20  ;;  %s10273_s3 = sld [smem:[#allocation40_spill]] }
  0x81   : > { %s10274_s22 = sshll.u32 %s8557_s16, 5  ;;  %s8360_s29 = smov [#allocation15]  }
  0x82   : > { %s439_s8 = scalar_lea.vmem [#allocation10], %s10274_s22  ;;  %s325_s25 = sshll.u32 %s8360_s29, 4  ;;  %s326_s25 = int_to_ptr.vmem [resolvable:$true] %s325_s25 }
  0x83   : > { %s452_s14 = sshll.u32 %s439_s8, 4  ;;  %s8105_s13 = scalar_lea.hbm %s10203_s6, 288  ;;  %s8627_s14 = int_to_ptr.vmem [resolvable:$true] %s452_s14 }
  0x84   : > { %10275 = sst [smem:[#allocation38_spill]] %s8627_s14  ;;  %p8106_p4 = scmp.ne.s32.totalorder %s10203_s6, %s8105_s13 }
  0x85   : > { %p10276_p8 = scmp.ne.s32.totalorder %s10260_s26, 0  ;;  %p8112_p12 = scmp.lt.u32.totalorder %s8105_s13, %s10203_s6 }
  0x86   : > { %s8623_s17 = scalar_lea.hbm %s10273_s3, %s10272_s12 }
  0x87   : > { %p8108_p11 = pnand %p8106_p4, %p10276_p8 }
  0x89   : > { %p8109_p13 = pneg %p8108_p11 }
  0x8b   : > { %p8114_p3 = pnand %p8112_p12, %p8109_p13 }
  0x8d   : > { %8117 = shalt.err (!%p8114_p3)
}
  0x8e   : > { %s8118_s12 = scalar_lea.vmem %s326_s25, 288  ;;  %p8126_p10 = scmp.lt.s32.totalorder %s326_s25, %s326_s25 }
  0x8f   : > { %p8119_p9 = scmp.ne.s32.totalorder %s326_s25, %s8118_s12  ;;  %p8127_p5 = scmp.lt.s32.totalorder %s8118_s12, %s8118_s12 }
  0x91   : > { %p8121_p0 = pnand %p8119_p9, %p10276_p8  ;;  %p8128_p7 = por %p8127_p5, %p8126_p10 }
  0x93   : > { %p8122_p2 = pneg %p8121_p0 }
  0x95   : > { %p8129_p1 = pnand %p8128_p7, %p8122_p2 }
  0x97   : > { %8132 = shalt.err (!%p8129_p1)
}
  0x98   : > { %s8361_s28 = smov 32   ;;  %s8362_s29 = smov 2  }
  0x99   : > { %p10277_p4 = scmp.ne.s32.totalorder %s10258_s18, 0  ;;  %s8363_s13 = smov [#allocation16]  }
  0x9a   : > { %s339_s21 = sshll.u32 %s8363_s13, 4  ;;  %s7801_s22 = smul.u32 96, %s8557_s16  ;;  %s340_s21 = int_to_ptr.vmem [resolvable:$true] %s339_s21 }
  0x9b   : > { %7841 = dma.hbm_to_vmem [thread:$0]  (!%p10277_p4), %s10203_s6, 288, %s326_s25, [#allocation14], %s8361_s28, %s8361_s28, %s8362_s29  }
  0x9c   : > { %s8652_s1 = scalar_lea.hbm %s10197_s0, %s8560_s20  ;;  %s8133_s15 = scalar_lea.hbm %s10204_s7, 16 }
  0x9d   : > { %p8134_p1 = scmp.ne.s32.totalorder %s10204_s7, %s8133_s15  ;;  %p8140_p12 = scmp.lt.u32.totalorder %s8133_s15, %s10204_s7 }
  0x9f   : > { %p8136_p11 = pnand %p8134_p1, %p10276_p8 }
  0xa1   : > { %p8137_p13 = pneg %p8136_p11 }
  0xa3   : > { %p8142_p3 = pnand %p8140_p12, %p8137_p13 }
  0xa5   : > { %8145 = shalt.err (!%p8142_p3)
}
  0xa6   : > { %s8146_s29 = scalar_lea.vmem %s340_s21, 16  ;;  %s8153_s30 = scalar_lea.vmem %s340_s21, 32 }
  0xa7   : > { %p8147_p9 = scmp.ne.s32.totalorder %s340_s21, %s8146_s29  ;;  %p8154_p10 = scmp.lt.s32.totalorder %s340_s21, %s340_s21 }
  0xa8   : > { %p8155_p5 = scmp.lt.s32.totalorder %s8153_s30, %s8146_s29 }
  0xa9   : > { %p8149_p0 = pnand %p8147_p9, %p10276_p8 }
  0xaa   : > { %p8156_p7 = por %p8155_p5, %p8154_p10 }
  0xab   : > { %p8150_p2 = pneg %p8149_p0 }
  0xad   : > { %p8157_p6 = pnand %p8156_p7, %p8150_p2 }
  0xaf   : > { %8160 = shalt.err (!%p8157_p6)
}
  0xb0   : > { %7844 = dma.hbm_to_vmem [thread:$0]  (!%p10277_p4), %s10204_s7, 16, %s340_s21, [#allocation17]  }
  0xb1   : > { %s354_s15 = scalar_lea.vmem [#allocation4], %s7801_s22  ;;  %s8676_s8 = scalar_lea.hbm %s10199_s2, %s8560_s20 }
  0xb2   : > { %s369_s26 = sshll.u32 %s354_s15, 4  ;;  %s8680_s18 = scalar_lea.vmem [#allocation9], %s7801_s22  ;;  %s8678_s26 = int_to_ptr.vmem [resolvable:$true] %s369_s26 }
  0xb3   : > { %s425_s4 = sshll.u32 %s8680_s18, 4  ;;  %s351_s5 = scalar_lea.sflag [#allocation5], %s8557_s16  ;;  %s8712_s4 = int_to_ptr.vmem [resolvable:$true] %s425_s4 }
  0xb4   : > { %s8161_s12 = scalar_lea.hbm %s8652_s1, 1536  ;;  %p10278_p8 = scmp.ne.s32.totalorder %s10269_s9, 0 }
  0xb5   : > { %p8162_p6 = scmp.ne.s32.totalorder %s8652_s1, %s8161_s12  ;;  %s8166_s28 = scalar_lea.hbm %s10197_s0, 4096 }
  0xb6   : > { %p8167_p11 = scmp.lt.u32.totalorder %s8652_s1, %s10197_s0  ;;  %p8168_p13 = scmp.lt.u32.totalorder %s8166_s28, %s8161_s12 }
  0xb7   : > { %p8164_p1 = pnand %p8162_p6, %p10278_p8  ;;  %p8170_p3 = scmp.lt.u32.totalorder %s8161_s12, %s8652_s1 }
  0xb8   : > { %p8169_p12 = por %p8168_p13, %p8167_p11 }
  0xb9   : > { %p8165_p4 = pneg %p8164_p1 }
  0xba   : > { %p8171_p9 = por %p8170_p3, %p8169_p12 }
  0xbc   : > { %p8172_p0 = pnand %p8171_p9, %p8165_p4 }
  0xbe   : > { %8175 = shalt.err (!%p8172_p0)
}
  0xbf   : > { %s8176_s20 = scalar_lea.vmem %s8678_s26, 1536  ;;  %s8364_s22 = smov [#allocation4]  }
  0xc0   : > { %p8177_p2 = scmp.ne.s32.totalorder %s8678_s26, %s8176_s20  ;;  %s8181_s3 = sshll.u32 %s8364_s22, 4  ;;  %s8182_s3 = int_to_ptr.vmem [resolvable:$false] %s8181_s3 }
  0xc1   : > { %s8183_s14 = scalar_lea.vmem %s8182_s3, 3072  ;;  %p8184_p7 = scmp.lt.s32.totalorder %s8678_s26, %s8182_s3 }
  0xc2   : > { %p8179_p10 = pnand %p8177_p2, %p10278_p8  ;;  %p8185_p6 = scmp.lt.s32.totalorder %s8183_s14, %s8176_s20 }
  0xc4   : > { %p8180_p5 = pneg %p8179_p10  ;;  %p8186_p1 = por %p8185_p6, %p8184_p7 }
  0xc6   : > { %p8187_p11 = pnand %p8186_p1, %p8180_p5 }
  0xc8   : > { %8190 = shalt.err (!%p8187_p11)
}
  0xc9   : > { %p10279_p4 = scmp.ne.s32.totalorder %s10266_s19, 0  ;;  %s8191_s15 = scalar_lea.hbm %s8676_s8, 1536 }
  0xca   : > { %p8192_p13 = scmp.ne.s32.totalorder %s8676_s8, %s8191_s15  ;;  %s8196_s16 = scalar_lea.hbm %s10199_s2, 4096 }
  0xcb   : > { %7848 = dma.hbm_to_vmem [thread:$0]  (!%p10279_p4), %s8652_s1, 1536, %s8678_s26, %s351_s5, %s10271_s27, %s10271_s27, %s10270_s23  }
  0xcc   : > { %p8194_p12 = pnand %p8192_p13, %p10278_p8  ;;  %p8197_p9 = scmp.lt.u32.totalorder %s8676_s8, %s10199_s2 }
  0xcd   : > { %p8198_p0 = scmp.lt.u32.totalorder %s8196_s16, %s8191_s15  ;;  %p8200_p10 = scmp.lt.u32.totalorder %s8191_s15, %s8676_s8 }
  0xce   : > { %p8195_p3 = pneg %p8194_p12 }
  0xcf   : > { %p8199_p2 = por %p8198_p0, %p8197_p9 }
  0xd1   : > { %p8201_p5 = por %p8200_p10, %p8199_p2 }
  0xd3   : > { %p8202_p7 = pnand %p8201_p5, %p8195_p3 }
  0xd5   : > { %8205 = shalt.err (!%p8202_p7)
}
  0xd6   : > { %s8206_s1 = scalar_lea.vmem %s8712_s4, 1536  ;;  %s8365_s26 = smov [#allocation9]  }
  0xd7   : > { %p8207_p6 = scmp.ne.s32.totalorder %s8712_s4, %s8206_s1  ;;  %s8211_s18 = sshll.u32 %s8365_s26, 4  ;;  %s8212_s18 = int_to_ptr.vmem [resolvable:$false] %s8211_s18 }
  0xd8   : > { %s8213_s5 = scalar_lea.vmem %s8212_s18, 3072  ;;  %p8214_p13 = scmp.lt.s32.totalorder %s8712_s4, %s8212_s18 }
  0xd9   : > { %p8209_p1 = pnand %p8207_p6, %p10278_p8  ;;  %p8215_p12 = scmp.lt.s32.totalorder %s8213_s5, %s8206_s1 }
  0xdb   : > { %p8210_p11 = pneg %p8209_p1  ;;  %p8216_p9 = por %p8215_p12, %p8214_p13 }
  0xdd   : > { %p8217_p0 = pnand %p8216_p9, %p8210_p11 }
  0xdf   : > { %8220 = shalt.err (!%p8217_p0)
}
  0xe0   : > { %7854 = dma.hbm_to_vmem [thread:$0]  (!%p10279_p4), %s8676_s8, 1536, %s8712_s4, %s8585_s24, %s10271_s27, %s10271_s27, %s10270_s23  }
  0xe1   : > { %s10280_s25 = sand.u32 1, %s8353_s10   ;;  %s8221_s29 = scalar_lea.hbm %s8623_s17, 512 }
  0xe2   : > { %s8741_s28 = scalar_lea.sflag [#allocation11], %s10280_s25  ;;  %p8222_p3 = scmp.ne.s32.totalorder %s8623_s17, %s8221_s29 }
  0xe3   : > { %s10281_s22 = sld [smem:[#allocation40_spill]]  ;;  %p8230_p1 = scmp.lt.u32.totalorder %s8221_s29, %s8623_s17 }
  0xe4   : > { %p8224_p2 = pnand %p8222_p3, %p10278_p8 }
  0xe6   : > { %p8225_p10 = pneg %p8224_p2 }
  0xe9   : > { %s8226_s3 = scalar_lea.hbm %s10281_s22, 4096  ;;  %p8227_p5 = scmp.lt.u32.totalorder %s8623_s17, %s10281_s22 }
  0xea   : > { %p8228_p7 = scmp.lt.u32.totalorder %s8226_s3, %s8221_s29 }
  0xec   : > { %p8229_p6 = por %p8228_p7, %p8227_p5 }
  0xee   : > { %p8231_p11 = por %p8230_p1, %p8229_p6 }
  0xf0   : > { %p8232_p13 = pnand %p8231_p11, %p8225_p10 }
  0xf2   : > { %8235 = shalt.err (!%p8232_p13)
}
  0xf3   : > { %s10282_s24 = sld [smem:[#allocation38_spill]]  ;;  %s8366_s4 = smov [#allocation10]  }
  0xf4   : > { %s8241_s11 = sshll.u32 %s8366_s4, 4  ;;  %s8242_s11 = int_to_ptr.vmem [resolvable:$false] %s8241_s11 }
  0xf5   : > { %s8243_s13 = scalar_lea.vmem %s8242_s11, 1024 }
  0xf9   : > { %s8236_s8 = scalar_lea.vmem %s10282_s24, 512  ;;  %p8244_p3 = scmp.lt.s32.totalorder %s10282_s24, %s8242_s11 }
  0xfa   : > { %p8237_p12 = scmp.ne.s32.totalorder %s10282_s24, %s8236_s8  ;;  %p8245_p2 = scmp.lt.s32.totalorder %s8243_s13, %s8236_s8 }
  0xfc   : > { %p8239_p9 = pnand %p8237_p12, %p10278_p8  ;;  %p8246_p5 = por %p8245_p2, %p8244_p3 }
  0xfe   : > { %p8240_p0 = pneg %p8239_p9 }
 0x100   : > { %p8247_p7 = pnand %p8246_p5, %p8240_p0 }
 0x102   : > { %8250 = shalt.err (!%p8247_p7)
}
 0x103   : > { %7857 = dma.hbm_to_vmem [thread:$0]  (!%p10279_p4), %s8623_s17, 512, %s10282_s24, %s8741_s28, %s10271_s27, %s10271_s27, %s10270_s23  }
 0x104   : > { %s10283_s9 = sld [smem:[#allocation34_spill]] }
 0x10a   : > { %p10284_p8 = scmp.ne.s32.totalorder %s10283_s9, 0 }
 0x10b   : > { %s10285_s16 = sld [smem:[#allocation27_spill]] (!%p10284_p8) }
 0x10c   : > { %464 = sbr.rel (%p10284_p8) target bundleno = 1755 (0x6db), region = 52  ;;  %s10286_s12 = sld [smem:[#allocation32_spill]] (!%p10284_p8) }
 0x111   : > { %s8771_s21 = sand.u32 (!%p10284_p8), 1, %s10285_s16  }
 0x112   : > { %s7803_s1 = smul.u32 (!%p10284_p8), 96, %s8771_s21  ;;  %s467_s26 = scalar_lea.sflag (!%p10284_p8), [#allocation5], %s8771_s21 }
 0x113   : > { %p10287_p10 = scmp.ne.s32.totalorder %s10286_s12, 0 }
 0x114   : > { %s8775_s18 = scalar_lea.vmem [#allocation4], %s7803_s1 }
 0x115   : > { %8304 = dma.done.wait (%p10287_p10), %s467_s26, 1536  }
 0x116   : > { %8306 = vsyncadd (%p10287_p10), %s467_s26, 4294965760  ;;  %s10288_s19 = sld [smem:[#allocation31_spill]]  ;;  %s6209_s27 = sshll.u32 %s8771_s21, 5 }
 0x117   : > { %s8783_s5 = scalar_lea.vmem [#allocation7], %s6209_s27 }
 0x11c   : > { %s475_s23 = sand.u32 1, %s10288_s19  }
 0x11d   : > { %s476_s17 = scalar_lea.sflag [#allocation8], %s475_s23 }
 0x11e   : > { %8308 = dma.done.wait (%p10287_p10), %s476_s17, 2048  }
 0x11f   : > { %8310 = vsyncadd (%p10287_p10), %s476_s17, 4294965248  ;;  %s8789_s25 = scalar_lea.vmem [#allocation9], %s7803_s1  ;;  %s494_s28 = scalar_lea.sflag [#allocation11], %s475_s23 }
 0x120   : > { %s8791_s29 = scalar_lea.vmem [#allocation10], %s6209_s27 }
 0x121   : > { %8312 = dma.done.wait (%p10287_p10), %s494_s28, 512  }
 0x122   : > { %8314 = vsyncadd (%p10287_p10), %s494_s28, 4294966784  ;;  %p10289_p4 = scmp.eq.s32.totalorder %s10288_s19, 0 }
 0x124   : > { %8316 = dma.done.wait (%p10289_p4), [#allocation11], 576   ;;  %p10290_p6 = pmov %p10289_p4 }
 0x125   : > { %p10291_p1 = pmov %p10289_p4 }
 0x126   : > { %8318 = vsyncadd (%p10290_p6), [#allocation11], 4294966720 }
 0x127   : > { %8320 = dma.done.wait (%p10291_p1), [#allocation14], 304   ;;  %p10292_p11 = pmov %p10291_p1 }
 0x128   : > { %p10293_p13 = pmov %p10291_p1 }
 0x129   : > { %8322 = vsyncadd (%p10292_p11), [#allocation14], 4294966992 }
 0x12a   : > { %8324 = dma.done.wait (%p10293_p13), [#allocation17], 16   ;;  %p10294_p12 = pmov %p10291_p1 }
 0x12b   : > { %v650_v0 = vld [vmem:[%s8789_s25 + $0x8] sm:$0xf]  ;;  %v648_v1 = vld [vmem:[%s8789_s25] sm:$0xf]  ;;  %s8367_s30 = smov 4   ;;  %vm607_vm0 = vcmask 27648  }
 0x12c   : > { %8326 = vsyncadd (%p10294_p12), [#allocation17], 4294967280  ;;  %700 = vrot.lane.b32.xlu1 %v650_v0, %s8367_s30  ;;  %696 = vrot.lane.b32.xlu0 %v648_v1, %s8367_s30  ;;  %v651_v2 = vld [vmem:[%s8789_s25 + $0xc] sm:$0xf]  ;;  %v649_v3 = vld [vmem:[%s8789_s25 + $0x4] sm:$0xf] }
 0x12d   : > { %v653_v4 = vld [vmem:[%s8789_s25 + $0x14] sm:$0xf]  ;;  %v652_v5 = vld [vmem:[%s8789_s25 + $0x10] sm:$0xf]  ;;  %v874_v6 = vld [vmem:[#allocation12 + $0x4] sm:$0xf] }
 0x12e   : > { %vm1108_vm1 = vcmask 1043456   ;;  %v655_v7 = vld [vmem:[%s8789_s25 + $0x1c] sm:$0xf]  ;;  %v654_v8 = vld [vmem:[%s8789_s25 + $0x18] sm:$0xf]  ;;  %vm768_vm2 = vcmask 60448  }
 0x12f   : > { %7782 = vmatprep.subr.msk.bf16.mxu0 %vm1108_vm1, %v874_v6  ;;  %7783 = vmatprep.subr.msk.bf16.mxu1 %vm1108_vm1, %v874_v6  ;;  %v585_v9 = vld [vmem:[%s8775_s18 + $0x8] sm:$0xf]  ;;  %v583_v10 = vld [vmem:[%s8775_s18] sm:$0xf]  ;;  %v586_v11 = vld [vmem:[%s8775_s18 + $0xc] sm:$0xf] }
 0x130   : > { %702 = vrot.lane.b32.xlu1 %v651_v2, %s8367_s30  ;;  %698 = vrot.lane.b32.xlu0 %v649_v3, %s8367_s30  ;;  %v657_v12 = vld [vmem:[%s8789_s25 + $0x24] sm:$0xf]  ;;  %v656_v13 = vld [vmem:[%s8789_s25 + $0x20] sm:$0xf]  ;;  %610 = vst.msk [vmem:[#allocation2 + $0x8] sm:$0xf] %vm607_vm0, %v585_v9 }
 0x131   : > { %608 = vst.msk [vmem:[#allocation2] sm:$0xf] %vm607_vm0, %v583_v10  ;;  %611 = vst.msk [vmem:[#allocation2 + $0xc] sm:$0xf] %vm607_vm0, %v586_v11  ;;  %v584_v14 = vld [vmem:[%s8775_s18 + $0x4] sm:$0xf] }
 0x132   : > { %v588_v15 = vld [vmem:[%s8775_s18 + $0x14] sm:$0xf]  ;;  %v587_v16 = vld [vmem:[%s8775_s18 + $0x10] sm:$0xf]  ;;  %609 = vst.msk [vmem:[#allocation2 + $0x4] sm:$0xf] %vm607_vm0, %v584_v14 }
 0x133   : > { %613 = vst.msk [vmem:[#allocation2 + $0x14] sm:$0xf] %vm607_vm0, %v588_v15  ;;  %612 = vst.msk [vmem:[#allocation2 + $0x10] sm:$0xf] %vm607_vm0, %v587_v16  ;;  %v590_v17 = vld [vmem:[%s8775_s18 + $0x1c] sm:$0xf] }
 0x134   : > { %706 = vrot.lane.b32.xlu1 %v653_v4, %s8367_s30  ;;  %704 = vrot.lane.b32.xlu0 %v652_v5, %s8367_s30  ;;  %v589_v18 = vld [vmem:[%s8775_s18 + $0x18] sm:$0xf]  ;;  %v1110_v19 = vsel %vm1108_vm1, %v874_v6, 0  ;;  %615 = vst.msk [vmem:[#allocation2 + $0x1c] sm:$0xf] %vm607_vm0, %v590_v17  ;;  %vm1439_vm3 = vcmask 1046528  }
 0x135   : > { %614 = vst.msk [vmem:[#allocation2 + $0x18] sm:$0xf] %vm607_vm0, %v589_v18  ;;  %v592_v20 = vld [vmem:[%s8775_s18 + $0x24] sm:$0xf]  ;;  %v591_v21 = vld [vmem:[%s8775_s18 + $0x20] sm:$0xf]  ;;  %6861 = vmatpush3.bf16.msra.mxu0 %v1110_v19  ;;  %7365 = vmatpush3.bf16.msra.mxu1 %v1110_v19 }
 0x136   : > { %v594_v22 = vld [vmem:[%s8775_s18 + $0x2c] sm:$0xf]  ;;  %617 = vst.msk [vmem:[#allocation2 + $0x24] sm:$0xf] %vm607_vm0, %v592_v20  ;;  %616 = vst.msk [vmem:[#allocation2 + $0x20] sm:$0xf] %vm607_vm0, %v591_v21 }
 0x137   : > { %619 = vst.msk [vmem:[#allocation2 + $0x2c] sm:$0xf] %vm607_vm0, %v594_v22  ;;  %v593_v23 = vld [vmem:[%s8775_s18 + $0x28] sm:$0xf]  ;;  %v8853_v24 = vld [vmem:[#allocation12] sm:$0xf] }
 0x138   : > { %710 = vrot.lane.b32.xlu1 %v655_v7, %s8367_s30  ;;  %708 = vrot.lane.b32.xlu0 %v654_v8, %s8367_s30  ;;  %618 = vst.msk [vmem:[#allocation2 + $0x28] sm:$0xf] %vm607_vm0, %v593_v23  ;;  %v596_v25 = vld [vmem:[%s8775_s18 + $0x34] sm:$0xf]  ;;  %v595_v26 = vld [vmem:[%s8775_s18 + $0x30] sm:$0xf] }
 0x139   : > { %7784 = vmatprep.subr.msk.bf16.mxu0 %vm1108_vm1, %v8853_v24  ;;  %621 = vst.msk [vmem:[#allocation2 + $0x34] sm:$0xf] %vm607_vm0, %v596_v25  ;;  %v598_v27 = vld [vmem:[%s8775_s18 + $0x3c] sm:$0xf]  ;;  %v659_v28 = vld [vmem:[%s8789_s25 + $0x2c] sm:$0xf] }
 0x13a   : > { %v658_v29 = vld [vmem:[%s8789_s25 + $0x28] sm:$0xf]  ;;  %620 = vst.msk [vmem:[#allocation2 + $0x30] sm:$0xf] %vm607_vm0, %v595_v26  ;;  %623 = vst.msk [vmem:[#allocation2 + $0x3c] sm:$0xf] %vm607_vm0, %v598_v27 }
 0x13b   : > { %v597_v30 = vld [vmem:[%s8775_s18 + $0x38] sm:$0xf]  ;;  %v661_v31 = vld [vmem:[%s8789_s25 + $0x34] sm:$0xf]  ;;  %v660_v32 = vld [vmem:[%s8789_s25 + $0x30] sm:$0xf] }
 0x13c   : > { %714 = vrot.lane.b32.xlu1 %v657_v12, %s8367_s30  ;;  %712 = vrot.lane.b32.xlu0 %v656_v13, %s8367_s30  ;;  %622 = vst.msk [vmem:[#allocation2 + $0x38] sm:$0xf] %vm607_vm0, %v597_v30  ;;  %v663_v33 = vld [vmem:[%s8789_s25 + $0x3c] sm:$0xf]  ;;  %v662_v34 = vld [vmem:[%s8789_s25 + $0x38] sm:$0xf] }
 0x13d   : > { %v665_v35 = vld [vmem:[%s8789_s25 + $0x44] sm:$0xf]  ;;  %v664_v36 = vld [vmem:[%s8789_s25 + $0x40] sm:$0xf]  ;;  %v667_v37 = vld [vmem:[%s8789_s25 + $0x4c] sm:$0xf] }
 0x13e   : > { %v666_v38 = vld [vmem:[%s8789_s25 + $0x48] sm:$0xf]  ;;  %v669_v39 = vld [vmem:[%s8789_s25 + $0x54] sm:$0xf]  ;;  %v668_v40 = vld [vmem:[%s8789_s25 + $0x50] sm:$0xf] }
 0x13f   : > { %v671_v41 = vld [vmem:[%s8789_s25 + $0x5c] sm:$0xf]  ;;  %v670_v42 = vld [vmem:[%s8789_s25 + $0x58] sm:$0xf]  ;;  %v600_v43 = vld [vmem:[%s8775_s18 + $0x44] sm:$0xf] }
 0x140   : > { %718 = vrot.lane.b32.xlu1 %v659_v28, %s8367_s30  ;;  %716 = vrot.lane.b32.xlu0 %v658_v29, %s8367_s30  ;;  %v599_v44 = vld [vmem:[%s8775_s18 + $0x40] sm:$0xf]  ;;  %v602_v45 = vld [vmem:[%s8775_s18 + $0x4c] sm:$0xf]  ;;  %625 = vst.msk [vmem:[#allocation2 + $0x44] sm:$0xf] %vm607_vm0, %v600_v43 }
 0x141   : > { %624 = vst.msk [vmem:[#allocation2 + $0x40] sm:$0xf] %vm607_vm0, %v599_v44  ;;  %627 = vst.msk [vmem:[#allocation2 + $0x4c] sm:$0xf] %vm607_vm0, %v602_v45  ;;  %v601_v46 = vld [vmem:[%s8775_s18 + $0x48] sm:$0xf] }
 0x142   : > { %626 = vst.msk [vmem:[#allocation2 + $0x48] sm:$0xf] %vm607_vm0, %v601_v46  ;;  %v794_v47 = vld [vmem:[%s8791_s29 + $0x4] sm:$0xf]  ;;  %v793_v48 = vld [vmem:[%s8791_s29] sm:$0xf] }
 0x143   : > { %v795_v49 = vld [vmem:[%s8791_s29 + $0x8] sm:$0xf]  ;;  %v796_v50 = vld [vmem:[%s8791_s29 + $0xc] sm:$0xf]  ;;  %v604_v51 = vld [vmem:[%s8775_s18 + $0x54] sm:$0xf] }
 0x144   : > { %722 = vrot.lane.b32.xlu1 %v661_v31, %s8367_s30  ;;  %720 = vrot.lane.b32.xlu0 %v660_v32, %s8367_s30  ;;  %v603_v52 = vld [vmem:[%s8775_s18 + $0x50] sm:$0xf]  ;;  %v606_v53 = vld [vmem:[%s8775_s18 + $0x5c] sm:$0xf]  ;;  %629 = vst.msk [vmem:[#allocation2 + $0x54] sm:$0xf] %vm607_vm0, %v604_v51 }
 0x145   : > { %628 = vst.msk [vmem:[#allocation2 + $0x50] sm:$0xf] %vm607_vm0, %v603_v52  ;;  %631 = vst.msk [vmem:[#allocation2 + $0x5c] sm:$0xf] %vm607_vm0, %v606_v53  ;;  %v605_v54 = vld [vmem:[%s8775_s18 + $0x58] sm:$0xf] }
 0x146   : > { %630 = vst.msk [vmem:[#allocation2 + $0x58] sm:$0xf] %vm607_vm0, %v605_v54  ;;  %v797_v55 = vld [vmem:[%s8791_s29 + $0x10] sm:$0xf]  ;;  %v798_v56 = vld [vmem:[%s8791_s29 + $0x14] sm:$0xf] }
 0x147   : > { %v800_v57 = vld [vmem:[%s8791_s29 + $0x1c] sm:$0xf]  ;;  %v799_v58 = vld [vmem:[%s8791_s29 + $0x18] sm:$0xf]  ;;  %v633_v59 = vld [vmem:[%s8783_s5 + $0x4] sm:$0xf] }
 0x148   : > { %726 = vrot.lane.b32.xlu1 %v663_v33, %s8367_s30  ;;  %724 = vrot.lane.b32.xlu0 %v662_v34, %s8367_s30  ;;  %v632_v60 = vld [vmem:[%s8783_s5] sm:$0xf]  ;;  %641 = vst.msk [vmem:[#allocation2 + $0x64] sm:$0xf] %vm607_vm0, %v633_v59  ;;  %v634_v61 = vld [vmem:[%s8783_s5 + $0x8] sm:$0xf] }
 0x149   : > { %640 = vst.msk [vmem:[#allocation2 + $0x60] sm:$0xf] %vm607_vm0, %v632_v60  ;;  %v635_v62 = vld [vmem:[%s8783_s5 + $0xc] sm:$0xf]  ;;  %642 = vst.msk [vmem:[#allocation2 + $0x68] sm:$0xf] %vm607_vm0, %v634_v61 }
 0x14a   : > { %643 = vst.msk [vmem:[#allocation2 + $0x6c] sm:$0xf] %vm607_vm0, %v635_v62  ;;  %v636_v63 = vld [vmem:[%s8783_s5 + $0x10] sm:$0xf]  ;;  %v637_v0 = vld [vmem:[%s8783_s5 + $0x14] sm:$0xf] }
 0x14b   : > { %644 = vst.msk [vmem:[#allocation2 + $0x70] sm:$0xf] %vm607_vm0, %v636_v63  ;;  %645 = vst.msk [vmem:[#allocation2 + $0x74] sm:$0xf] %vm607_vm0, %v637_v0  ;;  %v639_v7 = vld [vmem:[%s8783_s5 + $0x1c] sm:$0xf] }
 0x14c   : > { %730 = vrot.lane.b32.xlu1 %v665_v35, %s8367_s30  ;;  %728 = vrot.lane.b32.xlu0 %v664_v36, %s8367_s30  ;;  %v638_v8 = vld [vmem:[%s8783_s5 + $0x18] sm:$0xf]  ;;  %647 = vst.msk [vmem:[#allocation2 + $0x7c] sm:$0xf] %vm607_vm0, %v639_v7  ;;  %vm948_vm4 = vsmask.f32 7424 }
 0x14d   : > { %646 = vst.msk [vmem:[#allocation2 + $0x78] sm:$0xf] %vm607_vm0, %v638_v8  ;;  %vm1065_vm5 = vcmask 64512   ;;  %vm841_vm6 = vcmask 60416   ;;  %vm3857_vm7 = vcmask 1041408   ;;  %vm3820_vm8 = vcmask 31744  }
 0x14e   : > { %s7804_s20 = smul.u32 192, %s8771_s21  ;;  %s10295_s3 = sld [smem:[#allocation29_spill]] }
 0x14f   : > { %s10296_s15 = sld [smem:[#allocation36_spill]]  ;;  %s10297_s11 = sld [smem:[#allocation43_spill]] }
 0x150   : > { %734 = vrot.lane.b32.xlu1 %v667_v37, %s8367_s30  ;;  %732 = vrot.lane.b32.xlu0 %v666_v38, %s8367_s30  ;;  %s10071_s22 = scalar_lea.vmem [#allocation18], %s7804_s20  ;;  %s5975_s9 = scalar_lea.sflag [#allocation6], %s8771_s21 }
 0x151   : > { %s5990_s24 = sshll.u32 %s10071_s22, 4  ;;  %s8369_s12 = smov [#allocation18]   ;;  %s10144_s24 = int_to_ptr.vmem [resolvable:$true] %s5990_s24 }
 0x152   : > { %s8251_s16 = scalar_lea.vmem %s10144_s24, 3072  ;;  %s8255_s1 = sshll.u32 %s8369_s12, 4  ;;  %s8256_s1 = int_to_ptr.vmem [resolvable:$false] %s8255_s1 }
 0x153   : > { %p8252_p9 = scmp.ne.s32.totalorder %s10144_s24, %s8251_s16  ;;  %s8257_s26 = scalar_lea.vmem %s8256_s1, 6144 }
 0x154   : > { %738 = vrot.lane.b32.xlu1 %v669_v39, %s8367_s30  ;;  %736 = vrot.lane.b32.xlu0 %v668_v40, %s8367_s30  ;;  %v1286_v40 = vsel %vm1108_vm1, %v8853_v24, 0  ;;  %s7805_s14 = smul.u32 3072, %s10295_s3  ;;  %p8258_p5 = scmp.lt.s32.totalorder %s10144_s24, %s8256_s1 }
 0x155   : > { %p10298_p0 = scmp.ne.s32.totalorder %s10296_s15, 0  ;;  %p8259_p7 = scmp.lt.s32.totalorder %s8257_s26, %s8251_s16 }
 0x156   : > { %s10140_s13 = scalar_lea.hbm %s10297_s11, %s7805_s14 }
 0x157   : > { %p8253_p3 = pnand %p8252_p9, %p10298_p0  ;;  %p8260_p8 = por %p8259_p7, %p8258_p5 }
 0x158   : > { %742 = vrot.lane.b32.xlu1 %v671_v41, %s8367_s30  ;;  %740 = vrot.lane.b32.xlu0 %v670_v42, %s8367_s30  ;;  %v8980_v41 = vld [vmem:[#allocation12 + $0x8] sm:$0xf] }
 0x159   : > { %p8254_p2 = pneg %p8253_p3 }
 0x15b   : > { %p8261_p10 = pnand %p8260_p8, %p8254_p2 }
 0x15c   : > { %811 = vrot.lane.b32.xlu1 %v794_v47, %s8367_s30  ;;  %809 = vrot.lane.b32.xlu0 %v793_v48, %s8367_s30 }
 0x160   : > { %813 = vrot.lane.b32.xlu0 %v795_v49, %s8367_s30  ;;  %815 = vrot.lane.b32.xlu1 %v796_v50, %s8367_s30 }
 0x164   : > { %817 = vrot.lane.b32.xlu0 %v797_v55, %s8367_s30  ;;  %819 = vrot.lane.b32.xlu1 %v798_v56, %s8367_s30 }
 0x168   : > { %823 = vrot.lane.b32.xlu1 %v800_v57, %s8367_s30  ;;  %821 = vrot.lane.b32.xlu0 %v799_v58, %s8367_s30 }
 0x19e   : > { %v701_v1 = vpop.permute.xlu1 %700  ;;  %v697_v2 = vpop.permute.xlu0 %696 }
 0x19f   : > { %771 = vst.msk [vmem:[#allocation2 + $0x8] sm:$0xf] %vm768_vm2, %v701_v1  ;;  %769 = vst.msk [vmem:[#allocation2] sm:$0xf] %vm768_vm2, %v697_v2 }
 0x1a2   : > { %v703_v3 = vpop.permute.xlu1 %702  ;;  %v699_v4 = vpop.permute.xlu0 %698 }
 0x1a3   : > { %772 = vst.msk [vmem:[#allocation2 + $0xc] sm:$0xf] %vm768_vm2, %v703_v3  ;;  %770 = vst.msk [vmem:[#allocation2 + $0x4] sm:$0xf] %vm768_vm2, %v699_v4 }
 0x1a6   : > { %v707_v5 = vpop.permute.xlu1 %706  ;;  %v705_v6 = vpop.permute.xlu0 %704  ;;  %v843_v9 = vld [vmem:[#allocation2] sm:$0xf] }
 0x1a7   : > { %774 = vst.msk [vmem:[#allocation2 + $0x14] sm:$0xf] %vm768_vm2, %v707_v5  ;;  %773 = vst.msk [vmem:[#allocation2 + $0x10] sm:$0xf] %vm768_vm2, %v705_v6  ;;  %v1433_v10 = vld [vmem:[#allocation2] sm:$0xe] }
 0x1aa   : > { %v711_v11 = vpop.permute.xlu1 %710  ;;  %v709_v12 = vpop.permute.xlu0 %708  ;;  %v844_v13 = vld [vmem:[#allocation2 + $0x4] sm:$0xf]  ;;  %v8950_v14 = vld [vmem:[#allocation2 + $0x8] sm:$0xff]  }
 0x1ab   : > { %776 = vst.msk [vmem:[#allocation2 + $0x1c] sm:$0xf] %vm768_vm2, %v711_v11  ;;  %775 = vst.msk [vmem:[#allocation2 + $0x18] sm:$0xf] %vm768_vm2, %v709_v12  ;;  %v8954_v15 = vcombine.low %v843_v9, %v844_v13  ;;  %v6258_v16 = vcombine.low %v1433_v10, %v844_v13  ;;  %v957_v17 = vshll.u32 %v8950_v14, 16  ;;  %v1441_v18 = vrot.slane %v8950_v14, 1 }
 0x1ac   : > { %v961_v29 = vshrl.u32 %v8950_v14, 16 }
 0x1ad   : > { %v952_v19 = vshll.u32 %v8954_v15, 16  ;;  %v1440_v20 = vrot.slane %v6258_v16, 1  ;;  %v959_v23 = vrot.slane %v957_v17, 1  ;;  %v950_v26 = vshrl.u32 %v8954_v15, 16 }
 0x1ae   : > { %v715_v21 = vpop.permute.xlu1 %714  ;;  %v713_v22 = vpop.permute.xlu0 %712  ;;  %v8959_v25 = vld [vmem:[#allocation2 + $0x10] sm:$0xff]  }
 0x1af   : > { %778 = vst.msk [vmem:[#allocation2 + $0x24] sm:$0xf] %vm768_vm2, %v715_v21  ;;  %777 = vst.msk [vmem:[#allocation2 + $0x20] sm:$0xf] %vm768_vm2, %v713_v22  ;;  %v954_v27 = vrot.slane %v952_v19, 1  ;;  %v8965_v28 = vsel %vm1439_vm3, %v1440_v20, %v1441_v18  ;;  %v965_v30 = vshll.u32 %v8959_v25, 16  ;;  %v963_v35 = vor.u32 %v961_v29, %v959_v23 }
 0x1b0   : > { %v1443_v31 = vrot.slane %v8959_v25, 1  ;;  %v969_v43 = vshrl.u32 %v8959_v25, 16 }
 0x1b1   : > { %v955_v32 = vor.u32 %v954_v27, %v950_v26  ;;  %v967_v36 = vrot.slane %v965_v30, 1 }
 0x1b2   : > { %v719_v33 = vpop.permute.xlu1 %718  ;;  %v717_v34 = vpop.permute.xlu0 %716  ;;  %v8970_v37 = vld [vmem:[#allocation2 + $0x18] sm:$0xff]   ;;  %v8973_v38 = vsel %vm1439_vm3, %v1441_v18, %v1443_v31 }
 0x1b3   : > { %780 = vst.msk [vmem:[#allocation2 + $0x2c] sm:$0xf] %vm768_vm2, %v719_v33  ;;  %779 = vst.msk [vmem:[#allocation2 + $0x28] sm:$0xf] %vm768_vm2, %v717_v34  ;;  %v960_v39 = vsel %vm948_vm4, %v955_v32, %v959_v23  ;;  %v968_v42 = vsel %vm948_vm4, %v963_v35, %v967_v36  ;;  %v973_v44 = vshll.u32 %v8970_v37, 16  ;;  %v1445_v45 = vrot.slane %v8970_v37, 1 }
 0x1b4   : > { %6862 = vmatprep.mubr.msk.bf16.mxu0 %vm1065_vm5, %v960_v39  ;;  %v971_v48 = vor.u32 %v969_v43, %v967_v36  ;;  %v977_v52 = vshrl.u32 %v8970_v37, 16  ;;  %v1512_v36 = vsel %vm1108_vm1, %v8980_v41, 0 }
 0x1b5   : > { %6863 = vmatmul.mubr.msk.bf16.vlgmr.msra.gmra.mrb[0].mxu0 %vm1065_vm5, %v968_v42  ;;  %v975_v49 = vrot.slane %v973_v44, 1  ;;  %v8995_v50 = vsel %vm1439_vm3, %v1443_v31, %v1445_v45 }
 0x1b6   : > { %v723_v46 = vpop.permute.xlu1 %722  ;;  %v721_v47 = vpop.permute.xlu0 %720  ;;  %6891 = vmatpush3.bf16.msra.mxu0 %v1286_v40  ;;  %v8988_v24 = vld [vmem:[#allocation2 + $0x20] sm:$0xff]  }
 0x1b7   : > { %782 = vst.msk [vmem:[#allocation2 + $0x34] sm:$0xf] %vm768_vm2, %v723_v46  ;;  %781 = vst.msk [vmem:[#allocation2 + $0x30] sm:$0xf] %vm768_vm2, %v721_v47  ;;  %7785 = vmatprep.subr.msk.bf16.mxu0 %vm1108_vm1, %v8980_v41  ;;  %v976_v51 = vsel %vm948_vm4, %v971_v48, %v975_v49  ;;  %v981_v53 = vshll.u32 %v8988_v24, 16  ;;  %v1447_v54 = vrot.slane %v8988_v24, 1  ;;  %v979_v57 = vor.u32 %v977_v52, %v975_v49 }
 0x1b8   : > { %6866 = vmatprep.mubr.msk.bf16.mxu0 %vm1065_vm5, %v976_v51  ;;  %v985_v62 = vshrl.u32 %v8988_v24, 16 }
 0x1b9   : > { %v983_v58 = vrot.slane %v981_v53, 1  ;;  %v9007_v60 = vsel %vm1439_vm3, %v1445_v45, %v1447_v54  ;;  %v9059_v45 = vld [vmem:[#allocation12 + $0x10] sm:$0xf] }
 0x1ba   : > { %v727_v55 = vpop.permute.xlu1 %726  ;;  %v725_v56 = vpop.permute.xlu0 %724  ;;  %v9002_v59 = vld [vmem:[#allocation2 + $0x28] sm:$0xff]  }
 0x1bb   : > { %784 = vst.msk [vmem:[#allocation2 + $0x3c] sm:$0xf] %vm768_vm2, %v727_v55  ;;  %783 = vst.msk [vmem:[#allocation2 + $0x38] sm:$0xf] %vm768_vm2, %v725_v56  ;;  %v984_v61 = vsel %vm948_vm4, %v979_v57, %v983_v58  ;;  %v989_v63 = vshll.u32 %v9002_v59, 16  ;;  %v1449_v0 = vrot.slane %v9002_v59, 1  ;;  %v987_v1 = vor.u32 %v985_v62, %v983_v58 }
 0x1bc   : > { %v993_v8 = vshrl.u32 %v9002_v59, 16 }
 0x1bd   : > { %6867 = vmatmul.mubr.msk.bf16.gmra.mrb[4].mxu0 %vm1065_vm5, %v984_v61  ;;  %v991_v2 = vrot.slane %v989_v63, 1  ;;  %v9019_v6 = vsel %vm1439_vm3, %v1447_v54, %v1449_v0 }
 0x1be   : > { %v9014_v3 = vld [vmem:[#allocation2 + $0x30] sm:$0xff]   ;;  %v731_v4 = vpop.permute.xlu1 %730  ;;  %v729_v5 = vpop.permute.xlu0 %728 }
 0x1bf   : > { %786 = vst.msk [vmem:[#allocation2 + $0x44] sm:$0xf] %vm768_vm2, %v731_v4  ;;  %785 = vst.msk [vmem:[#allocation2 + $0x40] sm:$0xf] %vm768_vm2, %v729_v5  ;;  %v992_v7 = vsel %vm948_vm4, %v987_v1, %v991_v2  ;;  %v997_v9 = vshll.u32 %v9014_v3, 16  ;;  %v1451_v10 = vrot.slane %v9014_v3, 1  ;;  %v995_v11 = vor.u32 %v993_v8, %v991_v2 }
 0x1c0   : > { %6870 = vmatprep.mubr.msk.bf16.mxu0 %vm1065_vm5, %v992_v7  ;;  %v1001_v18 = vshrl.u32 %v9014_v3, 16 }
 0x1c1   : > { %v999_v12 = vrot.slane %v997_v9, 1  ;;  %v9032_v19 = vsel %vm1439_vm3, %v1449_v0, %v1451_v10 }
 0x1c2   : > { %v9026_v13 = vld [vmem:[#allocation2 + $0x38] sm:$0xff]   ;;  %v735_v16 = vpop.permute.xlu1 %734  ;;  %v733_v17 = vpop.permute.xlu0 %732 }
 0x1c3   : > { %788 = vst.msk [vmem:[#allocation2 + $0x4c] sm:$0xf] %vm768_vm2, %v735_v16  ;;  %787 = vst.msk [vmem:[#allocation2 + $0x48] sm:$0xf] %vm768_vm2, %v733_v17  ;;  %v1000_v20 = vsel %vm948_vm4, %v995_v11, %v999_v12  ;;  %v1005_v21 = vshll.u32 %v9026_v13, 16  ;;  %v1009_v22 = vshrl.u32 %v9026_v13, 16  ;;  %v1003_v26 = vor.u32 %v1001_v18, %v999_v12 }
 0x1c4   : > { %v1453_v23 = vrot.slane %v9026_v13, 1 }
 0x1c5   : > { %6871 = vmatmul.mubr.msk.bf16.gmra.mrb[8].mxu0 %vm1065_vm5, %v1000_v20  ;;  %v1007_v27 = vrot.slane %v1005_v21, 1 }
 0x1c6   : > { %6892 = vmatprep.mubr.msk.bf16.mxu0 %vm1065_vm5, %v8954_v15  ;;  %v739_v29 = vpop.permute.xlu1 %738  ;;  %v737_v30 = vpop.permute.xlu0 %736  ;;  %v9041_v31 = vld [vmem:[#allocation2 + $0x40] sm:$0xff]   ;;  %v9046_v32 = vsel %vm1439_vm3, %v1451_v10, %v1453_v23 }
 0x1c7   : > { %790 = vst.msk [vmem:[#allocation2 + $0x54] sm:$0xf] %vm768_vm2, %v739_v29  ;;  %789 = vst.msk [vmem:[#allocation2 + $0x50] sm:$0xf] %vm768_vm2, %v737_v30  ;;  %v1008_v33 = vsel %vm948_vm4, %v1003_v26, %v1007_v27  ;;  %v1011_v34 = vor.u32 %v1009_v22, %v1007_v27  ;;  %v1013_v35 = vshll.u32 %v9041_v31, 16  ;;  %v1017_v15 = vshrl.u32 %v9041_v31, 16 }
 0x1c8   : > { %6874 = vmatprep.mubr.msk.bf16.mxu1 %vm1065_vm5, %v1008_v33  ;;  %v1455_v39 = vrot.slane %v9041_v31, 1 }
 0x1c9   : > { %v1015_v43 = vrot.slane %v1013_v35, 1 }
 0x1ca   : > { %v743_v40 = vpop.permute.xlu1 %742  ;;  %v741_v42 = vpop.permute.xlu0 %740  ;;  %v9055_v44 = vld [vmem:[#allocation2 + $0x48] sm:$0xff]   ;;  %v9062_v46 = vsel %vm1439_vm3, %v1453_v23, %v1455_v39 }
 0x1cb   : > { %792 = vst.msk [vmem:[#allocation2 + $0x5c] sm:$0xf] %vm768_vm2, %v743_v40  ;;  %791 = vst.msk [vmem:[#allocation2 + $0x58] sm:$0xf] %vm768_vm2, %v741_v42  ;;  %v1016_v47 = vsel %vm948_vm4, %v1011_v34, %v1015_v43  ;;  %v1019_v48 = vor.u32 %v1017_v15, %v1015_v43  ;;  %v1021_v41 = vshll.u32 %v9055_v44, 16  ;;  %v1025_v49 = vshrl.u32 %v9055_v44, 16 }
 0x1cc   : > { %6875 = vmatmul.mubr.msk.bf16.vlgmr.msra.gmra.mrb[0].mxu1 %vm1065_vm5, %v1016_v47  ;;  %v1457_v51 = vrot.slane %v9055_v44, 1 }
 0x1cd   : > { %6893 = vmatmul.mubr.msk.bf16.vlgmr.msra.gmra.mrb[0].mxu0 %vm1065_vm5, %v8950_v14  ;;  %v1023_v54 = vrot.slane %v1021_v41, 1 }
 0x1ce   : > { %6921 = vmatpush3.bf16.msra.mxu0 %v1512_v36  ;;  %6896 = vmatprep.mubr.msk.bf16.mxu0 %vm1065_vm5, %v8959_v25  ;;  %v812_v52 = vpop.permute.xlu1 %811  ;;  %v810_v53 = vpop.permute.xlu0 %809  ;;  %v9073_v55 = vld [vmem:[#allocation2 + $0x50] sm:$0xff]   ;;  %v9080_v14 = vsel %vm1439_vm3, %v1455_v39, %v1457_v51 }
 0x1cf   : > { %834 = vst.msk [vmem:[#allocation2 + $0x64] sm:$0xf] %vm768_vm2, %v812_v52  ;;  %833 = vst.msk [vmem:[#allocation2 + $0x60] sm:$0xf] %vm768_vm2, %v810_v53  ;;  %7786 = vmatprep.subr.msk.bf16.mxu0 %vm1108_vm1, %v9059_v45  ;;  %v1024_v56 = vsel %vm948_vm4, %v1019_v48, %v1023_v54  ;;  %v1027_v57 = vor.u32 %v1025_v49, %v1023_v54  ;;  %v1029_v25 = vshll.u32 %v9073_v55, 16  ;;  %v1033_v58 = vshrl.u32 %v9073_v55, 16 }
 0x1d0   : > { %6878 = vmatprep.mubr.msk.bf16.mxu1 %vm1065_vm5, %v1024_v56  ;;  %v1459_v61 = vrot.slane %v9073_v55, 1  ;;  %v9168_v52 = vld [vmem:[#allocation2 + $0x20] sm:$0xff]   ;;  %v9175_v56 = vld [vmem:[#allocation2 + $0x28] sm:$0xff]  }
 0x1d1   : > { %v1031_v0 = vrot.slane %v1029_v25, 1 }
 0x1d2   : > { %v814_v62 = vpop.permute.xlu0 %813  ;;  %v816_v63 = vpop.permute.xlu1 %815  ;;  %v7943_v1 = vld [vmem:[#allocation2 + $0x58] sm:$0xff]   ;;  %v9090_v2 = vsel %vm1439_vm3, %v1457_v51, %v1459_v61 }
 0x1d3   : > { %835 = vst.msk [vmem:[#allocation2 + $0x68] sm:$0xf] %vm768_vm2, %v814_v62  ;;  %836 = vst.msk [vmem:[#allocation2 + $0x6c] sm:$0xf] %vm768_vm2, %v816_v63  ;;  %v1032_v4 = vsel %vm948_vm4, %v1027_v57, %v1031_v0  ;;  %v1035_v5 = vor.u32 %v1033_v58, %v1031_v0  ;;  %v1037_v7 = vshll.u32 %v7943_v1, 16  ;;  %v1041_v8 = vshrl.u32 %v7943_v1, 16 }
 0x1d4   : > { %6879 = vmatmul.mubr.msk.bf16.gmra.mrb[4].mxu1 %vm1065_vm5, %v1032_v4  ;;  %v1461_v9 = vrot.slane %v7943_v1, 1  ;;  %v9184_v4 = vld [vmem:[#allocation12 + $0x14] sm:$0xf] }
 0x1d5   : > { %6897 = vmatmul.mubr.msk.bf16.gmra.mrb[4].mxu0 %vm1065_vm5, %v8970_v37  ;;  %v1039_v12 = vrot.slane %v1037_v7, 1 }
 0x1d6   : > { %6900 = vmatprep.mubr.msk.bf16.mxu0 %vm1065_vm5, %v8988_v24  ;;  %v818_v10 = vpop.permute.xlu0 %817  ;;  %v820_v11 = vpop.permute.xlu1 %819  ;;  %v7944_v16 = vld [vmem:[#allocation2 + $0x60] sm:$0xff]   ;;  %v1462_v17 = vsel %vm1439_vm3, %v1459_v61, %v1461_v9  ;;  %v9179_v61 = vld [vmem:[#allocation2 + $0x30] sm:$0xff]  }
 0x1d7   : > { %837 = vst.msk [vmem:[#allocation2 + $0x70] sm:$0xf] %vm768_vm2, %v818_v10  ;;  %838 = vst.msk [vmem:[#allocation2 + $0x74] sm:$0xf] %vm768_vm2, %v820_v11  ;;  %v1040_v18 = vsel %vm948_vm4, %v1035_v5, %v1039_v12  ;;  %v1043_v20 = vor.u32 %v1041_v8, %v1039_v12  ;;  %v1045_v37 = vshll.u32 %v7944_v16, 16  ;;  %v1049_v21 = vshrl.u32 %v7944_v16, 16 }
 0x1d8   : > { %6882 = vmatprep.mubr.msk.bf16.mxu1 %vm1065_vm5, %v1040_v18  ;;  %v1463_v22 = vrot.slane %v7944_v16, 1  ;;  %v1833_v7 = vshll.u32 %v9179_v61, 16  ;;  %v1821_v10 = vshrl.u32 %v9168_v52, 16  ;;  %v1829_v11 = vshrl.u32 %v9175_v56, 16 }
 0x1d9   : > { %v1047_v23 = vrot.slane %v1045_v37, 1 }
 0x1da   : > { %v7945_v24 = vld [vmem:[#allocation2 + $0x68] sm:$0xff]   ;;  %v824_v26 = vpop.permute.xlu1 %823  ;;  %v822_v27 = vpop.permute.xlu0 %821  ;;  %v1464_v29 = vsel %vm1439_vm3, %v1461_v9, %v1463_v22  ;;  %v9190_v9 = vld [vmem:[#allocation2 + $0x38] sm:$0xff]   ;;  %v1835_v12 = vrot.slane %v1833_v7, 1 }
 0x1db   : > { %840 = vst.msk [vmem:[#allocation2 + $0x7c] sm:$0xf] %vm768_vm2, %v824_v26  ;;  %839 = vst.msk [vmem:[#allocation2 + $0x78] sm:$0xf] %vm768_vm2, %v822_v27  ;;  %v1048_v30 = vsel %vm948_vm4, %v1043_v20, %v1047_v23  ;;  %v1051_v33 = vor.u32 %v1049_v21, %v1047_v23  ;;  %v1053_v34 = vshll.u32 %v7945_v24, 16  ;;  %v1057_v35 = vshrl.u32 %v7945_v24, 16 }
 0x1dc   : > { %6883 = vmatmul.mubr.msk.bf16.gmra.mrb[8].mxu1 %vm1065_vm5, %v1048_v30  ;;  %v1465_v15 = vrot.slane %v7945_v24, 1  ;;  %v1841_v20 = vshll.u32 %v9190_v9, 16  ;;  %v9205_v26 = vld [vmem:[#allocation2 + $0x48] sm:$0xff]   ;;  %v1837_v27 = vshrl.u32 %v9179_v61, 16 }
 0x1dd   : > { %6901 = vmatmul.mubr.msk.bf16.gmra.mrb[8].mxu0 %vm1065_vm5, %v9002_v59  ;;  %v1055_v36 = vrot.slane %v1053_v34, 1 }
 0x1de   : > { %6904 = vmatprep.mubr.msk.bf16.mxu0 %vm1065_vm5, %v9014_v3  ;;  %v7946_v39 = vld [vmem:[#allocation2 + $0x70] ss:$0 sps:$4 sm:$0x11]   ;;  %v1466_v40 = vsel %vm1439_vm3, %v1463_v22, %v1465_v15  ;;  %v1952_v3 = vsel %vm1108_vm1, %v9059_v45, 0  ;;  %v9166_v45 = vld [vmem:[#allocation2 + $0x18] sm:$0xff]   ;;  %v1845_v22 = vshrl.u32 %v9190_v9, 16  ;;  %v1839_v34 = vor.u32 %v1837_v27, %v1835_v12 }
 0x1df   : > { %v1056_v42 = vsel %vm948_vm4, %v1051_v33, %v1055_v36  ;;  %v1059_v43 = vor.u32 %v1057_v35, %v1055_v36  ;;  %v1061_v47 = vshll.u32 %v7946_v39, 16  ;;  %v1467_v48 = vrot.slane %v7946_v39, 1  ;;  %v9208_v33 = vld [vmem:[#allocation2 + $0x50] sm:$0xff]  }
 0x1e0   : > { %6886 = vmatprep.mubr.msk.bf16.mxu1 %vm1065_vm5, %v1056_v42  ;;  %v1809_v53 = vshll.u32 %v9166_v45, 16  ;;  %v1813_v25 = vshrl.u32 %v9166_v45, 16  ;;  %v1857_v35 = vshll.u32 %v9205_v26, 16  ;;  %v1865_v42 = vshll.u32 %v9208_v33, 16 }
 0x1e1   : > { %v1063_v41 = vrot.slane %v1061_v47, 1  ;;  %v1468_v59 = vsel %vm1439_vm3, %v1465_v15, %v1467_v48  ;;  %v9218_v47 = vld [vmem:[#allocation2 + $0x58] sm:$0xff]  }
 0x1e3   : > { %v1064_v49 = vsel %vm948_vm4, %v1059_v43, %v1063_v41  ;;  %v1859_v43 = vrot.slane %v1857_v35, 1 }
 0x1e4   : > { %6887 = vmatmul.mubr.msk.bf16.gmra.mrb[12].mxu1 %vm1065_vm5, %v1064_v49  ;;  %v9220_v49 = vld [vmem:[#allocation2 + $0x60] sm:$0xff]  }
 0x1e5   : > { %6905 = vmatmul.mubr.msk.bf16.gmra.mrb[12].mxu0 %vm1065_vm5, %v9026_v13  ;;  %v1716_v13 = vld [vmem:[#allocation12 + $0xc] sm:$0xf] }
 0x1e6   : > { %6908 = vmatprep.mubr.msk.bf16.mxu0 %vm1065_vm5, %v9041_v31  ;;  %v2128_v63 = vsel %vm1108_vm1, %v1716_v13, 0 }
 0x1ed   : > { %6909 = vmatmul.mubr.msk.bf16.gmra.mrb[16].mxu0 %vm1065_vm5, %v9055_v44 }
 0x1ee   : > { %6912 = vmatprep.mubr.msk.bf16.mxu0 %vm1065_vm5, %v9073_v55  ;;  %v1817_v55 = vshll.u32 %v9168_v52, 16 }
 0x1f0   : > { %v1819_v58 = vrot.slane %v1817_v55, 1 }
 0x1f5   : > { %6913 = vmatmul.mubr.msk.bf16.gmra.mrb[20].mxu0 %vm1065_vm5, %v7943_v1  ;;  %v1825_v1 = vshll.u32 %v9175_v56, 16 }
 0x1f6   : > { %6916 = vmatprep.mubr.msk.bf16.mxu0 %vm1065_vm5, %v7944_v16  ;;  %v9196_v16 = vld [vmem:[#allocation2 + $0x40] sm:$0xff]  }
 0x1f7   : > { %v1827_v8 = vrot.slane %v1825_v1, 1  ;;  %v1849_v23 = vshll.u32 %v9196_v16, 16  ;;  %v1853_v36 = vshrl.u32 %v9196_v16, 16  ;;  %v9242_v1 = vld [vmem:[#allocation2 + $0x78] ss:$0 sps:$4 sm:$0x11]  }
 0x1f9   : > { %v1831_v18 = vor.u32 %v1829_v11, %v1827_v8  ;;  %v1851_v30 = vrot.slane %v1849_v23, 1 }
 0x1fb   : > { %v1836_v21 = vsel %vm948_vm4, %v1831_v18, %v1835_v12  ;;  %v1855_v48 = vor.u32 %v1853_v36, %v1851_v30 }
 0x1fd   : > { %6917 = vmatmul.mubr.msk.bf16.gmra.mrb[24].mxu0 %vm1065_vm5, %v7945_v24  ;;  %v1843_v24 = vrot.slane %v1841_v20, 1  ;;  %v2353_v20 = vsel %vm1108_vm1, %v9184_v4, 0 }
 0x1fe   : > { %6922 = vmatprep.mubr.msk.bf16.mxu0 %vm1065_vm5, %v8965_v28  ;;  %v8368_v28 = vmov 0  }
 0x1ff   : > { %842 = vst.msk [vmem:[#allocation2 + $0x80] sm:$0xf] %vm841_vm6, %v8368_v28  ;;  %v1844_v15 = vsel %vm948_vm4, %v1839_v34, %v1843_v24 }
 0x200   : > { %3628 = vst.msk [vmem:[#allocation3 + $0x70] sm:$0xf] %vm607_vm0, %v8368_v28  ;;  %v1869_v28 = vshrl.u32 %v9208_v33, 16 }
 0x205   : > { %6923 = vmatmul.mubr.msk.bf16.vlgmr.msra.gmra.mrb[0].mxu0 %vm1065_vm5, %v8973_v38  ;;  %v9151_v38 = vld [vmem:[#allocation2 + $0xc] sm:$0xf] }
 0x206   : > { %6951 = vmatpush3.bf16.msra.mxu0 %v1952_v3  ;;  %6926 = vmatprep.mubr.msk.bf16.mxu0 %vm1065_vm5, %v8995_v50  ;;  %v1687_v50 = vld [vmem:[#allocation2 + $0x8] sm:$0xf]  ;;  %v1873_v3 = vshll.u32 %v9218_v47, 16 }
 0x207   : > { %7787 = vmatprep.subr.msk.bf16.mxu0 %vm1108_vm1, %v1716_v13  ;;  %v1860_v13 = vsel %vm948_vm4, %v1855_v48, %v1859_v43  ;;  %v2290_v48 = vrot.slane %v9179_v61, 1 }
 0x20d   : > { %6927 = vmatmul.mubr.msk.bf16.gmra.mrb[4].mxu0 %vm1065_vm5, %v9007_v60  ;;  %v9156_v60 = vcombine.low %v1687_v50, %v9151_v38 }
 0x20e   : > { %6930 = vmatprep.mubr.msk.bf16.mxu0 %vm1065_vm5, %v9019_v6  ;;  %v9159_v6 = vld [vmem:[#allocation2 + $0x10] sm:$0xff]  }
 0x20f   : > { %v1794_v44 = vshrl.u32 %v9156_v60, 16  ;;  %v1805_v57 = vshrl.u32 %v9159_v6, 16 }
 0x215   : > { %6931 = vmatmul.mubr.msk.bf16.gmra.mrb[8].mxu0 %vm1065_vm5, %v9032_v19  ;;  %v1796_v19 = vshll.u32 %v9156_v60, 16 }
 0x216   : > { %6934 = vmatprep.mubr.msk.bf16.mxu0 %vm1065_vm5, %v9046_v32  ;;  %v1801_v32 = vshll.u32 %v9159_v6, 16 }
 0x217   : > { %v1798_v31 = vrot.slane %v1796_v19, 1  ;;  %v1877_v19 = vshrl.u32 %v9218_v47, 16 }
 0x218   : > { %v1803_v51 = vrot.slane %v1801_v32, 1  ;;  %v1875_v32 = vrot.slane %v1873_v3, 1 }
 0x21a   : > { %v1807_v62 = vor.u32 %v1805_v57, %v1803_v51  ;;  %v1885_v57 = vshrl.u32 %v9220_v49, 16 }
 0x21d   : > { %6935 = vmatmul.mubr.msk.bf16.gmra.mrb[12].mxu0 %vm1065_vm5, %v9062_v46  ;;  %v1799_v46 = vor.u32 %v1798_v31, %v1794_v44  ;;  %v1881_v31 = vshll.u32 %v9220_v49, 16  ;;  %v9230_v44 = vld [vmem:[#allocation2 + $0x68] sm:$0xff]  }
 0x21e   : > { %6938 = vmatprep.mubr.msk.bf16.mxu0 %vm1065_vm5, %v9080_v14  ;;  %v1811_v14 = vrot.slane %v1809_v53, 1  ;;  %v1889_v55 = vshll.u32 %v9230_v44, 16 }
 0x21f   : > { %v1804_v54 = vsel %vm948_vm4, %v1799_v46, %v1803_v51  ;;  %v1879_v51 = vor.u32 %v1877_v19, %v1875_v32  ;;  %v1883_v53 = vrot.slane %v1881_v31, 1 }
 0x220   : > { %v1815_v0 = vor.u32 %v1813_v25, %v1811_v14 }
 0x221   : > { %v1884_v25 = vsel %vm948_vm4, %v1879_v51, %v1883_v53 }
 0x222   : > { %v1820_v5 = vsel %vm948_vm4, %v1815_v0, %v1819_v58  ;;  %v1887_v0 = vor.u32 %v1885_v57, %v1883_v53  ;;  %v2298_v53 = vrot.slane %v9208_v33, 1  ;;  %v2302_v57 = vrot.slane %v9220_v49, 1 }
 0x225   : > { %6939 = vmatmul.mubr.msk.bf16.gmra.mrb[16].mxu0 %vm1065_vm5, %v9090_v2  ;;  %v1812_v2 = vsel %vm948_vm4, %v1807_v62, %v1811_v14 }
 0x226   : > { %6942 = vmatprep.mubr.msk.bf16.mxu0 %vm1065_vm5, %v1462_v17  ;;  %v1823_v17 = vor.u32 %v1821_v10, %v1819_v58  ;;  %v1893_v58 = vshrl.u32 %v9230_v44, 16  ;;  %v1905_v10 = vshll.u32 %v9242_v1, 16 }
 0x228   : > { %v1828_v37 = vsel %vm948_vm4, %v1823_v17, %v1827_v8  ;;  %v1907_v17 = vrot.slane %v1905_v10, 1 }
 0x22d   : > { %6943 = vmatmul.mubr.msk.bf16.gmra.mrb[20].mxu0 %vm1065_vm5, %v1464_v29  ;;  %v1847_v29 = vor.u32 %v1845_v22, %v1843_v24  ;;  %v2282_v22 = vrot.slane %v9159_v6, 1 }
 0x22e   : > { %6946 = vmatprep.mubr.msk.bf16.mxu0 %vm1065_vm5, %v1466_v40  ;;  %v1861_v40 = vshrl.u32 %v9205_v26, 16 }
 0x22f   : > { %v1852_v39 = vsel %vm948_vm4, %v1847_v29, %v1851_v30 }
 0x230   : > { %v1863_v41 = vor.u32 %v1861_v40, %v1859_v43 }
 0x235   : > { %6947 = vmatmul.mubr.msk.bf16.gmra.mrb[24].mxu0 %vm1065_vm5, %v1468_v59  ;;  %v1867_v59 = vrot.slane %v1865_v42, 1  ;;  %v9307_v42 = vld [vmem:[#allocation12 + $0x18] sm:$0xf] }
 0x236   : > { %6952 = vmatprep.mubr.msk.bf16.mxu0 %vm1065_vm5, %v1804_v54  ;;  %v9232_v54 = vld [vmem:[#allocation2 + $0x70] sm:$0xff]  }
 0x237   : > { %v1868_v50 = vsel %vm948_vm4, %v1863_v41, %v1867_v59  ;;  %v1871_v46 = vor.u32 %v1869_v28, %v1867_v59  ;;  %v1897_v62 = vshll.u32 %v9232_v54, 16  ;;  %v1901_v8 = vshrl.u32 %v9232_v54, 16 }
 0x239   : > { %v1876_v14 = vsel %vm948_vm4, %v1871_v46, %v1875_v32 }
 0x23d   : > { %6953 = vmatmul.mubr.msk.bf16.vlgmr.msra.gmra.mrb[0].mxu0 %vm1065_vm5, %v1812_v2 }
 0x23e   : > { %6981 = vmatpush3.bf16.msra.mxu0 %v2128_v63  ;;  %6956 = vmatprep.mubr.msk.bf16.mxu0 %vm1065_vm5, %v1820_v5  ;;  %v1891_v63 = vrot.slane %v1889_v55, 1  ;;  %v1899_v5 = vrot.slane %v1897_v62, 1 }
 0x23f   : > { %7788 = vmatprep.subr.msk.bf16.mxu0 %vm1108_vm1, %v9184_v4 }
 0x240   : > { %v1895_v2 = vor.u32 %v1893_v58, %v1891_v63  ;;  %v1892_v7 = vsel %vm948_vm4, %v1887_v0, %v1891_v63  ;;  %v1903_v12 = vor.u32 %v1901_v8, %v1899_v5  ;;  %v9350_v58 = vld [vmem:[#allocation2 + $0x14] sm:$0xf]  ;;  %v2304_v63 = vrot.slane %v9230_v44, 1  ;;  %v9361_v0 = vld [vmem:[#allocation2 + $0x18] sm:$0xff]  }
 0x241   : > { %v2642_v8 = vshll.u32 %v9361_v0, 16 }
 0x242   : > { %v1900_v11 = vsel %vm948_vm4, %v1895_v2, %v1899_v5  ;;  %v1908_v18 = vsel %vm948_vm4, %v1903_v12, %v1907_v17  ;;  %v2305_v2 = vsel %vm1439_vm3, %v2302_v57, %v2304_v63  ;;  %v9373_v17 = vld [vmem:[#allocation2 + $0x28] sm:$0xff]  }
 0x243   : > { %v2644_v12 = vrot.slane %v2642_v8, 1 }
 0x245   : > { %6957 = vmatmul.mubr.msk.bf16.gmra.mrb[4].mxu0 %vm1065_vm5, %v1828_v37  ;;  %v2560_v37 = vld [vmem:[#allocation12 + $0x1c] sm:$0xf] }
 0x246   : > { %6960 = vmatprep.mubr.msk.bf16.mxu0 %vm1065_vm5, %v1836_v21  ;;  %v2793_v36 = vsel %vm1108_vm1, %v2560_v37, 0 }
 0x24d   : > { %6961 = vmatmul.mubr.msk.bf16.gmra.mrb[8].mxu0 %vm1065_vm5, %v1844_v15 }
 0x24e   : > { %6964 = vmatprep.mubr.msk.bf16.mxu0 %vm1065_vm5, %v1852_v39 }
 0x255   : > { %6965 = vmatmul.mubr.msk.bf16.gmra.mrb[12].mxu0 %vm1065_vm5, %v1860_v13 }
 0x256   : > { %6968 = vmatprep.mubr.msk.bf16.mxu0 %vm1065_vm5, %v1868_v50 }
 0x25d   : > { %6969 = vmatmul.mubr.msk.bf16.gmra.mrb[16].mxu0 %vm1065_vm5, %v1876_v14  ;;  %v2300_v14 = vrot.slane %v9218_v47, 1 }
 0x25e   : > { %6972 = vmatprep.mubr.msk.bf16.mxu0 %vm1065_vm5, %v1884_v25  ;;  %v2528_v25 = vld [vmem:[#allocation2 + $0x10] sm:$0xf] }
 0x25f   : > { %v2301_v62 = vsel %vm1439_vm3, %v2298_v53, %v2300_v14 }
 0x265   : > { %6973 = vmatmul.mubr.msk.bf16.gmra.mrb[20].mxu0 %vm1065_vm5, %v1892_v7 }
 0x266   : > { %6976 = vmatprep.mubr.msk.bf16.mxu0 %vm1065_vm5, %v1900_v11 }
 0x26d   : > { %6977 = vmatmul.mubr.msk.bf16.gmra.mrb[24].mxu0 %vm1065_vm5, %v1908_v18 }
 0x26e   : > { %6982 = vmatprep.mubr.msk.bf16.mxu0 %vm1065_vm5, %v9156_v60  ;;  %v2275_v60 = vld [vmem:[#allocation2 + $0x8] sm:$0xe] }
 0x26f   : > { %v6316_v4 = vcombine.low %v2275_v60, %v9151_v38  ;;  %v2284_v38 = vrot.slane %v9166_v45, 1  ;;  %v2658_v60 = vshll.u32 %v9373_v17, 16 }
 0x271   : > { %v2281_v27 = vrot.slane %v6316_v4, 1  ;;  %v2285_v40 = vsel %vm1439_vm3, %v2282_v22, %v2284_v38 }
 0x273   : > { %v2283_v30 = vsel %vm1439_vm3, %v2281_v27, %v2282_v22  ;;  %v9381_v22 = vld [vmem:[#allocation2 + $0x30] sm:$0xff]  }
 0x275   : > { %6983 = vmatmul.mubr.msk.bf16.vlgmr.msra.gmra.mrb[0].mxu0 %vm1065_vm5, %v9159_v6  ;;  %v2286_v6 = vrot.slane %v9168_v52, 1 }
 0x276   : > { %7011 = vmatpush3.bf16.msra.mxu0 %v2353_v20  ;;  %6986 = vmatprep.mubr.msk.bf16.mxu0 %vm1065_vm5, %v9166_v45 }
 0x277   : > { %7789 = vmatprep.subr.msk.bf16.mxu0 %vm1108_vm1, %v2560_v37  ;;  %v2287_v45 = vsel %vm1439_vm3, %v2284_v38, %v2286_v6  ;;  %v9385_v38 = vld [vmem:[#allocation2 + $0x38] sm:$0xff]  }
 0x27d   : > { %6987 = vmatmul.mubr.msk.bf16.gmra.mrb[4].mxu0 %vm1065_vm5, %v9168_v52  ;;  %v2288_v52 = vrot.slane %v9175_v56, 1 }
 0x27e   : > { %6990 = vmatprep.mubr.msk.bf16.mxu0 %vm1065_vm5, %v9175_v56  ;;  %v2292_v56 = vrot.slane %v9190_v9, 1 }
 0x27f   : > { %v2289_v13 = vsel %vm1439_vm3, %v2286_v6, %v2288_v52  ;;  %v2291_v28 = vsel %vm1439_vm3, %v2288_v52, %v2290_v48 }
 0x280   : > { %v2293_v46 = vsel %vm1439_vm3, %v2290_v48, %v2292_v56  ;;  %v9391_v48 = vld [vmem:[#allocation12 + $0x20] sm:$0xf] }
 0x285   : > { %6991 = vmatmul.mubr.msk.bf16.gmra.mrb[8].mxu0 %vm1065_vm5, %v9179_v61  ;;  %v2294_v61 = vrot.slane %v9196_v16, 1 }
 0x286   : > { %6994 = vmatprep.mubr.msk.bf16.mxu0 %vm1065_vm5, %v9190_v9  ;;  %v2296_v9 = vrot.slane %v9205_v26, 1 }
 0x287   : > { %v2295_v51 = vsel %vm1439_vm3, %v2292_v56, %v2294_v61 }
 0x288   : > { %v2299_v55 = vsel %vm1439_vm3, %v2296_v9, %v2298_v53 }
 0x28d   : > { %6995 = vmatmul.mubr.msk.bf16.gmra.mrb[12].mxu0 %vm1065_vm5, %v9196_v16  ;;  %v2297_v16 = vsel %vm1439_vm3, %v2294_v61, %v2296_v9  ;;  %v9397_v61 = vld [vmem:[#allocation2 + $0x40] sm:$0xff]   ;;  %v9403_v9 = vld [vmem:[#allocation2 + $0x48] sm:$0xff]  }
 0x28e   : > { %6998 = vmatprep.mubr.msk.bf16.mxu0 %vm1065_vm5, %v9205_v26  ;;  %v2303_v26 = vsel %vm1439_vm3, %v2300_v14, %v2302_v57  ;;  %v2678_v57 = vshrl.u32 %v9385_v38, 16 }
 0x295   : > { %6999 = vmatmul.mubr.msk.bf16.gmra.mrb[16].mxu0 %vm1065_vm5, %v9208_v33  ;;  %v9356_v33 = vcombine.low %v2528_v25, %v9350_v58 }
 0x296   : > { %7002 = vmatprep.mubr.msk.bf16.mxu0 %vm1065_vm5, %v9218_v47  ;;  %v2306_v47 = vrot.slane %v9232_v54, 1 }
 0x297   : > { %v2635_v10 = vshrl.u32 %v9356_v33, 16 }
 0x298   : > { %v2307_v5 = vsel %vm1439_vm3, %v2304_v63, %v2306_v47 }
 0x29d   : > { %7003 = vmatmul.mubr.msk.bf16.gmra.mrb[20].mxu0 %vm1065_vm5, %v9220_v49  ;;  %v2637_v49 = vshll.u32 %v9356_v33, 16 }
 0x29e   : > { %7006 = vmatprep.mubr.msk.bf16.mxu0 %vm1065_vm5, %v9230_v44  ;;  %v9370_v44 = vld [vmem:[#allocation2 + $0x20] sm:$0xff]  }
 0x29f   : > { %v9282_v21 = vpop.f32.mrb[0].mxu1  ;;  %v2639_v7 = vrot.slane %v2637_v49, 1  ;;  %v2650_v18 = vshll.u32 %v9370_v44, 16  ;;  %v2654_v27 = vshrl.u32 %v9370_v44, 16 }
 0x2a0   : > { %v9285_v23 = vpop.f32.mrb[1].mxu1 }
 0x2a1   : > { %v9287_v24 = vpop.f32.mrb[2].mxu1  ;;  %v2640_v11 = vor.u32 %v2639_v7, %v2635_v10  ;;  %v2652_v4 = vrot.slane %v2650_v18, 1  ;;  %v9415_v7 = vld [vmem:[#allocation2 + $0x58] sm:$0xff]  }
 0x2a2   : > { %v9289_v29 = vpop.f32.mrb[3].mxu1  ;;  %v2706_v18 = vshll.u32 %v9415_v7, 16 }
 0x2a3   : > { %v2645_v37 = vsel %vm948_vm4, %v2640_v11, %v2644_v12 }
 0x2a5   : > { %7007 = vmatmul.mubr.msk.bf16.gmra.mrb[24].mxu0 %vm1065_vm5, %v9232_v54  ;;  %v2308_v54 = vrot.slane %v9242_v1, 1  ;;  %v2646_v1 = vshrl.u32 %v9361_v0, 16 }
 0x2a6   : > { %7012 = vmatprep.mubr.msk.bf16.mxu0 %vm1065_vm5, %v2283_v30  ;;  %v2660_v30 = vrot.slane %v2658_v60, 1 }
 0x2a7   : > { %v9296_v34 = vpop.f32.mrb[4].mxu1  ;;  %v2309_v20 = vsel %vm1439_vm3, %v2306_v47, %v2308_v54  ;;  %v2648_v6 = vor.u32 %v2646_v1, %v2644_v12  ;;  %v9413_v47 = vld [vmem:[#allocation2 + $0x50] sm:$0xff]   ;;  %v2694_v54 = vshrl.u32 %v9403_v9, 16  ;;  %v2708_v1 = vrot.slane %v2706_v18, 1 }
 0x2a8   : > { %v9299_v35 = vpop.f32.mrb[5].mxu1  ;;  %v2698_v8 = vshll.u32 %v9413_v47, 16  ;;  %v2702_v12 = vshrl.u32 %v9413_v47, 16 }
 0x2a9   : > { %v9301_v15 = vpop.f32.mrb[6].mxu1  ;;  %v2653_v52 = vsel %vm948_vm4, %v2648_v6, %v2652_v4 }
 0x2aa   : > { %v9304_v39 = vpop.f32.mrb[7].mxu1 }
 0x2ad   : > { %7013 = vmatmul.mubr.msk.bf16.vlgmr.msra.gmra.mrb[0].mxu0 %vm1065_vm5, %v2285_v40  ;;  %v2656_v40 = vor.u32 %v2654_v27, %v2652_v4  ;;  %v9427_v27 = vld [vmem:[#allocation2 + $0x68] sm:$0xff]  }
 0x2ae   : > { %7041 = vmatpush3.bf16.msra.mxu0 %v2793_v36  ;;  %7016 = vmatprep.mubr.msk.bf16.mxu0 %vm1065_vm5, %v2287_v45  ;;  %v2969_v36 = vsel %vm1108_vm1, %v9307_v42, 0  ;;  %v2666_v45 = vshll.u32 %v9381_v22, 16 }
 0x2af   : > { %7790 = vmatprep.subr.msk.bf16.mxu0 %vm1108_vm1, %v9307_v42  ;;  %v9315_v43 = vpop.f32.mrb[8].mxu1  ;;  %v2662_v42 = vshrl.u32 %v9373_v17, 16 }
 0x2b0   : > { %v9318_v41 = vpop.f32.mrb[9].mxu1  ;;  %v2668_v56 = vrot.slane %v2666_v45, 1 }
 0x2b1   : > { %v9320_v59 = vpop.f32.mrb[10].mxu1  ;;  %v2664_v53 = vor.u32 %v2662_v42, %v2660_v30 }
 0x2b2   : > { %v9322_v3 = vpop.f32.mrb[11].mxu1 }
 0x2b3   : > { %v2669_v14 = vsel %vm948_vm4, %v2664_v53, %v2668_v56 }
 0x2b5   : > { %7017 = vmatmul.mubr.msk.bf16.gmra.mrb[4].mxu0 %vm1065_vm5, %v2289_v13  ;;  %v2661_v13 = vsel %vm948_vm4, %v2656_v40, %v2660_v30 }
 0x2b6   : > { %7020 = vmatprep.mubr.msk.bf16.mxu0 %vm1065_vm5, %v2291_v28  ;;  %v2674_v28 = vshll.u32 %v9385_v38, 16 }
 0x2b7   : > { %v9329_v50 = vpop.f32.mrb[12].mxu1 }
 0x2b8   : > { %v9332_v19 = vpop.f32.mrb[13].mxu1 }
 0x2b9   : > { %v9334_v31 = vpop.f32.mrb[14].mxu1 }
 0x2ba   : > { %v9336_v32 = vpop.f32.mrb[15].mxu1 }
 0x2bd   : > { %7021 = vmatmul.mubr.msk.bf16.gmra.mrb[8].mxu0 %vm1065_vm5, %v2293_v46  ;;  %v2670_v46 = vshrl.u32 %v9381_v22, 16 }
 0x2be   : > { %7024 = vmatprep.mubr.msk.bf16.mxu0 %vm1065_vm5, %v2295_v51  ;;  %v2676_v51 = vrot.slane %v2674_v28, 1  ;;  %v9437_v28 = vld [vmem:[#allocation2 + $0x70] sm:$0xff]  }
 0x2bf   : > { %v2730_v53 = vshll.u32 %v9437_v28, 16 }
 0x2c0   : > { %v2680_v49 = vor.u32 %v2678_v57, %v2676_v51  ;;  %v2734_v57 = vshrl.u32 %v9437_v28, 16 }
 0x2c5   : > { %7025 = vmatmul.mubr.msk.bf16.gmra.mrb[12].mxu0 %vm1065_vm5, %v2297_v16  ;;  %v2672_v16 = vor.u32 %v2670_v46, %v2668_v56 }
 0x2c6   : > { %7028 = vmatprep.mubr.msk.bf16.mxu0 %vm1065_vm5, %v2299_v55  ;;  %v2682_v55 = vshll.u32 %v9397_v61, 16 }
 0x2c7   : > { %v2677_v25 = vsel %vm948_vm4, %v2672_v16, %v2676_v51  ;;  %v9439_v51 = vld [vmem:[#allocation2 + $0x78] sm:$0xff]  }
 0x2c8   : > { %v2684_v63 = vrot.slane %v2682_v55, 1  ;;  %v2726_v55 = vshrl.u32 %v9427_v27, 16 }
 0x2ca   : > { %v2685_v10 = vsel %vm948_vm4, %v2680_v49, %v2684_v63 }
 0x2cd   : > { %7029 = vmatmul.mubr.msk.bf16.gmra.mrb[16].mxu0 %vm1065_vm5, %v2301_v62  ;;  %v2686_v62 = vshrl.u32 %v9397_v61, 16 }
 0x2ce   : > { %7032 = vmatprep.mubr.msk.bf16.mxu0 %vm1065_vm5, %v2303_v26  ;;  %v2690_v26 = vshll.u32 %v9403_v9, 16 }
 0x2d5   : > { %7033 = vmatmul.mubr.msk.bf16.gmra.mrb[20].mxu0 %vm1065_vm5, %v2305_v2  ;;  %v2688_v2 = vor.u32 %v2686_v62, %v2684_v63  ;;  %v2732_v62 = vrot.slane %v2730_v53, 1  ;;  %v9449_v63 = vld [vmem:[#allocation2 + $0x80] ss:$0 sps:$4 sm:$0x11]  }
 0x2d6   : > { %7036 = vmatprep.mubr.msk.bf16.mxu0 %vm1065_vm5, %v2307_v5  ;;  %v2692_v5 = vrot.slane %v2690_v26, 1 }
 0x2d7   : > { %v2736_v49 = vor.u32 %v2734_v57, %v2732_v62  ;;  %v3656_v57 = vld [vmem:[#allocation15 + $0x2] sm:$0x3] }
 0x2d8   : > { %v2693_v11 = vsel %vm948_vm4, %v2688_v2, %v2692_v5  ;;  %v2696_v60 = vor.u32 %v2694_v54, %v2692_v5  ;;  %7792 = vmatprep.subr.msk.bf16.mxu1 %vm3857_vm7, %v3656_v57 }
 0x2dd   : > { %7037 = vmatmul.mubr.msk.bf16.gmra.mrb[24].mxu0 %vm1065_vm5, %v2309_v20  ;;  %v2700_v20 = vrot.slane %v2698_v8, 1  ;;  %v2742_v8 = vshrl.u32 %v9439_v51, 16 }
 0x2de   : > { %7042 = vmatprep.mubr.msk.bf16.mxu0 %vm1065_vm5, %v2645_v37  ;;  %v9425_v37 = vld [vmem:[#allocation2 + $0x60] sm:$0xff]  }
 0x2df   : > { %v2704_v4 = vor.u32 %v2702_v12, %v2700_v20  ;;  %v2714_v30 = vshll.u32 %v9425_v37, 16  ;;  %v2701_v6 = vsel %vm948_vm4, %v2696_v60, %v2700_v20  ;;  %v2718_v45 = vshrl.u32 %v9425_v37, 16 }
 0x2e0   : > { %v3194_v20 = vsel %vm1108_vm1, %v9391_v48, 0  ;;  %v3123_v60 = vrot.slane %v9361_v0, 1 }
 0x2e1   : > { %v2709_v40 = vsel %vm948_vm4, %v2704_v4, %v2708_v1 }
 0x2e5   : > { %7043 = vmatmul.mubr.msk.bf16.vlgmr.msra.gmra.mrb[0].mxu0 %vm1065_vm5, %v2653_v52  ;;  %v2722_v52 = vshll.u32 %v9427_v27, 16 }
 0x2e6   : > { %7071 = vmatpush3.bf16.msra.mxu0 %v2969_v36  ;;  %7046 = vmatprep.mubr.msk.bf16.mxu0 %vm1065_vm5, %v2661_v13  ;;  %v2710_v36 = vshrl.u32 %v9415_v7, 16  ;;  %v2716_v13 = vrot.slane %v2714_v30, 1  ;;  %v3125_v30 = vrot.slane %v9370_v44, 1 }
 0x2e7   : > { %7791 = vmatprep.subr.msk.bf16.mxu0 %vm1108_vm1, %v9391_v48  ;;  %v2724_v46 = vrot.slane %v2722_v52, 1  ;;  %v3135_v52 = vrot.slane %v9403_v9, 1 }
 0x2e8   : > { %v2712_v56 = vor.u32 %v2710_v36, %v2708_v1  ;;  %v2720_v42 = vor.u32 %v2718_v45, %v2716_v13  ;;  %v3126_v36 = vsel %vm1439_vm3, %v3123_v60, %v3125_v30 }
 0x2e9   : > { %v2728_v26 = vor.u32 %v2726_v55, %v2724_v46 }
 0x2ea   : > { %v2717_v16 = vsel %vm948_vm4, %v2712_v56, %v2716_v13  ;;  %v3139_v56 = vrot.slane %v9415_v7, 1 }
 0x2eb   : > { %v2733_v5 = vsel %vm948_vm4, %v2728_v26, %v2732_v62 }
 0x2ed   : > { %7047 = vmatmul.mubr.msk.bf16.gmra.mrb[4].mxu0 %vm1065_vm5, %v2669_v14  ;;  %v2725_v14 = vsel %vm948_vm4, %v2720_v42, %v2724_v46  ;;  %v3143_v46 = vrot.slane %v9427_v27, 1 }
 0x2ee   : > { %7050 = vmatprep.mubr.msk.bf16.mxu0 %vm1065_vm5, %v2677_v25  ;;  %v2738_v25 = vshll.u32 %v9439_v51, 16 }
 0x2f0   : > { %v2740_v2 = vrot.slane %v2738_v25, 1  ;;  %v9538_v25 = vld [vmem:[#allocation13] ss:$0 sm:$0xff] }
 0x2f2   : > { %v2741_v54 = vsel %vm948_vm4, %v2736_v49, %v2740_v2 }
 0x2f5   : > { %7051 = vmatmul.mubr.msk.bf16.gmra.mrb[8].mxu0 %vm1065_vm5, %v2685_v10  ;;  %v2746_v10 = vshll.u32 %v9449_v63, 16 }
 0x2f6   : > { %7054 = vmatprep.mubr.msk.bf16.mxu0 %vm1065_vm5, %v2693_v11  ;;  %v2744_v11 = vor.u32 %v2742_v8, %v2740_v2 }
 0x2f7   : > { %v2748_v12 = vrot.slane %v2746_v10, 1 }
 0x2f9   : > { %v2749_v18 = vsel %vm948_vm4, %v2744_v11, %v2748_v12 }
 0x2fd   : > { %7055 = vmatmul.mubr.msk.bf16.gmra.mrb[12].mxu0 %vm1065_vm5, %v2701_v6  ;;  %v3127_v6 = vrot.slane %v9373_v17, 1 }
 0x2fe   : > { %7058 = vmatprep.mubr.msk.bf16.mxu0 %vm1065_vm5, %v2709_v40  ;;  %v3131_v40 = vrot.slane %v9385_v38, 1 }
 0x305   : > { %7059 = vmatmul.mubr.msk.bf16.gmra.mrb[16].mxu0 %vm1065_vm5, %v2717_v16  ;;  %v3147_v16 = vrot.slane %v9439_v51, 1 }
 0x306   : > { %7062 = vmatprep.mubr.msk.bf16.mxu0 %vm1065_vm5, %v2725_v14 }
 0x30d   : > { %7063 = vmatmul.mubr.msk.bf16.gmra.mrb[20].mxu0 %vm1065_vm5, %v2733_v5 }
 0x30e   : > { %7066 = vmatprep.mubr.msk.bf16.mxu0 %vm1065_vm5, %v2741_v54 }
 0x315   : > { %7067 = vmatmul.mubr.msk.bf16.gmra.mrb[24].mxu0 %vm1065_vm5, %v2749_v18 }
 0x316   : > { %7072 = vmatprep.mubr.msk.bf16.mxu0 %vm1065_vm5, %v9356_v33  ;;  %v3116_v33 = vld [vmem:[#allocation2 + $0x10] sm:$0xe] }
 0x317   : > { %v6374_v48 = vcombine.low %v3116_v33, %v9350_v58  ;;  %v3128_v58 = vsel %vm1439_vm3, %v3125_v30, %v3127_v6 }
 0x319   : > { %v3122_v4 = vrot.slane %v6374_v48, 1 }
 0x31b   : > { %v3124_v1 = vsel %vm1439_vm3, %v3122_v4, %v3123_v60 }
 0x31d   : > { %7073 = vmatmul.mubr.msk.bf16.vlgmr.msra.gmra.mrb[0].mxu0 %vm1065_vm5, %v9361_v0  ;;  %v3129_v0 = vrot.slane %v9381_v22, 1 }
 0x31e   : > { %7101 = vmatpush3.bf16.msra.mxu0 %v3194_v20  ;;  %7076 = vmatprep.mubr.msk.bf16.mxu0 %vm1065_vm5, %v9370_v44 }
 0x31f   : > { %v3130_v45 = vsel %vm1439_vm3, %v3127_v6, %v3129_v0  ;;  %v3132_v44 = vsel %vm1439_vm3, %v3129_v0, %v3131_v40 }
 0x325   : > { %7077 = vmatmul.mubr.msk.bf16.gmra.mrb[4].mxu0 %vm1065_vm5, %v9373_v17  ;;  %v3133_v17 = vrot.slane %v9397_v61, 1 }
 0x326   : > { %7080 = vmatprep.mubr.msk.bf16.mxu0 %vm1065_vm5, %v9381_v22 }
 0x327   : > { %v3134_v13 = vsel %vm1439_vm3, %v3131_v40, %v3133_v17  ;;  %v3136_v22 = vsel %vm1439_vm3, %v3133_v17, %v3135_v52 }
 0x32d   : > { %7081 = vmatmul.mubr.msk.bf16.gmra.mrb[8].mxu0 %vm1065_vm5, %v9385_v38  ;;  %v3137_v38 = vrot.slane %v9413_v47, 1 }
 0x32e   : > { %7084 = vmatprep.mubr.msk.bf16.mxu0 %vm1065_vm5, %v9397_v61 }
 0x32f   : > { %v3138_v42 = vsel %vm1439_vm3, %v3135_v52, %v3137_v38  ;;  %v3140_v61 = vsel %vm1439_vm3, %v3137_v38, %v3139_v56 }
 0x335   : > { %7085 = vmatmul.mubr.msk.bf16.gmra.mrb[12].mxu0 %vm1065_vm5, %v9403_v9  ;;  %v3141_v9 = vrot.slane %v9425_v37, 1 }
 0x336   : > { %7088 = vmatprep.mubr.msk.bf16.mxu0 %vm1065_vm5, %v9413_v47 }
 0x337   : > { %v3142_v53 = vsel %vm1439_vm3, %v3139_v56, %v3141_v9  ;;  %v3144_v47 = vsel %vm1439_vm3, %v3141_v9, %v3143_v46 }
 0x33d   : > { %7089 = vmatmul.mubr.msk.bf16.gmra.mrb[16].mxu0 %vm1065_vm5, %v9415_v7  ;;  %v3145_v7 = vrot.slane %v9437_v28, 1 }
 0x33e   : > { %7092 = vmatprep.mubr.msk.bf16.mxu0 %vm1065_vm5, %v9425_v37 }
 0x33f   : > { %v3146_v55 = vsel %vm1439_vm3, %v3143_v46, %v3145_v7  ;;  %v3148_v37 = vsel %vm1439_vm3, %v3145_v7, %v3147_v16 }
 0x345   : > { %7093 = vmatmul.mubr.msk.bf16.gmra.mrb[20].mxu0 %vm1065_vm5, %v9427_v27  ;;  %v3149_v27 = vrot.slane %v9449_v63, 1 }
 0x346   : > { %7096 = vmatprep.mubr.msk.bf16.mxu0 %vm1065_vm5, %v9437_v28  ;;  %v3859_v28 = vsel %vm3857_vm7, %v3656_v57, 0 }
 0x347   : > { %v3150_v14 = vsel %vm1439_vm3, %v3147_v16, %v3149_v27  ;;  %7131 = vmatpush3.bf16.msra.mxu1 %v3859_v28 }
 0x34d   : > { %7097 = vmatmul.mubr.msk.bf16.gmra.mrb[24].mxu0 %vm1065_vm5, %v9439_v51  ;;  %v9534_v51 = vld [vmem:[#allocation15] sm:$0x3] }
 0x34e   : > { %7102 = vmatprep.mubr.msk.bf16.mxu0 %vm1065_vm5, %v3124_v1  ;;  %7793 = vmatprep.subr.msk.bf16.mxu1 %vm3857_vm7, %v9534_v51 }
 0x355   : > { %7103 = vmatmul.mubr.msk.bf16.vlgmr.msra.gmra.mrb[0].mxu0 %vm1065_vm5, %v3126_v36 }
 0x356   : > { %7106 = vmatprep.mubr.msk.bf16.mxu0 %vm1065_vm5, %v3128_v58 }
 0x35d   : > { %7107 = vmatmul.mubr.msk.bf16.gmra.mrb[4].mxu0 %vm1065_vm5, %v3130_v45 }
 0x35e   : > { %7110 = vmatprep.mubr.msk.bf16.mxu0 %vm1065_vm5, %v3132_v44 }
 0x365   : > { %7111 = vmatmul.mubr.msk.bf16.gmra.mrb[8].mxu0 %vm1065_vm5, %v3134_v13 }
 0x366   : > { %7114 = vmatprep.mubr.msk.bf16.mxu0 %vm1065_vm5, %v3136_v22 }
 0x36d   : > { %7115 = vmatmul.mubr.msk.bf16.gmra.mrb[12].mxu0 %vm1065_vm5, %v3138_v42 }
 0x36e   : > { %7118 = vmatprep.mubr.msk.bf16.mxu0 %vm1065_vm5, %v3140_v61 }
 0x375   : > { %7119 = vmatmul.mubr.msk.bf16.gmra.mrb[16].mxu0 %vm1065_vm5, %v3142_v53 }
 0x376   : > { %7122 = vmatprep.mubr.msk.bf16.mxu0 %vm1065_vm5, %v3144_v47 }
 0x37d   : > { %7123 = vmatmul.mubr.msk.bf16.gmra.mrb[20].mxu0 %vm1065_vm5, %v3146_v55 }
 0x37e   : > { %7126 = vmatprep.mubr.msk.bf16.mxu0 %vm1065_vm5, %v3148_v37 }
 0x385   : > { %7127 = vmatmul.mubr.msk.bf16.gmra.mrb[24].mxu0 %vm1065_vm5, %v3150_v14 }
 0x428   : > { %v7104_v62 = vpop.f32.mrb[0].mxu0 }
 0x429   : > { %v3434_v26 = vadd.f32 %v7104_v62, %v9538_v25  ;;  %v3230_v63 = vpop.f32.mrb[1].mxu0 }
 0x42a   : > { %v3432_v49 = vadd.f32 %v9538_v25, %v3230_v63  ;;  %v7105_v2 = vpop.f32.mrb[2].mxu0 }
 0x42b   : > { %v3462_v5 = vmax.f32 %v3434_v26, 0.0  ;;  %v3435_v8 = vadd.f32 %v7105_v2, %v9538_v25  ;;  %v3233_v10 = vpop.f32.mrb[3].mxu0 }
 0x42c   : > { %v3460_v54 = vmax.f32 %v3432_v49, 0.0  ;;  %v3433_v11 = vadd.f32 %v9538_v25, %v3233_v10 }
 0x42d   : > { %v6580_v12 = vpack.c.bf16 %v3462_v5, %v3462_v5  ;;  %v3463_v18 = vmax.f32 %v3435_v8, 0.0 }
 0x42e   : > { %v6578_v20 = vpack.c.bf16 %v3460_v54, %v3460_v54  ;;  %v3461_v33 = vmax.f32 %v3433_v11, 0.0 }
 0x42f   : > { %3602 = vst.msk [vmem:[#allocation3 + $0x8] sm:$0xf] %vm607_vm0, %v6580_v12  ;;  %v6581_v48 = vpack.c.bf16 %v3463_v18, %v3463_v18 }
 0x430   : > { %3600 = vst.msk [vmem:[#allocation3] sm:$0xf] %vm607_vm0, %v6578_v20  ;;  %v6579_v60 = vpack.c.bf16 %v3461_v33, %v3461_v33  ;;  %v7108_v4 = vpop.f32.mrb[4].mxu0 }
 0x431   : > { %3603 = vst.msk [vmem:[#allocation3 + $0xc] sm:$0xf] %vm607_vm0, %v6581_v48  ;;  %v3438_v1 = vadd.f32 %v7108_v4, %v9538_v25  ;;  %v3246_v30 = vpop.f32.mrb[5].mxu0 }
 0x432   : > { %3601 = vst.msk [vmem:[#allocation3 + $0x4] sm:$0xf] %vm607_vm0, %v6579_v60  ;;  %v3436_v6 = vadd.f32 %v9538_v25, %v3246_v30  ;;  %v7109_v36 = vpop.f32.mrb[6].mxu0 }
 0x433   : > { %v3466_v58 = vmax.f32 %v3438_v1, 0.0  ;;  %v3439_v0 = vadd.f32 %v7109_v36, %v9538_v25  ;;  %v3249_v40 = vpop.f32.mrb[7].mxu0 }
 0x434   : > { %v3464_v45 = vmax.f32 %v3436_v6, 0.0  ;;  %v3437_v44 = vadd.f32 %v9538_v25, %v3249_v40 }
 0x435   : > { %v6584_v17 = vpack.c.bf16 %v3466_v58, %v3466_v58  ;;  %v3467_v52 = vmax.f32 %v3439_v0, 0.0 }
 0x436   : > { %v6582_v13 = vpack.c.bf16 %v3464_v45, %v3464_v45  ;;  %v3465_v22 = vmax.f32 %v3437_v44, 0.0 }
 0x437   : > { %3606 = vst.msk [vmem:[#allocation3 + $0x18] sm:$0xf] %vm607_vm0, %v6584_v17  ;;  %v6585_v38 = vpack.c.bf16 %v3467_v52, %v3467_v52  ;;  %v3629_v53 = vld [vmem:[#allocation3] sm:$0xf]  ;;  %v4015_v52 = vsel %vm3857_vm7, %v9534_v51, 0 }
 0x438   : > { %3604 = vst.msk [vmem:[#allocation3 + $0x10] sm:$0xf] %vm607_vm0, %v6582_v13  ;;  %v6583_v56 = vpack.c.bf16 %v3465_v22, %v3465_v22  ;;  %v7112_v42 = vpop.f32.mrb[8].mxu0  ;;  %v9554_v61 = vld [vmem:[#allocation3 + $0x8] sm:$0xff]   ;;  %v4146_v37 = vld [vmem:[#allocation3] sm:$0xe] }
 0x439   : > { %3607 = vst.msk [vmem:[#allocation3 + $0x1c] sm:$0xf] %vm607_vm0, %v6585_v38  ;;  %v3442_v9 = vadd.f32 %v7112_v42, %v9538_v25  ;;  %v3262_v46 = vpop.f32.mrb[9].mxu0  ;;  %v3630_v47 = vld [vmem:[#allocation3 + $0x4] sm:$0xf]  ;;  %v3728_v28 = vshll.u32 %v9554_v61, 16 }
 0x43a   : > { %3605 = vst.msk [vmem:[#allocation3 + $0x14] sm:$0xf] %vm607_vm0, %v6583_v56  ;;  %v3440_v7 = vadd.f32 %v9538_v25, %v3262_v46  ;;  %v7113_v16 = vpop.f32.mrb[10].mxu0  ;;  %v9560_v55 = vcombine.low %v3629_v53, %v3630_v47  ;;  %v6455_v62 = vcombine.low %v4146_v37, %v3630_v47  ;;  %v4153_v10 = vrot.slane %v9554_v61, 1 }
 0x43b   : > { %v3470_v27 = vmax.f32 %v3442_v9, 0.0  ;;  %v3443_v14 = vadd.f32 %v7113_v16, %v9538_v25  ;;  %v3265_v57 = vpop.f32.mrb[11].mxu0  ;;  %v3730_v33 = vrot.slane %v3728_v28, 1  ;;  %v3732_v48 = vshrl.u32 %v9554_v61, 16 }
 0x43c   : > { %v3468_v26 = vmax.f32 %v3440_v7, 0.0  ;;  %v3441_v63 = vadd.f32 %v9538_v25, %v3265_v57  ;;  %v3723_v49 = vshll.u32 %v9560_v55, 16  ;;  %v4152_v8 = vrot.slane %v6455_v62, 1  ;;  %v9595_v7 = vld [vmem:[#allocation15 + $0x4] sm:$0x3] }
 0x43d   : > { %v6588_v2 = vpack.c.bf16 %v3470_v27, %v3470_v27  ;;  %v3471_v5 = vmax.f32 %v3443_v14, 0.0  ;;  %v3721_v12 = vshrl.u32 %v9560_v55, 16  ;;  %v3734_v38 = vor.u32 %v3732_v48, %v3730_v33 }
 0x43e   : > { %v6586_v54 = vpack.c.bf16 %v3468_v26, %v3468_v26  ;;  %v3469_v11 = vmax.f32 %v3441_v63, 0.0  ;;  %v3725_v18 = vrot.slane %v3723_v49, 1  ;;  %v9571_v60 = vsel %vm1439_vm3, %v4152_v8, %v4153_v10 }
 0x43f   : > { %3610 = vst.msk [vmem:[#allocation3 + $0x28] sm:$0xf] %vm607_vm0, %v6588_v2  ;;  %v6589_v20 = vpack.c.bf16 %v3471_v5, %v3471_v5 }
 0x440   : > { %3608 = vst.msk [vmem:[#allocation3 + $0x20] sm:$0xf] %vm607_vm0, %v6586_v54  ;;  %v6587_v4 = vpack.c.bf16 %v3469_v11, %v3469_v11  ;;  %v7116_v1 = vpop.f32.mrb[12].mxu0  ;;  %v3726_v30 = vor.u32 %v3725_v18, %v3721_v12  ;;  %v9574_v6 = vld [vmem:[#allocation3 + $0x18] sm:$0xff]  }
 0x441   : > { %3611 = vst.msk [vmem:[#allocation3 + $0x2c] sm:$0xf] %vm607_vm0, %v6589_v20  ;;  %v7366_v36 = vadd.f32 %v7116_v1, %v9282_v21  ;;  %v3278_v58 = vpop.f32.mrb[13].mxu0  ;;  %v9578_v0 = vld [vmem:[#allocation3 + $0x10] sm:$0xff]   ;;  %v3744_v17 = vshll.u32 %v9574_v6, 16  ;;  %v3748_v18 = vshrl.u32 %v9574_v6, 16 }
 0x442   : > { %3609 = vst.msk [vmem:[#allocation3 + $0x24] sm:$0xf] %vm607_vm0, %v6587_v4  ;;  %v7367_v40 = vadd.f32 %v3278_v58, %v9285_v23  ;;  %v7117_v45 = vpop.f32.mrb[14].mxu0  ;;  %v3731_v44 = vsel %vm948_vm4, %v3726_v30, %v3730_v33  ;;  %v3736_v56 = vshll.u32 %v9578_v0, 16  ;;  %v3740_v9 = vshrl.u32 %v9578_v0, 16 }
 0x443   : > { %v3446_v13 = vadd.f32 %v7366_v36, %v9538_v25  ;;  %v7368_v22 = vadd.f32 %v7117_v45, %v9287_v24  ;;  %v3281_v21 = vpop.f32.mrb[15].mxu0  ;;  %7132 = vmatprep.mubr.msk.bf16.mxu1 %vm3820_vm8, %v3731_v44  ;;  %v4155_v46 = vrot.slane %v9578_v0, 1  ;;  %v4157_v24 = vrot.slane %v9574_v6, 1 }
 0x444   : > { %v3444_v23 = vadd.f32 %v7367_v40, %v9538_v25  ;;  %v7369_v42 = vadd.f32 %v3281_v21, %v9289_v29  ;;  %v3738_v47 = vrot.slane %v3736_v56, 1  ;;  %v3746_v27 = vrot.slane %v3744_v17, 1 }
 0x445   : > { %v3474_v53 = vmax.f32 %v3446_v13, 0.0  ;;  %v3447_v51 = vadd.f32 %v7368_v22, %v9538_v25  ;;  %v9600_v14 = vsel %vm1439_vm3, %v4153_v10, %v4155_v46  ;;  %v9607_v5 = vsel %vm1439_vm3, %v4155_v46, %v4157_v24 }
 0x446   : > { %v3472_v16 = vmax.f32 %v3444_v23, 0.0  ;;  %v3445_v37 = vadd.f32 %v7369_v42, %v9538_v25  ;;  %v3739_v28 = vsel %vm948_vm4, %v3734_v38, %v3738_v47  ;;  %v3742_v62 = vor.u32 %v3740_v9, %v3738_v47 }
 0x447   : > { %v6592_v29 = vpack.c.bf16 %v3474_v53, %v3474_v53  ;;  %v3475_v57 = vmax.f32 %v3447_v51, 0.0  ;;  %7133 = vmatmul.mubr.msk.bf16.vlgmr.msra.gmra.mrb[16].mxu1 %vm3820_vm8, %v3739_v28  ;;  %v3750_v36 = vor.u32 %v3748_v18, %v3746_v27 }
 0x448   : > { %v6590_v26 = vpack.c.bf16 %v3472_v16, %v3472_v16  ;;  %v3473_v63 = vmax.f32 %v3445_v37, 0.0  ;;  %v7120_v49 = vpop.f32.mrb[16].mxu0  ;;  %v9604_v2 = vld [vmem:[#allocation3 + $0x28] sm:$0xff]   ;;  %v3747_v11 = vsel %vm948_vm4, %v3742_v62, %v3746_v27  ;;  %7157 = vmatpush3.bf16.msra.mxu1 %v4015_v52 }
 0x449   : > { %3614 = vst.msk [vmem:[#allocation3 + $0x38] sm:$0xf] %vm607_vm0, %v6592_v29  ;;  %v6593_v8 = vpack.c.bf16 %v3475_v57, %v3475_v57  ;;  %v7370_v10 = vadd.f32 %v7120_v49, %v9296_v34  ;;  %v3294_v54 = vpop.f32.mrb[17].mxu0  ;;  %v9612_v12 = vld [vmem:[#allocation3 + $0x20] sm:$0xff]   ;;  %7136 = vmatprep.mubr.msk.bf16.mxu1 %vm3820_vm8, %v3747_v11  ;;  %v3760_v4 = vshll.u32 %v9604_v2, 16  ;;  %7794 = vmatprep.subr.msk.bf16.mxu1 %vm3857_vm7, %v9595_v7  ;;  %v3764_v62 = vshrl.u32 %v9604_v2, 16 }
 0x44a   : > { %3612 = vst.msk [vmem:[#allocation3 + $0x30] sm:$0xf] %vm607_vm0, %v6590_v26  ;;  %v6591_v20 = vpack.c.bf16 %v3473_v63, %v3473_v63  ;;  %v7371_v33 = vadd.f32 %v3294_v54, %v9299_v35  ;;  %v7121_v48 = vpop.f32.mrb[18].mxu0  ;;  %v3752_v58 = vshll.u32 %v9612_v12, 16  ;;  %v3756_v45 = vshrl.u32 %v9612_v12, 16 }
 0x44b   : > { %3615 = vst.msk [vmem:[#allocation3 + $0x3c] sm:$0xf] %vm607_vm0, %v6593_v8  ;;  %v3450_v34 = vadd.f32 %v7370_v10, %v9538_v25  ;;  %v7372_v1 = vadd.f32 %v7121_v48, %v9301_v15  ;;  %v3297_v30 = vpop.f32.mrb[19].mxu0  ;;  %v4159_v44 = vrot.slane %v9612_v12, 1  ;;  %v4161_v15 = vrot.slane %v9604_v2, 1 }
 0x44c   : > { %3613 = vst.msk [vmem:[#allocation3 + $0x34] sm:$0xf] %vm607_vm0, %v6591_v20  ;;  %v3448_v35 = vadd.f32 %v7371_v33, %v9538_v25  ;;  %v7373_v40 = vadd.f32 %v3297_v30, %v9304_v39  ;;  %v3754_v13 = vrot.slane %v3752_v58, 1  ;;  %v3762_v38 = vrot.slane %v3760_v4, 1 }
 0x44d   : > { %v3478_v17 = vmax.f32 %v3450_v34, 0.0  ;;  %v3451_v52 = vadd.f32 %v7372_v1, %v9538_v25  ;;  %v9634_v56 = vsel %vm1439_vm3, %v4157_v24, %v4159_v44  ;;  %v9639_v47 = vsel %vm1439_vm3, %v4159_v44, %v4161_v15 }
 0x44e   : > { %v3476_v22 = vmax.f32 %v3448_v35, 0.0  ;;  %v3449_v21 = vadd.f32 %v7373_v40, %v9538_v25  ;;  %v3755_v39 = vsel %vm948_vm4, %v3750_v36, %v3754_v13  ;;  %v3758_v9 = vor.u32 %v3756_v45, %v3754_v13 }
 0x44f   : > { %v6596_v23 = vpack.c.bf16 %v3478_v17, %v3478_v17  ;;  %v3479_v42 = vmax.f32 %v3451_v52, 0.0  ;;  %7137 = vmatmul.mubr.msk.bf16.gmra.mrb[20].mxu1 %vm3820_vm8, %v3755_v39  ;;  %v3766_v54 = vor.u32 %v3764_v62, %v3762_v38 }
 0x450   : > { %v6594_v46 = vpack.c.bf16 %v3476_v22, %v3476_v22  ;;  %v3477_v53 = vmax.f32 %v3449_v21, 0.0  ;;  %v7124_v51 = vpop.f32.mrb[20].mxu0  ;;  %v3763_v27 = vsel %vm948_vm4, %v3758_v9, %v3762_v38 }
 0x451   : > { %3618 = vst.msk [vmem:[#allocation3 + $0x48] sm:$0xf] %vm607_vm0, %v6596_v23  ;;  %v6597_v16 = vpack.c.bf16 %v3479_v42, %v3479_v42  ;;  %v7374_v37 = vadd.f32 %v7124_v51, %v9315_v43  ;;  %v3310_v24 = vpop.f32.mrb[21].mxu0  ;;  %7140 = vmatprep.mubr.msk.bf16.mxu1 %vm3820_vm8, %v3763_v27 }
 0x452   : > { %3616 = vst.msk [vmem:[#allocation3 + $0x40] sm:$0xf] %vm607_vm0, %v6594_v46  ;;  %v6595_v29 = vpack.c.bf16 %v3477_v53, %v3477_v53  ;;  %v7375_v57 = vadd.f32 %v3310_v24, %v9318_v41  ;;  %v7125_v28 = vpop.f32.mrb[22].mxu0  ;;  %v9648_v26 = vld [vmem:[#allocation3 + $0x38] sm:$0xff]  }
 0x453   : > { %3619 = vst.msk [vmem:[#allocation3 + $0x4c] sm:$0xf] %vm607_vm0, %v6597_v16  ;;  %v3454_v63 = vadd.f32 %v7374_v37, %v9538_v25  ;;  %v7376_v43 = vadd.f32 %v7125_v28, %v9320_v59  ;;  %v3313_v49 = vpop.f32.mrb[23].mxu0  ;;  %v9653_v8 = vld [vmem:[#allocation3 + $0x30] sm:$0xff]   ;;  %v3776_v11 = vshll.u32 %v9648_v26, 16 }
 0x454   : > { %3617 = vst.msk [vmem:[#allocation3 + $0x44] sm:$0xf] %vm607_vm0, %v6595_v29  ;;  %v3452_v41 = vadd.f32 %v7375_v57, %v9538_v25  ;;  %v7377_v10 = vadd.f32 %v3313_v49, %v9322_v3  ;;  %v3768_v33 = vshll.u32 %v9653_v8, 16  ;;  %v3772_v48 = vshrl.u32 %v9653_v8, 16 }
 0x455   : > { %v3482_v18 = vmax.f32 %v3454_v63, 0.0  ;;  %v3455_v20 = vadd.f32 %v7376_v43, %v9538_v25  ;;  %v3778_v34 = vrot.slane %v3776_v11, 1  ;;  %v4163_v1 = vrot.slane %v9653_v8, 1 }
 0x456   : > { %v3480_v59 = vmax.f32 %v3452_v41, 0.0  ;;  %v3453_v4 = vadd.f32 %v7377_v10, %v9538_v25  ;;  %v3770_v58 = vrot.slane %v3768_v33, 1  ;;  %v4165_v3 = vrot.slane %v9648_v26, 1 }
 0x457   : > { %v6600_v30 = vpack.c.bf16 %v3482_v18, %v3482_v18  ;;  %v3483_v36 = vmax.f32 %v3455_v20, 0.0  ;;  %v9666_v44 = vsel %vm1439_vm3, %v4161_v15, %v4163_v1 }
 0x458   : > { %v6598_v35 = vpack.c.bf16 %v3480_v59, %v3480_v59  ;;  %v3481_v40 = vmax.f32 %v3453_v4, 0.0  ;;  %v7128_v45 = vpop.f32.mrb[24].mxu0  ;;  %v3771_v22 = vsel %vm948_vm4, %v3766_v54, %v3770_v58  ;;  %v3774_v21 = vor.u32 %v3772_v48, %v3770_v58 }
 0x459   : > { %3622 = vst.msk [vmem:[#allocation3 + $0x58] sm:$0xf] %vm607_vm0, %v6600_v30  ;;  %v6601_v17 = vpack.c.bf16 %v3483_v36, %v3483_v36  ;;  %v7378_v52 = vadd.f32 %v7128_v45, %v9329_v50  ;;  %v3326_v13 = vpop.f32.mrb[25].mxu0  ;;  %7141 = vmatmul.mubr.msk.bf16.gmra.mrb[24].mxu1 %vm3820_vm8, %v3771_v22  ;;  %v9677_v15 = vsel %vm1439_vm3, %v4163_v1, %v4165_v3 }
 0x45a   : > { %3620 = vst.msk [vmem:[#allocation3 + $0x50] sm:$0xf] %vm607_vm0, %v6598_v35  ;;  %v6599_v38 = vpack.c.bf16 %v3481_v40, %v3481_v40  ;;  %v7379_v23 = vadd.f32 %v3326_v13, %v9332_v19  ;;  %v7129_v42 = vpop.f32.mrb[26].mxu0  ;;  %v9674_v39 = vld [vmem:[#allocation3 + $0x48] sm:$0xff]   ;;  %v3779_v53 = vsel %vm948_vm4, %v3774_v21, %v3778_v34  ;;  %v3780_v19 = vshrl.u32 %v9648_v26, 16 }
 0x45b   : > { %3623 = vst.msk [vmem:[#allocation3 + $0x5c] sm:$0xf] %vm607_vm0, %v6601_v17  ;;  %v3458_v50 = vadd.f32 %v7378_v52, %v9538_v25  ;;  %v7380_v9 = vadd.f32 %v7129_v42, %v9334_v31  ;;  %v3329_v46 = vpop.f32.mrb[27].mxu0  ;;  %v9683_v51 = vld [vmem:[#allocation3 + $0x40] sm:$0xff]   ;;  %7144 = vmatprep.mubr.msk.bf16.mxu1 %vm3820_vm8, %v3779_v53  ;;  %v3792_v24 = vshll.u32 %v9674_v39, 16  ;;  %v4169_v10 = vrot.slane %v9674_v39, 1 }
 0x45c   : > { %3621 = vst.msk [vmem:[#allocation3 + $0x54] sm:$0xf] %vm607_vm0, %v6599_v38  ;;  %v3456_v16 = vadd.f32 %v7379_v23, %v9538_v25  ;;  %v7381_v37 = vadd.f32 %v3329_v46, %v9336_v32  ;;  %v3782_v29 = vor.u32 %v3780_v19, %v3778_v34  ;;  %v3784_v57 = vshll.u32 %v9683_v51, 16 }
 0x45d   : > { %v3486_v27 = vmax.f32 %v3458_v50, 0.0  ;;  %v3459_v31 = vadd.f32 %v7380_v9, %v9538_v25  ;;  %v3788_v63 = vshrl.u32 %v9683_v51, 16  ;;  %v4167_v43 = vrot.slane %v9683_v51, 1 }
 0x45e   : > { %v3484_v28 = vmax.f32 %v3456_v16, 0.0  ;;  %v3457_v62 = vadd.f32 %v7381_v37, %v9538_v25  ;;  %v3786_v32 = vrot.slane %v3784_v57, 1  ;;  %v3794_v18 = vrot.slane %v3792_v24, 1  ;;  %v9788_v57 = vld [vmem:[#allocation3 + $0x28] sm:$0xff]  }
 0x45f   : > { %v6604_v49 = vpack.c.bf16 %v3486_v27, %v3486_v27  ;;  %v3487_v41 = vmax.f32 %v3459_v31, 0.0  ;;  %v9698_v20 = vsel %vm1439_vm3, %v4165_v3, %v4167_v43  ;;  %v9703_v59 = vsel %vm1439_vm3, %v4167_v43, %v4169_v10  ;;  %v4397_v31 = vld [vmem:[#allocation15 + $0x8] sm:$0x3]  ;;  %v9791_v43 = vld [vmem:[#allocation3 + $0x30] sm:$0xff]  }
 0x460   : > { %v6602_v54 = vpack.c.bf16 %v3484_v28, %v3484_v28  ;;  %v3485_v11 = vmax.f32 %v3457_v62, 0.0  ;;  %v3787_v25 = vsel %vm948_vm4, %v3782_v29, %v3786_v32  ;;  %v3790_v48 = vor.u32 %v3788_v63, %v3786_v32 }
 0x461   : > { %3626 = vst.msk [vmem:[#allocation3 + $0x68] sm:$0xf] %vm607_vm0, %v6604_v49  ;;  %v6605_v33 = vpack.c.bf16 %v3487_v41, %v3487_v41  ;;  %7145 = vmatmul.mubr.msk.bf16.gmra.mrb[28].mxu1 %vm3820_vm8, %v3787_v25  ;;  %v3796_v36 = vshrl.u32 %v9674_v39, 16  ;;  %v4214_v27 = vsel %vm3857_vm7, %v9595_v7, 0  ;;  %v9771_v7 = vld [vmem:[#allocation3 + $0x10] sm:$0xff]   ;;  %v4493_v32 = vshll.u32 %v9788_v57, 16 }
 0x462   : > { %3624 = vst.msk [vmem:[#allocation3 + $0x60] sm:$0xf] %vm607_vm0, %v6602_v54  ;;  %v6603_v4 = vpack.c.bf16 %v3485_v11, %v3485_v11  ;;  %v7989_v34 = vld [vmem:[#allocation3 + $0x58] sm:$0xff]   ;;  %v3795_v1 = vsel %vm948_vm4, %v3790_v48, %v3794_v18  ;;  %v9796_v54 = vld [vmem:[#allocation15 + $0xa] sm:$0x3] }
 0x463   : > { %3627 = vst.msk [vmem:[#allocation3 + $0x6c] sm:$0xf] %vm607_vm0, %v6605_v33  ;;  %v7988_v30 = vld [vmem:[#allocation3 + $0x50] sm:$0xff]   ;;  %7148 = vmatprep.mubr.msk.bf16.mxu1 %vm3820_vm8, %v3795_v1  ;;  %v4173_v58 = vrot.slane %v7989_v34, 1  ;;  %v3808_v35 = vshll.u32 %v7989_v34, 16  ;;  %v3798_v45 = vor.u32 %v3796_v36, %v3794_v18  ;;  %v3812_v53 = vshrl.u32 %v7989_v34, 16 }
 0x464   : > { %3625 = vst.msk [vmem:[#allocation3 + $0x64] sm:$0xf] %vm607_vm0, %v6603_v4  ;;  %v3800_v3 = vshll.u32 %v7988_v30, 16  ;;  %v4171_v40 = vrot.slane %v7988_v30, 1  ;;  %v3804_v52 = vshrl.u32 %v7988_v30, 16  ;;  %v4501_v18 = vshll.u32 %v9791_v43, 16 }
 0x465   : > { %v3810_v23 = vrot.slane %v3808_v35, 1  ;;  %v4495_v33 = vrot.slane %v4493_v32, 1  ;;  %v9803_v25 = vld [vmem:[#allocation3 + $0x38] sm:$0xff]   ;;  %v4505_v35 = vshrl.u32 %v9791_v43, 16 }
 0x466   : > { %v3802_v17 = vrot.slane %v3800_v3, 1  ;;  %v4172_v13 = vsel %vm1439_vm3, %v4169_v10, %v4171_v40  ;;  %v4174_v22 = vsel %vm1439_vm3, %v4171_v40, %v4173_v58  ;;  %v4503_v4 = vrot.slane %v4501_v18, 1 }
 0x467   : > { %v3814_v37 = vor.u32 %v3812_v53, %v3810_v23  ;;  %v9829_v53 = vld [vmem:[#allocation3 + $0x58] sm:$0xff]  }
 0x468   : > { %v3803_v21 = vsel %vm948_vm4, %v3798_v45, %v3802_v17  ;;  %v3806_v38 = vor.u32 %v3804_v52, %v3802_v17  ;;  %v9817_v45 = vld [vmem:[#allocation3 + $0x48] sm:$0xff]   ;;  %v4507_v17 = vor.u32 %v4505_v35, %v4503_v4  ;;  %v4513_v52 = vshrl.u32 %v9803_v25, 16 }
 0x469   : > { %v7990_v42 = vld [vmem:[#allocation3 + $0x60] ss:$0 sps:$4 sm:$0x11]   ;;  %7149 = vmatmul.mubr.msk.bf16.gmra.mrb[32].mxu1 %vm3820_vm8, %v3803_v21 }
 0x46a   : > { %v3811_v50 = vsel %vm948_vm4, %v3806_v38, %v3810_v23  ;;  %v3816_v9 = vshll.u32 %v7990_v42, 16  ;;  %v4175_v46 = vrot.slane %v7990_v42, 1  ;;  %v4525_v38 = vshll.u32 %v9817_v45, 16 }
 0x46b   : > { %7152 = vmatprep.mubr.msk.bf16.mxu1 %vm3820_vm8, %v3811_v50 }
 0x46c   : > { %v3818_v19 = vrot.slane %v3816_v9, 1  ;;  %v4176_v16 = vsel %vm1439_vm3, %v4173_v58, %v4175_v46  ;;  %v4527_v46 = vrot.slane %v4525_v38, 1 }
 0x46e   : > { %v3819_v24 = vsel %vm948_vm4, %v3814_v37, %v3818_v19 }
 0x471   : > { %7153 = vmatmul.mubr.msk.bf16.gmra.mrb[36].mxu1 %vm3820_vm8, %v3819_v24  ;;  %v9832_v24 = vld [vmem:[#allocation3 + $0x60] sm:$0xff]  }
 0x472   : > { %7158 = vmatprep.mubr.msk.bf16.mxu1 %vm3820_vm8, %v9560_v55  ;;  %v4394_v55 = vld [vmem:[#allocation15 + $0x6] sm:$0x3] }
 0x473   : > { %v4754_v49 = vsel %vm3857_vm7, %v4394_v55, 0 }
 0x479   : > { %7159 = vmatmul.mubr.msk.bf16.vlgmr.msra.gmra.mrb[16].mxu1 %vm3820_vm8, %v9554_v61  ;;  %v4598_v61 = vsel %vm3857_vm7, %v4397_v31, 0 }
 0x47a   : > { %7183 = vmatpush3.bf16.msra.mxu1 %v4214_v27  ;;  %7162 = vmatprep.mubr.msk.bf16.mxu1 %vm3820_vm8, %v9578_v0 }
 0x47b   : > { %7795 = vmatprep.subr.msk.bf16.mxu1 %vm3857_vm7, %v4397_v31  ;;  %v4541_v31 = vshll.u32 %v9829_v53, 16 }
 0x481   : > { %7163 = vmatmul.mubr.msk.bf16.gmra.mrb[20].mxu1 %vm3820_vm8, %v9574_v6  ;;  %v4369_v6 = vld [vmem:[#allocation3 + $0x8] sm:$0xf] }
 0x482   : > { %7166 = vmatprep.mubr.msk.bf16.mxu1 %vm3820_vm8, %v9612_v12  ;;  %v9777_v12 = vld [vmem:[#allocation3 + $0x18] sm:$0xff]  }
 0x483   : > { %v4481_v62 = vshrl.u32 %v9777_v12, 16  ;;  %v4894_v18 = vrot.slane %v9777_v12, 1 }
 0x489   : > { %7167 = vmatmul.mubr.msk.bf16.gmra.mrb[24].mxu1 %vm3820_vm8, %v9604_v2  ;;  %v4469_v2 = vshll.u32 %v9771_v7, 16 }
 0x48a   : > { %7170 = vmatprep.mubr.msk.bf16.mxu1 %vm3820_vm8, %v9653_v8 }
 0x491   : > { %7171 = vmatmul.mubr.msk.bf16.gmra.mrb[28].mxu1 %vm3820_vm8, %v9648_v26  ;;  %v9780_v26 = vld [vmem:[#allocation3 + $0x20] sm:$0xff]  }
 0x492   : > { %7174 = vmatprep.mubr.msk.bf16.mxu1 %vm3820_vm8, %v9683_v51  ;;  %v4473_v51 = vshrl.u32 %v9771_v7, 16 }
 0x499   : > { %7175 = vmatmul.mubr.msk.bf16.gmra.mrb[32].mxu1 %vm3820_vm8, %v9674_v39 }
 0x49a   : > { %7178 = vmatprep.mubr.msk.bf16.mxu1 %vm3820_vm8, %v7988_v30  ;;  %v4509_v30 = vshll.u32 %v9803_v25, 16 }
 0x49c   : > { %v4511_v40 = vrot.slane %v4509_v30, 1 }
 0x49e   : > { %v4515_v21 = vor.u32 %v4513_v52, %v4511_v40  ;;  %v4512_v23 = vsel %vm948_vm4, %v4507_v17, %v4511_v40  ;;  %v5108_v40 = vld [vmem:[#allocation3 + $0x10] sm:$0xf]  ;;  %v4910_v17 = vrot.slane %v9829_v53, 1 }
 0x4a1   : > { %7179 = vmatmul.mubr.msk.bf16.gmra.mrb[36].mxu1 %vm3820_vm8, %v7989_v34  ;;  %v9808_v34 = vld [vmem:[#allocation3 + $0x40] sm:$0xff]  }
 0x4a2   : > { %7184 = vmatprep.mubr.msk.bf16.mxu1 %vm3820_vm8, %v9571_v60  ;;  %v9762_v60 = vld [vmem:[#allocation3 + $0xc] sm:$0xf]  ;;  %v4517_v3 = vshll.u32 %v9808_v34, 16  ;;  %v4521_v9 = vshrl.u32 %v9808_v34, 16  ;;  %v4904_v30 = vrot.slane %v9808_v34, 1 }
 0x4a3   : > { %v9769_v0 = vcombine.low %v4369_v6, %v9762_v60  ;;  %v4549_v6 = vshll.u32 %v9832_v24, 16 }
 0x4a9   : > { %7185 = vmatmul.mubr.msk.bf16.vlgmr.msra.gmra.mrb[16].mxu1 %vm3820_vm8, %v9600_v14  ;;  %v4464_v14 = vshll.u32 %v9769_v0, 16 }
 0x4aa   : > { %7209 = vmatpush3.bf16.msra.mxu1 %v4598_v61  ;;  %7188 = vmatprep.mubr.msk.bf16.mxu1 %vm3820_vm8, %v9607_v5 }
 0x4ab   : > { %7796 = vmatprep.subr.msk.bf16.mxu1 %vm3857_vm7, %v4394_v55  ;;  %v4466_v5 = vrot.slane %v4464_v14, 1 }
 0x4b1   : > { %7189 = vmatmul.mubr.msk.bf16.gmra.mrb[20].mxu1 %vm3820_vm8, %v9634_v56  ;;  %v4462_v56 = vshrl.u32 %v9769_v0, 16 }
 0x4b2   : > { %7192 = vmatprep.mubr.msk.bf16.mxu1 %vm3820_vm8, %v9639_v47  ;;  %v4471_v47 = vrot.slane %v4469_v2, 1  ;;  %v4543_v2 = vrot.slane %v4541_v31, 1  ;;  %v9934_v31 = vld [vmem:[#allocation3 + $0x30] sm:$0xff]  }
 0x4b3   : > { %v4467_v8 = vor.u32 %v4466_v5, %v4462_v56  ;;  %v4545_v56 = vshrl.u32 %v9829_v53, 16 }
 0x4b4   : > { %v4475_v28 = vor.u32 %v4473_v51, %v4471_v47  ;;  %v4553_v51 = vshrl.u32 %v9832_v24, 16 }
 0x4b5   : > { %v4472_v39 = vsel %vm948_vm4, %v4467_v8, %v4471_v47  ;;  %v4551_v47 = vrot.slane %v4549_v6, 1  ;;  %v9842_v8 = vld [vmem:[#allocation3 + $0x68] ss:$0 sps:$4 sm:$0x11]  }
 0x4b9   : > { %7193 = vmatmul.mubr.msk.bf16.gmra.mrb[24].mxu1 %vm3820_vm8, %v9666_v44  ;;  %v4477_v44 = vshll.u32 %v9777_v12, 16 }
 0x4ba   : > { %7196 = vmatprep.mubr.msk.bf16.mxu1 %vm3820_vm8, %v9677_v15  ;;  %v4485_v15 = vshll.u32 %v9780_v26, 16 }
 0x4bb   : > { %v4479_v29 = vrot.slane %v4477_v44, 1  ;;  %v4547_v44 = vor.u32 %v4545_v56, %v4543_v2 }
 0x4bc   : > { %v4487_v63 = vrot.slane %v4485_v15, 1 }
 0x4bd   : > { %v4483_v41 = vor.u32 %v4481_v62, %v4479_v29  ;;  %v4480_v10 = vsel %vm948_vm4, %v4475_v28, %v4479_v29  ;;  %v4552_v15 = vsel %vm948_vm4, %v4547_v44, %v4551_v47  ;;  %v4557_v29 = vshll.u32 %v9842_v8, 16 }
 0x4be   : > { %v4555_v28 = vor.u32 %v4553_v51, %v4551_v47 }
 0x4bf   : > { %v4488_v11 = vsel %vm948_vm4, %v4483_v41, %v4487_v63  ;;  %v4559_v62 = vrot.slane %v4557_v29, 1  ;;  %v5136_v41 = vld [vmem:[#allocation15 + $0xe] sm:$0x3]  ;;  %v9949_v29 = vld [vmem:[#allocation3 + $0x40] sm:$0xff]  }
 0x4c1   : > { %7197 = vmatmul.mubr.msk.bf16.gmra.mrb[28].mxu1 %vm3820_vm8, %v9698_v20  ;;  %v4489_v20 = vshrl.u32 %v9780_v26, 16 }
 0x4c2   : > { %7200 = vmatprep.mubr.msk.bf16.mxu1 %vm3820_vm8, %v9703_v59  ;;  %v4497_v59 = vshrl.u32 %v9788_v57, 16 }
 0x4c3   : > { %v4491_v48 = vor.u32 %v4489_v20, %v4487_v63  ;;  %v4560_v63 = vsel %vm948_vm4, %v4555_v28, %v4559_v62  ;;  %v4896_v20 = vrot.slane %v9780_v26, 1  ;;  %v5236_v28 = vshrl.u32 %v9934_v31, 16 }
 0x4c4   : > { %v4499_v1 = vor.u32 %v4497_v59, %v4495_v33  ;;  %v5133_v59 = vld [vmem:[#allocation15 + $0xc] sm:$0x3] }
 0x4c5   : > { %v4496_v36 = vsel %vm948_vm4, %v4491_v48, %v4495_v33  ;;  %v5337_v33 = vsel %vm3857_vm7, %v5136_v41, 0  ;;  %v5493_v56 = vsel %vm3857_vm7, %v5133_v59, 0 }
 0x4c6   : > { %v4504_v58 = vsel %vm948_vm4, %v4499_v1, %v4503_v4  ;;  %v4902_v1 = vrot.slane %v9803_v25, 1 }
 0x4c9   : > { %7201 = vmatmul.mubr.msk.bf16.gmra.mrb[32].mxu1 %vm3820_vm8, %v4172_v13  ;;  %v4519_v13 = vrot.slane %v4517_v3, 1  ;;  %v9905_v3 = vld [vmem:[#allocation3 + $0x14] sm:$0xf] }
 0x4ca   : > { %7204 = vmatprep.mubr.msk.bf16.mxu1 %vm3820_vm8, %v4174_v22  ;;  %v9820_v22 = vld [vmem:[#allocation3 + $0x50] sm:$0xff]  }
 0x4cb   : > { %v4520_v42 = vsel %vm948_vm4, %v4515_v21, %v4519_v13  ;;  %v4533_v50 = vshll.u32 %v9820_v22, 16  ;;  %v4523_v19 = vor.u32 %v4521_v9, %v4519_v13  ;;  %v4537_v14 = vshrl.u32 %v9820_v22, 16  ;;  %v9917_v13 = vld [vmem:[#allocation3 + $0x18] sm:$0xff]  }
 0x4cc   : > { %v5212_v6 = vshrl.u32 %v9917_v13, 16 }
 0x4cd   : > { %v4535_v37 = vrot.slane %v4533_v50, 1  ;;  %v4528_v61 = vsel %vm948_vm4, %v4523_v19, %v4527_v46  ;;  %v5208_v50 = vshll.u32 %v9917_v13, 16 }
 0x4cf   : > { %v4539_v5 = vor.u32 %v4537_v14, %v4535_v37  ;;  %v5210_v19 = vrot.slane %v5208_v50, 1 }
 0x4d1   : > { %7205 = vmatmul.mubr.msk.bf16.gmra.mrb[36].mxu1 %vm3820_vm8, %v4176_v16  ;;  %v4529_v16 = vshrl.u32 %v9817_v45, 16 }
 0x4d2   : > { %7210 = vmatprep.mubr.msk.bf16.mxu1 %vm3820_vm8, %v4472_v39  ;;  %v4544_v39 = vsel %vm948_vm4, %v4539_v5, %v4543_v2  ;;  %v5232_v2 = vshll.u32 %v9934_v31, 16  ;;  %v5214_v5 = vor.u32 %v5212_v6, %v5210_v19 }
 0x4d3   : > { %v4531_v27 = vor.u32 %v4529_v16, %v4527_v46  ;;  %v9929_v16 = vld [vmem:[#allocation3 + $0x28] sm:$0xff]  }
 0x4d4   : > { %v5234_v51 = vrot.slane %v5232_v2, 1 }
 0x4d5   : > { %v4536_v55 = vsel %vm948_vm4, %v4531_v27, %v4535_v37 }
 0x4d9   : > { %7211 = vmatmul.mubr.msk.bf16.vlgmr.msra.gmra.mrb[16].mxu1 %vm3820_vm8, %v4480_v10  ;;  %v4892_v10 = vrot.slane %v9771_v7, 1 }
 0x4da   : > { %7235 = vmatpush3.bf16.msra.mxu1 %v4754_v49  ;;  %7214 = vmatprep.mubr.msk.bf16.mxu1 %vm3820_vm8, %v4488_v11  ;;  %v4953_v49 = vsel %vm3857_vm7, %v9796_v54, 0 }
 0x4db   : > { %7797 = vmatprep.subr.msk.bf16.mxu1 %vm3857_vm7, %v9796_v54  ;;  %v4895_v48 = vsel %vm1439_vm3, %v4892_v10, %v4894_v18 }
 0x4e1   : > { %7215 = vmatmul.mubr.msk.bf16.gmra.mrb[20].mxu1 %vm3820_vm8, %v4496_v36 }
 0x4e2   : > { %7218 = vmatprep.mubr.msk.bf16.mxu1 %vm3820_vm8, %v4504_v58  ;;  %v4908_v58 = vrot.slane %v9820_v22, 1 }
 0x4e9   : > { %7219 = vmatmul.mubr.msk.bf16.gmra.mrb[24].mxu1 %vm3820_vm8, %v4512_v23  ;;  %v9922_v23 = vld [vmem:[#allocation3 + $0x20] sm:$0xff]  }
 0x4ea   : > { %7222 = vmatprep.mubr.msk.bf16.mxu1 %vm3820_vm8, %v4520_v42  ;;  %v5216_v46 = vshll.u32 %v9922_v23, 16 }
 0x4ec   : > { %v5218_v27 = vrot.slane %v5216_v46, 1 }
 0x4ee   : > { %v5219_v44 = vsel %vm948_vm4, %v5214_v5, %v5218_v27 }
 0x4f1   : > { %7223 = vmatmul.mubr.msk.bf16.gmra.mrb[28].mxu1 %vm3820_vm8, %v4528_v61  ;;  %v5220_v61 = vshrl.u32 %v9922_v23, 16 }
 0x4f2   : > { %7226 = vmatprep.mubr.msk.bf16.mxu1 %vm3820_vm8, %v4536_v55  ;;  %v5224_v55 = vshll.u32 %v9929_v16, 16 }
 0x4f3   : > { %v5222_v14 = vor.u32 %v5220_v61, %v5218_v27 }
 0x4f4   : > { %v5226_v47 = vrot.slane %v5224_v55, 1 }
 0x4f9   : > { %7227 = vmatmul.mubr.msk.bf16.gmra.mrb[32].mxu1 %vm3820_vm8, %v4544_v39  ;;  %v9945_v39 = vld [vmem:[#allocation15 + $0x10] sm:$0x3] }
 0x4fa   : > { %7230 = vmatprep.mubr.msk.bf16.mxu1 %vm3820_vm8, %v4552_v15  ;;  %v5227_v15 = vsel %vm948_vm4, %v5222_v14, %v5226_v47  ;;  %v5692_v5 = vsel %vm3857_vm7, %v9945_v39, 0 }
 0x501   : > { %7231 = vmatmul.mubr.msk.bf16.gmra.mrb[36].mxu1 %vm3820_vm8, %v4560_v63  ;;  %v5228_v63 = vshrl.u32 %v9929_v16, 16 }
 0x502   : > { %7236 = vmatprep.mubr.msk.bf16.mxu1 %vm3820_vm8, %v9769_v0  ;;  %v4885_v0 = vld [vmem:[#allocation3 + $0x8] sm:$0xe] }
 0x503   : > { %v6505_v32 = vcombine.low %v4885_v0, %v9762_v60  ;;  %v4897_v60 = vsel %vm1439_vm3, %v4894_v18, %v4896_v20  ;;  %v5230_v0 = vor.u32 %v5228_v63, %v5226_v47 }
 0x505   : > { %v4891_v54 = vrot.slane %v6505_v32, 1 }
 0x507   : > { %v4893_v11 = vsel %vm1439_vm3, %v4891_v54, %v4892_v10  ;;  %v9958_v10 = vld [vmem:[#allocation3 + $0x48] sm:$0xff]   ;;  %v5235_v54 = vsel %vm948_vm4, %v5230_v0, %v5234_v51 }
 0x509   : > { %7237 = vmatmul.mubr.msk.bf16.vlgmr.msra.gmra.mrb[16].mxu1 %vm3820_vm8, %v9771_v7  ;;  %v4898_v7 = vrot.slane %v9788_v57, 1 }
 0x50a   : > { %7261 = vmatpush3.bf16.msra.mxu1 %v4953_v49  ;;  %7240 = vmatprep.mubr.msk.bf16.mxu1 %vm3820_vm8, %v9777_v12  ;;  %v4900_v12 = vrot.slane %v9791_v43, 1  ;;  %v5238_v49 = vor.u32 %v5236_v28, %v5234_v51  ;;  %v5635_v51 = vrot.slane %v9929_v16, 1 }
 0x50b   : > { %7798 = vmatprep.subr.msk.bf16.mxu1 %vm3857_vm7, %v5136_v41  ;;  %v5248_v41 = vshll.u32 %v9949_v29, 16 }
 0x50c   : > { %v4901_v4 = vsel %vm1439_vm3, %v4898_v7, %v4900_v12  ;;  %v4903_v36 = vsel %vm1439_vm3, %v4900_v12, %v4902_v1 }
 0x50d   : > { %v5250_v18 = vrot.slane %v5248_v41, 1 }
 0x511   : > { %7241 = vmatmul.mubr.msk.bf16.gmra.mrb[20].mxu1 %vm3820_vm8, %v9780_v26  ;;  %v4899_v26 = vsel %vm1439_vm3, %v4896_v20, %v4898_v7  ;;  %v9963_v20 = vld [vmem:[#allocation3 + $0x50] sm:$0xff]  }
 0x512   : > { %7244 = vmatprep.mubr.msk.bf16.mxu1 %vm3820_vm8, %v9788_v57  ;;  %v4905_v57 = vsel %vm1439_vm3, %v4902_v1, %v4904_v30  ;;  %v5264_v7 = vshll.u32 %v9963_v20, 16 }
 0x519   : > { %7245 = vmatmul.mubr.msk.bf16.gmra.mrb[24].mxu1 %vm3820_vm8, %v9791_v43  ;;  %v4906_v43 = vrot.slane %v9817_v45, 1 }
 0x51a   : > { %7248 = vmatprep.mubr.msk.bf16.mxu1 %vm3820_vm8, %v9803_v25 }
 0x51b   : > { %v4907_v35 = vsel %vm1439_vm3, %v4904_v30, %v4906_v43  ;;  %v4909_v25 = vsel %vm1439_vm3, %v4906_v43, %v4908_v58  ;;  %v5268_v43 = vshrl.u32 %v9963_v20, 16 }
 0x521   : > { %7249 = vmatmul.mubr.msk.bf16.gmra.mrb[28].mxu1 %vm3820_vm8, %v9808_v34  ;;  %v9911_v34 = vcombine.low %v5108_v40, %v9905_v3 }
 0x522   : > { %7252 = vmatprep.mubr.msk.bf16.mxu1 %vm3820_vm8, %v9817_v45  ;;  %v4912_v45 = vrot.slane %v9832_v24, 1 }
 0x523   : > { %v5203_v52 = vshll.u32 %v9911_v34, 16  ;;  %v5201_v42 = vshrl.u32 %v9911_v34, 16 }
 0x524   : > { %v4913_v21 = vsel %vm1439_vm3, %v4910_v17, %v4912_v45 }
 0x525   : > { %v5205_v38 = vrot.slane %v5203_v52, 1  ;;  %v9982_v52 = vld [vmem:[#allocation3 + $0x68] sm:$0xff]  }
 0x526   : > { %v5288_v50 = vshll.u32 %v9982_v52, 16  ;;  %v5292_v55 = vshrl.u32 %v9982_v52, 16 }
 0x527   : > { %v5206_v9 = vor.u32 %v5205_v38, %v5201_v42 }
 0x529   : > { %7253 = vmatmul.mubr.msk.bf16.gmra.mrb[32].mxu1 %vm3820_vm8, %v9820_v22  ;;  %v4911_v22 = vsel %vm1439_vm3, %v4908_v58, %v4910_v17 }
 0x52a   : > { %7256 = vmatprep.mubr.msk.bf16.mxu1 %vm3820_vm8, %v9829_v53  ;;  %v4914_v53 = vrot.slane %v9842_v8, 1  ;;  %v9942_v8 = vld [vmem:[#allocation3 + $0x38] sm:$0xff]  }
 0x52b   : > { %v5240_v62 = vshll.u32 %v9942_v8, 16 }
 0x52c   : > { %v4915_v37 = vsel %vm1439_vm3, %v4912_v45, %v4914_v53 }
 0x52d   : > { %v5242_v32 = vrot.slane %v5240_v62, 1  ;;  %v5639_v62 = vrot.slane %v9942_v8, 1 }
 0x531   : > { %7257 = vmatmul.mubr.msk.bf16.gmra.mrb[36].mxu1 %vm3820_vm8, %v9832_v24  ;;  %v5211_v24 = vsel %vm948_vm4, %v5206_v9, %v5210_v19  ;;  %v9991_v19 = vld [vmem:[#allocation3 + $0x70] ss:$0 sps:$4 sm:$0x11]  }
 0x532   : > { %7262 = vmatprep.mubr.msk.bf16.mxu1 %vm3820_vm8, %v4893_v11  ;;  %v5243_v11 = vsel %vm948_vm4, %v5238_v49, %v5242_v32  ;;  %v5296_v27 = vshll.u32 %v9991_v19, 16  ;;  %v5643_v49 = vrot.slane %v9958_v10, 1 }
 0x534   : > { %v5298_v14 = vrot.slane %v5296_v27, 1 }
 0x539   : > { %7263 = vmatmul.mubr.msk.bf16.vlgmr.msra.gmra.mrb[16].mxu1 %vm3820_vm8, %v4895_v48  ;;  %v5256_v48 = vshll.u32 %v9958_v10, 16 }
 0x53a   : > { %7287 = vmatpush3.bf16.msra.mxu1 %v5337_v33  ;;  %7266 = vmatprep.mubr.msk.bf16.mxu1 %vm3820_vm8, %v4897_v60  ;;  %v5252_v33 = vshrl.u32 %v9949_v29, 16 }
 0x53b   : > { %7799 = vmatprep.subr.msk.bf16.mxu1 %vm3857_vm7, %v5133_v59  ;;  %v5244_v59 = vshrl.u32 %v9942_v8, 16 }
 0x53c   : > { %v5254_v60 = vor.u32 %v5252_v33, %v5250_v18 }
 0x53d   : > { %v5246_v12 = vor.u32 %v5244_v59, %v5242_v32 }
 0x53f   : > { %v5251_v1 = vsel %vm948_vm4, %v5246_v12, %v5250_v18 }
 0x541   : > { %7267 = vmatmul.mubr.msk.bf16.gmra.mrb[20].mxu1 %vm3820_vm8, %v4899_v26  ;;  %v5258_v26 = vrot.slane %v5256_v48, 1  ;;  %v10065_v48 = vld [vmem:[#allocation16] ss:$0 sm:$0xff] }
 0x542   : > { %7270 = vmatprep.mubr.msk.bf16.mxu1 %vm3820_vm8, %v4901_v4  ;;  %v9970_v4 = vld [vmem:[#allocation3 + $0x58] sm:$0xff]  }
 0x543   : > { %v5259_v30 = vsel %vm948_vm4, %v5254_v60, %v5258_v26  ;;  %v5272_v58 = vshll.u32 %v9970_v4, 16  ;;  %v5276_v9 = vshrl.u32 %v9970_v4, 16  ;;  %v5647_v0 = vrot.slane %v9970_v4, 1 }
 0x545   : > { %v5274_v45 = vrot.slane %v5272_v58, 1 }
 0x547   : > { %v5278_v53 = vor.u32 %v5276_v9, %v5274_v45 }
 0x549   : > { %7271 = vmatmul.mubr.msk.bf16.gmra.mrb[24].mxu1 %vm3820_vm8, %v4903_v36  ;;  %v5266_v36 = vrot.slane %v5264_v7, 1 }
 0x54a   : > { %7274 = vmatprep.mubr.msk.bf16.mxu1 %vm3820_vm8, %v4905_v57  ;;  %v9975_v57 = vld [vmem:[#allocation3 + $0x60] sm:$0xff]  }
 0x54b   : > { %v5270_v40 = vor.u32 %v5268_v43, %v5266_v36  ;;  %v5284_v42 = vshrl.u32 %v9975_v57, 16 }
 0x551   : > { %7275 = vmatmul.mubr.msk.bf16.gmra.mrb[28].mxu1 %vm3820_vm8, %v4907_v35  ;;  %v5260_v35 = vshrl.u32 %v9958_v10, 16 }
 0x552   : > { %7278 = vmatprep.mubr.msk.bf16.mxu1 %vm3820_vm8, %v4909_v25  ;;  %v5280_v25 = vshll.u32 %v9975_v57, 16 }
 0x553   : > { %v5262_v17 = vor.u32 %v5260_v35, %v5258_v26 }
 0x554   : > { %v5282_v38 = vrot.slane %v5280_v25, 1 }
 0x556   : > { %v5286_v46 = vor.u32 %v5284_v42, %v5282_v38 }
 0x559   : > { %7279 = vmatmul.mubr.msk.bf16.gmra.mrb[32].mxu1 %vm3820_vm8, %v4911_v22  ;;  %v5267_v22 = vsel %vm948_vm4, %v5262_v17, %v5266_v36 }
 0x55a   : > { %7282 = vmatprep.mubr.msk.bf16.mxu1 %vm3820_vm8, %v4913_v21  ;;  %v5275_v21 = vsel %vm948_vm4, %v5270_v40, %v5274_v45 }
 0x561   : > { %7283 = vmatmul.mubr.msk.bf16.gmra.mrb[36].mxu1 %vm3820_vm8, %v4915_v37  ;;  %v5290_v37 = vrot.slane %v5288_v50, 1 }
 0x562   : > { %7288 = vmatprep.mubr.msk.bf16.mxu1 %vm3820_vm8, %v5211_v24  ;;  %v5283_v24 = vsel %vm948_vm4, %v5278_v53, %v5282_v38 }
 0x563   : > { %v5291_v61 = vsel %vm948_vm4, %v5286_v46, %v5290_v37  ;;  %v5294_v6 = vor.u32 %v5292_v55, %v5290_v37 }
 0x565   : > { %v5299_v2 = vsel %vm948_vm4, %v5294_v6, %v5298_v14 }
 0x569   : > { %7289 = vmatmul.mubr.msk.bf16.vlgmr.msra.gmra.mrb[16].mxu1 %vm3820_vm8, %v5219_v44  ;;  %v5631_v44 = vrot.slane %v9917_v13, 1 }
 0x56a   : > { %7313 = vmatpush3.bf16.msra.mxu1 %v5493_v56  ;;  %7292 = vmatprep.mubr.msk.bf16.mxu1 %vm3820_vm8, %v5227_v15  ;;  %v5633_v15 = vrot.slane %v9922_v23, 1 }
 0x56b   : > { %7800 = vmatprep.subr.msk.bf16.mxu1 %vm3857_vm7, %v9945_v39 }
 0x56c   : > { %v5634_v28 = vsel %vm1439_vm3, %v5631_v44, %v5633_v15 }
 0x571   : > { %7293 = vmatmul.mubr.msk.bf16.gmra.mrb[20].mxu1 %vm3820_vm8, %v5235_v54  ;;  %v5651_v54 = vrot.slane %v9982_v52, 1 }
 0x572   : > { %7296 = vmatprep.mubr.msk.bf16.mxu1 %vm3820_vm8, %v5243_v11 }
 0x579   : > { %7297 = vmatmul.mubr.msk.bf16.gmra.mrb[24].mxu1 %vm3820_vm8, %v5251_v1 }
 0x57a   : > { %7300 = vmatprep.mubr.msk.bf16.mxu1 %vm3820_vm8, %v5259_v30 }
 0x581   : > { %7301 = vmatmul.mubr.msk.bf16.gmra.mrb[28].mxu1 %vm3820_vm8, %v5267_v22 }
 0x582   : > { %7304 = vmatprep.mubr.msk.bf16.mxu1 %vm3820_vm8, %v5275_v21 }
 0x589   : > { %7305 = vmatmul.mubr.msk.bf16.gmra.mrb[32].mxu1 %vm3820_vm8, %v5283_v24 }
 0x58a   : > { %7308 = vmatprep.mubr.msk.bf16.mxu1 %vm3820_vm8, %v5291_v61 }
 0x591   : > { %7309 = vmatmul.mubr.msk.bf16.gmra.mrb[36].mxu1 %vm3820_vm8, %v5299_v2 }
 0x592   : > { %7314 = vmatprep.mubr.msk.bf16.mxu1 %vm3820_vm8, %v9911_v34  ;;  %v5624_v34 = vld [vmem:[#allocation3 + $0x10] sm:$0xe] }
 0x593   : > { %v6555_v56 = vcombine.low %v5624_v34, %v9905_v3  ;;  %v5636_v3 = vsel %vm1439_vm3, %v5633_v15, %v5635_v51 }
 0x595   : > { %v5630_v47 = vrot.slane %v6555_v56, 1 }
 0x597   : > { %v5632_v39 = vsel %vm1439_vm3, %v5630_v47, %v5631_v44 }
 0x599   : > { %7315 = vmatmul.mubr.msk.bf16.vlgmr.msra.gmra.mrb[16].mxu1 %vm3820_vm8, %v9917_v13  ;;  %v5637_v13 = vrot.slane %v9934_v31, 1 }
 0x59a   : > { %7339 = vmatpush3.bf16.msra.mxu1 %v5692_v5  ;;  %7318 = vmatprep.mubr.msk.bf16.mxu1 %vm3820_vm8, %v9922_v23 }
 0x59b   : > { %v5638_v63 = vsel %vm1439_vm3, %v5635_v51, %v5637_v13  ;;  %v5640_v23 = vsel %vm1439_vm3, %v5637_v13, %v5639_v62 }
 0x5a1   : > { %7319 = vmatmul.mubr.msk.bf16.gmra.mrb[20].mxu1 %vm3820_vm8, %v9929_v16  ;;  %v5641_v16 = vrot.slane %v9949_v29, 1 }
 0x5a2   : > { %7322 = vmatprep.mubr.msk.bf16.mxu1 %vm3820_vm8, %v9934_v31 }
 0x5a3   : > { %v5642_v41 = vsel %vm1439_vm3, %v5639_v62, %v5641_v16  ;;  %v5644_v31 = vsel %vm1439_vm3, %v5641_v16, %v5643_v49 }
 0x5a9   : > { %7323 = vmatmul.mubr.msk.bf16.gmra.mrb[24].mxu1 %vm3820_vm8, %v9942_v8  ;;  %v5645_v8 = vrot.slane %v9963_v20, 1 }
 0x5aa   : > { %7326 = vmatprep.mubr.msk.bf16.mxu1 %vm3820_vm8, %v9949_v29 }
 0x5ab   : > { %v5646_v32 = vsel %vm1439_vm3, %v5643_v49, %v5645_v8  ;;  %v5648_v29 = vsel %vm1439_vm3, %v5645_v8, %v5647_v0 }
 0x5b1   : > { %7327 = vmatmul.mubr.msk.bf16.gmra.mrb[28].mxu1 %vm3820_vm8, %v9958_v10  ;;  %v5649_v10 = vrot.slane %v9975_v57, 1 }
 0x5b2   : > { %7330 = vmatprep.mubr.msk.bf16.mxu1 %vm3820_vm8, %v9963_v20  ;;  %v5653_v20 = vrot.slane %v9991_v19, 1 }
 0x5b3   : > { %v5650_v11 = vsel %vm1439_vm3, %v5647_v0, %v5649_v10  ;;  %v5652_v18 = vsel %vm1439_vm3, %v5649_v10, %v5651_v54 }
 0x5b4   : > { %v5654_v33 = vsel %vm1439_vm3, %v5651_v54, %v5653_v20 }
 0x5b9   : > { %7331 = vmatmul.mubr.msk.bf16.gmra.mrb[32].mxu1 %vm3820_vm8, %v9970_v4 }
 0x5ba   : > { %7334 = vmatprep.mubr.msk.bf16.mxu1 %vm3820_vm8, %v9975_v57 }
 0x5c1   : > { %7335 = vmatmul.mubr.msk.bf16.gmra.mrb[36].mxu1 %vm3820_vm8, %v9982_v52 }
 0x5c2   : > { %7340 = vmatprep.mubr.msk.bf16.mxu1 %vm3820_vm8, %v5632_v39 }
 0x5c9   : > { %7341 = vmatmul.mubr.msk.bf16.vlgmr.msra.gmra.mrb[16].mxu1 %vm3820_vm8, %v5634_v28 }
 0x5ca   : > { %7344 = vmatprep.mubr.msk.bf16.mxu1 %vm3820_vm8, %v5636_v3 }
 0x5d1   : > { %7345 = vmatmul.mubr.msk.bf16.gmra.mrb[20].mxu1 %vm3820_vm8, %v5638_v63 }
 0x5d2   : > { %7348 = vmatprep.mubr.msk.bf16.mxu1 %vm3820_vm8, %v5640_v23 }
 0x5d9   : > { %7349 = vmatmul.mubr.msk.bf16.gmra.mrb[24].mxu1 %vm3820_vm8, %v5642_v41 }
 0x5da   : > { %7352 = vmatprep.mubr.msk.bf16.mxu1 %vm3820_vm8, %v5644_v31 }
 0x5e1   : > { %7353 = vmatmul.mubr.msk.bf16.gmra.mrb[28].mxu1 %vm3820_vm8, %v5646_v32 }
 0x5e2   : > { %7356 = vmatprep.mubr.msk.bf16.mxu1 %vm3820_vm8, %v5648_v29 }
 0x5e9   : > { %7357 = vmatmul.mubr.msk.bf16.gmra.mrb[32].mxu1 %vm3820_vm8, %v5650_v11 }
 0x5ea   : > { %7360 = vmatprep.mubr.msk.bf16.mxu1 %vm3820_vm8, %v5652_v18 }
 0x5f1   : > { %7361 = vmatmul.mubr.msk.bf16.gmra.mrb[36].mxu1 %vm3820_vm8, %v5654_v33 }
 0x69c   : > { %v7342_v59 = vpop.f32.mrb[16].mxu1 }
 0x69d   : > { %v5904_v60 = vadd.f32 %v7342_v59, %v10065_v48  ;;  %v5728_v7 = vpop.f32.mrb[17].mxu1 }
 0x69e   : > { %v5902_v12 = vadd.f32 %v10065_v48, %v5728_v7  ;;  %v7343_v26 = vpop.f32.mrb[18].mxu1 }
 0x69f   : > { %v5928_v4 = vmax.f32 %v5904_v60, 0.0  ;;  %v5905_v1 = vadd.f32 %v7343_v26, %v10065_v48  ;;  %v5731_v30 = vpop.f32.mrb[19].mxu1 }
 0x6a0   : > { %v5926_v36 = vmax.f32 %v5902_v12, 0.0  ;;  %v5903_v57 = vadd.f32 %v10065_v48, %v5731_v30 }
 0x6a1   : > { %5952 = vst.msk [vmem:[%s10071_s22 + $0x10] sm:$0xff] %vm3820_vm8, %v5928_v4  ;;  %v5929_v43 = vmax.f32 %v5905_v1, 0.0 }
 0x6a2   : > { %5950 = vst.msk [vmem:[%s10071_s22] sm:$0xff] %vm3820_vm8, %v5926_v36  ;;  %v5927_v58 = vmax.f32 %v5903_v57, 0.0 }
 0x6a3   : > { %5953 = vst.msk [vmem:[%s10071_s22 + $0x18] sm:$0xff] %vm3820_vm8, %v5929_v43 }
 0x6a4   : > { %5951 = vst.msk [vmem:[%s10071_s22 + $0x8] sm:$0xff] %vm3820_vm8, %v5927_v58  ;;  %v7346_v35 = vpop.f32.mrb[20].mxu1 }
 0x6a5   : > { %v5908_v40 = vadd.f32 %v7346_v35, %v10065_v48  ;;  %v5744_v25 = vpop.f32.mrb[21].mxu1 }
 0x6a6   : > { %v5906_v17 = vadd.f32 %v10065_v48, %v5744_v25  ;;  %v7347_v45 = vpop.f32.mrb[22].mxu1 }
 0x6a7   : > { %v5932_v52 = vmax.f32 %v5908_v40, 0.0  ;;  %v5909_v22 = vadd.f32 %v7347_v45, %v10065_v48  ;;  %v5747_v21 = vpop.f32.mrb[23].mxu1 }
 0x6a8   : > { %v5930_v38 = vmax.f32 %v5906_v17, 0.0  ;;  %v5907_v42 = vadd.f32 %v10065_v48, %v5747_v21 }
 0x6a9   : > { %5956 = vst.msk [vmem:[%s10071_s22 + $0x30] sm:$0xff] %vm3820_vm8, %v5932_v52  ;;  %v5933_v50 = vmax.f32 %v5909_v22, 0.0 }
 0x6aa   : > { %5954 = vst.msk [vmem:[%s10071_s22 + $0x20] sm:$0xff] %vm3820_vm8, %v5930_v38  ;;  %v5931_v9 = vmax.f32 %v5907_v42, 0.0 }
 0x6ab   : > { %5957 = vst.msk [vmem:[%s10071_s22 + $0x38] sm:$0xff] %vm3820_vm8, %v5933_v50 }
 0x6ac   : > { %5955 = vst.msk [vmem:[%s10071_s22 + $0x28] sm:$0xff] %vm3820_vm8, %v5931_v9  ;;  %v7350_v46 = vpop.f32.mrb[24].mxu1 }
 0x6ad   : > { %v5912_v53 = vadd.f32 %v7350_v46, %v10065_v48  ;;  %v5760_v19 = vpop.f32.mrb[25].mxu1 }
 0x6ae   : > { %v5910_v37 = vadd.f32 %v10065_v48, %v5760_v19  ;;  %v7351_v24 = vpop.f32.mrb[26].mxu1 }
 0x6af   : > { %v5936_v27 = vmax.f32 %v5912_v53, 0.0  ;;  %v5913_v61 = vadd.f32 %v7351_v24, %v10065_v48  ;;  %v5763_v55 = vpop.f32.mrb[27].mxu1 }
 0x6b0   : > { %v5934_v6 = vmax.f32 %v5910_v37, 0.0  ;;  %v5911_v14 = vadd.f32 %v10065_v48, %v5763_v55 }
 0x6b1   : > { %5960 = vst.msk [vmem:[%s10071_s22 + $0x50] sm:$0xff] %vm3820_vm8, %v5936_v27  ;;  %v5937_v2 = vmax.f32 %v5913_v61, 0.0 }
 0x6b2   : > { %5958 = vst.msk [vmem:[%s10071_s22 + $0x40] sm:$0xff] %vm3820_vm8, %v5934_v6  ;;  %v5935_v5 = vmax.f32 %v5911_v14, 0.0 }
 0x6b3   : > { %5961 = vst.msk [vmem:[%s10071_s22 + $0x58] sm:$0xff] %vm3820_vm8, %v5937_v2 }
 0x6b4   : > { %5959 = vst.msk [vmem:[%s10071_s22 + $0x48] sm:$0xff] %vm3820_vm8, %v5935_v5  ;;  %v7354_v34 = vpop.f32.mrb[28].mxu1 }
 0x6b5   : > { %v5916_v56 = vadd.f32 %v7354_v34, %v10065_v48  ;;  %v5776_v47 = vpop.f32.mrb[29].mxu1 }
 0x6b6   : > { %v5914_v44 = vadd.f32 %v10065_v48, %v5776_v47  ;;  %v7355_v39 = vpop.f32.mrb[30].mxu1 }
 0x6b7   : > { %v5940_v15 = vmax.f32 %v5916_v56, 0.0  ;;  %v5917_v51 = vadd.f32 %v7355_v39, %v10065_v48  ;;  %v5779_v28 = vpop.f32.mrb[31].mxu1 }
 0x6b8   : > { %v5938_v3 = vmax.f32 %v5914_v44, 0.0  ;;  %v5915_v13 = vadd.f32 %v10065_v48, %v5779_v28 }
 0x6b9   : > { %5964 = vst.msk [vmem:[%s10071_s22 + $0x70] sm:$0xff] %vm3820_vm8, %v5940_v15  ;;  %v5941_v62 = vmax.f32 %v5917_v51, 0.0 }
 0x6ba   : > { %5962 = vst.msk [vmem:[%s10071_s22 + $0x60] sm:$0xff] %vm3820_vm8, %v5938_v3  ;;  %v5939_v63 = vmax.f32 %v5915_v13, 0.0 }
 0x6bb   : > { %5965 = vst.msk [vmem:[%s10071_s22 + $0x78] sm:$0xff] %vm3820_vm8, %v5941_v62 }
 0x6bc   : > { %5963 = vst.msk [vmem:[%s10071_s22 + $0x68] sm:$0xff] %vm3820_vm8, %v5939_v63  ;;  %v7358_v23 = vpop.f32.mrb[32].mxu1 }
 0x6bd   : > { %v5920_v16 = vadd.f32 %v7358_v23, %v10065_v48  ;;  %v5792_v49 = vpop.f32.mrb[33].mxu1 }
 0x6be   : > { %v5918_v41 = vadd.f32 %v10065_v48, %v5792_v49  ;;  %v7359_v31 = vpop.f32.mrb[34].mxu1 }
 0x6bf   : > { %v5944_v8 = vmax.f32 %v5920_v16, 0.0  ;;  %v5921_v0 = vadd.f32 %v7359_v31, %v10065_v48  ;;  %v5795_v32 = vpop.f32.mrb[35].mxu1 }
 0x6c0   : > { %v5942_v29 = vmax.f32 %v5918_v41, 0.0  ;;  %v5919_v10 = vadd.f32 %v10065_v48, %v5795_v32 }
 0x6c1   : > { %5968 = vst.msk [vmem:[%s10071_s22 + $0x90] sm:$0xff] %vm3820_vm8, %v5944_v8  ;;  %v5945_v54 = vmax.f32 %v5921_v0, 0.0 }
 0x6c2   : > { %5966 = vst.msk [vmem:[%s10071_s22 + $0x80] sm:$0xff] %vm3820_vm8, %v5942_v29  ;;  %v5943_v11 = vmax.f32 %v5919_v10, 0.0 }
 0x6c3   : > { %5969 = vst.msk [vmem:[%s10071_s22 + $0x98] sm:$0xff] %vm3820_vm8, %v5945_v54 }
 0x6c4   : > { %5967 = vst.msk [vmem:[%s10071_s22 + $0x88] sm:$0xff] %vm3820_vm8, %v5943_v11  ;;  %v7362_v18 = vpop.f32.mrb[36].mxu1 }
 0x6c5   : > { %v5924_v20 = vadd.f32 %v7362_v18, %v10065_v48  ;;  %v5808_v33 = vpop.f32.mrb[37].mxu1 }
 0x6c6   : > { %v5922_v59 = vadd.f32 %v10065_v48, %v5808_v33  ;;  %v7363_v60 = vpop.f32.mrb[38].mxu1 }
 0x6c7   : > { %v5948_v7 = vmax.f32 %v5924_v20, 0.0  ;;  %v5925_v12 = vadd.f32 %v7363_v60, %v10065_v48  ;;  %v5811_v26 = vpop.f32.mrb[39].mxu1 }
 0x6c8   : > { %v5946_v4 = vmax.f32 %v5922_v59, 0.0  ;;  %v5923_v1 = vadd.f32 %v10065_v48, %v5811_v26 }
 0x6c9   : > { %5972 = vst.msk [vmem:[%s10071_s22 + $0xb0] sm:$0xff] %vm3820_vm8, %v5948_v7  ;;  %v5949_v30 = vmax.f32 %v5925_v12, 0.0 }
 0x6ca   : > { %5970 = vst.msk [vmem:[%s10071_s22 + $0xa0] sm:$0xff] %vm3820_vm8, %v5946_v4  ;;  %v5947_v36 = vmax.f32 %v5923_v1, 0.0 }
 0x6cb   : > { %5973 = vst.msk [vmem:[%s10071_s22 + $0xb8] sm:$0xff] %vm3820_vm8, %v5949_v30 }
 0x6cc   : > { %5971 = vst.msk [vmem:[%s10071_s22 + $0xa8] sm:$0xff] %vm3820_vm8, %v5947_v36 }
 0x6cd   : > { %8264 = shalt.err (!%p8261_p10)
}
 0x6ce   : > { %s8265_s18 = scalar_lea.hbm %s10140_s13, 3072  ;;  %s8269_s27 = scalar_lea.hbm %s10297_s11, 6144 }
 0x6cf   : > { %p8266_p4 = scmp.ne.s32.totalorder %s10140_s13, %s8265_s18  ;;  %p8270_p11 = scmp.lt.u32.totalorder %s10140_s13, %s10297_s11 }
 0x6d0   : > { %p8271_p13 = scmp.lt.u32.totalorder %s8269_s27, %s8265_s18  ;;  %p8273_p9 = scmp.lt.u32.totalorder %s8265_s18, %s10140_s13 }
 0x6d1   : > { %p8267_p6 = pnand %p8266_p4, %p10298_p0 }
 0x6d2   : > { %p8272_p12 = por %p8271_p13, %p8270_p11 }
 0x6d3   : > { %p8268_p1 = pneg %p8267_p6 }
 0x6d4   : > { %p8274_p3 = por %p8273_p9, %p8272_p12 }
 0x6d6   : > { %p8275_p2 = pnand %p8274_p3, %p8268_p1 }
 0x6d8   : > { %8278 = shalt.err (!%p8275_p2)
}
 0x6d9   : > { %s8370_s25 = smov 128   ;;  %s8371_s28 = smov 8  }
 0x6da   : > { %7830 = dma.vmem_to_hbm [thread:$0]  (%p10298_p0), %s10144_s24, 3072, %s10140_s13, %s5975_s9, %s8370_s25, %s8370_s25, %s8371_s28  }
 0x6db PF: > { %s10299_s29 = sld [smem:[#allocation26_spill]]  ;;  %s10300_s30 = sld [smem:[#allocation33_spill]] }
 0x6dc   : > { %p10302_p7 = scmp.ge.s32.totalorder %s8353_s10, 2 }
 0x6e1   : > { %s6005_s20 = sand.u32 1, %s10299_s29   ;;  %p10301_p5 = scmp.ne.s32.totalorder %s10300_s30, 0 }
 0x6e2   : > { %s6006_s22 = scalar_lea.sflag [#allocation6], %s6005_s20 }
 0x6e3   : > { %p7859_p8 = pnand %p10302_p7, %p10301_p5 }
 0x6e5   : > { %8328 = dma.done.wait (!%p7859_p8), %s6006_s22, 3072  }
 0x6e6   : > { %8330 = vsyncadd (!%p7859_p8), %s6006_s22, 4294964224  ;;  %s32_s10 = sadd.s32 1, %s8353_s10   ;;  %s10303_s27 = sld [smem:[#allocation27_spill]] }
 0x6e7   : > { %p29_p10 = scmp.ge.s32.totalorder %s32_s10, 4   ;;  %s10304_s28 = sld [smem:[#allocation28_spill]] }
 0x6e8   : > { %s10305_s29 = sld [smem:[#allocation37_spill]]  ;;  %s10306_s30 = sld [smem:[#allocation30_spill]] }
 0x6e9   : > { %s10307_s9 = sld [smem:[#allocation35_spill]]  ;;  %31 = sbr.rel (!%p29_p10) target bundleno = 18 (0x12), region = 166 }
 0x6f0   :  { %6011 = vsyncpa [#allocation5], 1 }
 0x6f1   :  { %6013 = vsyncpa [#allocation5 + $0x1], 1 }
 0x6f2   :  { %6014 = vsyncpa [#allocation8], 1 }
 0x6f3   :  { %6016 = vsyncpa [#allocation8 + $0x1], 1 }
 0x6f4   :  { %6017 = vsyncpa [#allocation11], 1 }
 0x6f5   :  { %6019 = vsyncpa [#allocation11 + $0x1], 1 }
 0x6f6   :  { %6020 = vsyncpa [#allocation14], 1 }
 0x6f7   :  { %6021 = vsyncpa [#allocation17], 1 }
 0x6f8   :  { %6022 = vsyncpa [#allocation6], 1 }
 0x6f9   :  { %6024 = vsyncpa [#allocation6 + $0x1], 1 }

</bundles_post_ra>
